<compile_context>
chip_gen: v6e
topology: v6e:2x2x1
jax: 0.10.0
libtpu: 0.0.40
codegen_flags: <defaults>
</compile_context>

<pallas_src>
import functools
import math

import jax
import jax.numpy as jnp
from jax import lax
from jax.experimental import pallas as pl
from jax.experimental.pallas import tpu as pltpu


# ----------------------------- Pallas kernel --------------------------------

def fused_mha_kernel(x_ref, w_ref, b_ref, o_ref, ctx_scratch, *, n_heads):
    # x_ref:  (1, S, D)  bf16
    # w_ref:  (D, 3D)    bf16   columns grouped [Q_all | K_all | V_all], scale folded into Q
    # b_ref:  (1, 3D)    f32    same grouping / scaling
    # o_ref:  (1, S, D)  bf16
    # ctx_scratch: (S, D) f32 VMEM scratch
    S = x_ref.shape[1]
    D = x_ref.shape[2]
    H = n_heads
    D_h = D // H

    # --- QKV projection: bf16 operands, f32 accumulation on the MXU ---
    qkv = jnp.dot(x_ref[0], w_ref[...], preferred_element_type=jnp.float32)
    qkv = qkv + b_ref[...]                      # (S, 3D) f32, bias broadcast over S
    qkv_bf = qkv.astype(jnp.bfloat16)           # single cast; all slices below are bf16

    # Lane-aligned (S, D) slabs.
    q_all = qkv_bf[:, 0:D]
    k_all = qkv_bf[:, D:2 * D]
    v_all = qkv_bf[:, 2 * D:3 * D]

    for h in range(H):                          # unrolled at trace time (H small)
        lo = h * D_h
        hi = lo + D_h
        q = q_all[:, lo:hi]                     # (S, D_h) bf16  (scale already folded in)
        k = k_all[:, lo:hi]
        v = v_all[:, lo:hi]

        # scores = (q * scale) @ k^T, contraction over D_h (no explicit transpose).
        s = lax.dot_general(
            q, k,
            dimension_numbers=(((1,), (1,)), ((), ())),
            preferred_element_type=jnp.float32,
        )                                       # (S, S) f32

        # numerically-stable softmax in f32; divide via EUP reciprocal.
        m = jnp.max(s, axis=-1, keepdims=True)
        p = jnp.exp(s - m)
        l = jnp.sum(p, axis=-1, keepdims=True)
        w_attn = p * pl.reciprocal(l, approx=True)
        # TODO(synk): dropout_p=0.1 of F.scaled_dot_product_attention is omitted
        # (inference / deterministic semantics).

        ctx = jnp.dot(w_attn.astype(jnp.bfloat16), v,
                      preferred_element_type=jnp.float32)   # (S, D_h) f32

        # Scatter this head's context into the scratch slab; bounds live ranges.
        ctx_scratch[:, lo:hi] = ctx

    # Single lane-dense (S, D) store; head order matches context.transpose(1,2).view(B,S,D).
    o_ref[0] = ctx_scratch[...].astype(o_ref.dtype)


# ------------------------------ Python wrapper -------------------------------

def multihead_attention(x, w_qkv, b_qkv, n_heads, out_dtype=jnp.bfloat16):
    """Pallas implementation of MultiheadAttention.forward (mask=None, eval).

    w_qkv: (D, 3D) with the PyTorch layout implied by view(B,S,H,3,D_h), i.e.
    columns interleaved per head as [q_h | k_h | v_h]. b_qkv: (3D,).
    """
    B, S, D = x.shape
    H = n_heads
    assert D % H == 0
    D_h = D // H
    scale = 1.0 / math.sqrt(D_h)

    # --- wrapper-side layout prep (free relative to the kernel) ---------------
    # De-interleave columns into [Q_all | K_all | V_all] (heads contiguous within
    # each block) and fold the softmax scale into the Q columns and Q bias.
    w4 = w_qkv.reshape(D, H, 3, D_h)                      # (D, H, 3, D_h)
    b3 = b_qkv.reshape(H, 3, D_h)                         # (H, 3, D_h)
    w_q = w4[:, :, 0, :].reshape(D, D) * scale
    w_k = w4[:, :, 1, :].reshape(D, D)
    w_v = w4[:, :, 2, :].reshape(D, D)
    b_q = b3[:, 0, :].reshape(D) * scale
    b_k = b3[:, 1, :].reshape(D)
    b_v = b3[:, 2, :].reshape(D)
    w_grouped = jnp.concatenate([w_q, w_k, w_v], axis=1).astype(jnp.bfloat16)   # (D, 3D)
    b_grouped = jnp.concatenate([b_q, b_k, b_v]).reshape(1, 3 * D).astype(jnp.float32)

    x_bf = x.astype(jnp.bfloat16)

    kernel = functools.partial(fused_mha_kernel, n_heads=H)

    # Advisory cost hint for the XLA scheduler.
    flops = B * (2 * S * D * (3 * D) + H * (4 * S * S * D_h))
    transcendentals = B * H * S * S                        # exp in softmax
    bytes_accessed = (x_bf.size * 2 + w_grouped.size * 2 + b_grouped.size * 4
                      + B * S * D * jnp.dtype(out_dtype).itemsize)

    return pl.pallas_call(
        kernel,
        out_shape=jax.ShapeDtypeStruct((B, S, D), out_dtype),
        grid=(B,),
        in_specs=[
            pl.BlockSpec((1, S, D), lambda i: (i, 0, 0)),        # x slab for this batch
            pl.BlockSpec((D, 3 * D), lambda i: (0, 0)),          # weight (resident, not re-fetched)
            pl.BlockSpec((1, 3 * D), lambda i: (0, 0)),          # bias
        ],
        out_specs=pl.BlockSpec((1, S, D), lambda i: (i, 0, 0)),  # lane-dense (S, D) output slab
        scratch_shapes=[pltpu.VMEM((S, D), jnp.float32)],        # per-head context scatter target
        compiler_params=pltpu.CompilerParams(
            dimension_semantics=("parallel",),                   # batches shard across TCs (v7x)
        ),
        cost_estimate=pl.CostEstimate(
            flops=flops,
            transcendentals=transcendentals,
            bytes_accessed=bytes_accessed,
        ),
    )(x_bf, w_grouped, b_grouped)
    # TODO(synk): for S beyond ~1-2K (notably v7x's 64 MiB VMEM), switch to
    # flash-style K/V blocking with a VMEM accumulator and row-tile the QKV
    # projection; also transpose each K tile once per KV block there.


# ---------------------------- pure-JAX reference -----------------------------

def reference(x, w_qkv, b_qkv, n_heads):
    B, S, D = x.shape
    H = n_heads
    D_h = D // H
    qkv = x @ w_qkv + b_qkv
    qkv = qkv.reshape(B, S, H, 3, D_h).transpose(0, 2, 3, 1, 4)   # (B, H, 3, S, D_h)
    q, k, v = qkv[:, :, 0], qkv[:, :, 1], qkv[:, :, 2]
    scores = jnp.einsum("bhqd,bhkd->bhqk", q, k) / math.sqrt(D_h)
    weights = jax.nn.softmax(scores, axis=-1)
    ctx = jnp.einsum("bhqk,bhkd->bhqd", weights, v)
    return ctx.transpose(0, 2, 1, 3).reshape(B, S, D)


# ----------------------------------- main ------------------------------------

if __name__ == "__main__":
    # Small, module-consistent shapes: n_dim=256, n_heads=8 -> D_h=32, B=2, S=128.
    B, S, D, H = 2, 128, 256, 8

    key = jax.random.PRNGKey(0)
    kx, kw, kb = jax.random.split(key, 3)

    x = jax.random.normal(kx, (B, S, D), dtype=jnp.float32)

    # nn.Linear(D, 3D): PyTorch-style uniform(-1/sqrt(D), 1/sqrt(D)) init.
    bound = 1.0 / math.sqrt(D)
    w_qkv = jax.random.uniform(kw, (D, 3 * D), minval=-bound, maxval=bound, dtype=jnp.float32)
    b_qkv = jax.random.uniform(kb, (3 * D,), minval=-bound, maxval=bound, dtype=jnp.float32)

    out = multihead_attention(x, w_qkv, b_qkv, H)
    out = jax.block_until_ready(out)

    ref = reference(x, w_qkv, b_qkv, H)
    assert out.shape == (B, S, D)
    # bf16 matmul operands / bf16 output (f32 accumulate) -> loosened tolerance vs f32 reference.
    assert jnp.allclose(out.astype(jnp.float32), ref, atol=5e-2, rtol=5e-2), \
        "Pallas output mismatch vs reference"

    print("KERNEL_OK")
</pallas_src>

<mosaic_0001>
module attributes {stable_mosaic.version = 11 : i64} {
  func.func @fused_mha_kernel(%arg0: i32, %arg1: memref<1x128x256xbf16, #tpu.memory_space<vmem>>, %arg2: memref<256x768xbf16, #tpu.memory_space<vmem>>, %arg3: memref<1x768xf32, #tpu.memory_space<vmem>>, %arg4: memref<1x128x256xbf16, #tpu.memory_space<vmem>>, %arg5: memref<128x256xf32, #tpu.memory_space<vmem>>) attributes {dimension_semantics = [#tpu.dimension_semantics<parallel>], iteration_bounds = array<i64: 2>, scalar_prefetch = 0 : i64, scratch_operands = 1 : i64, tpu.core_type = #tpu.core_type<tc>, window_params = [{transform_indices = @transform_0, window_bounds = array<i64: 1, 128, 256>}, {pipeline_mode = #tpu.pipeline_mode<synchronous>, transform_indices = @transform_1, window_bounds = array<i64: 256, 768>}, {pipeline_mode = #tpu.pipeline_mode<synchronous>, transform_indices = @transform_2, window_bounds = array<i64: 1, 768>}, {transform_indices = @transform_3, window_bounds = array<i64: 1, 128, 256>}]} {
    %c0 = arith.constant 0 : index
    %c0_0 = arith.constant 0 : index
    %c0_1 = arith.constant 0 : index
    %0 = vector.load %arg1[%c0, %c0_0, %c0_1] : memref<1x128x256xbf16, #tpu.memory_space<vmem>>, vector<1x128x256xbf16>
    %1 = vector.shape_cast %0 : vector<1x128x256xbf16> to vector<128x256xbf16>
    %c0_2 = arith.constant 0 : index
    %c0_3 = arith.constant 0 : index
    %2 = vector.load %arg2[%c0_2, %c0_3] : memref<256x768xbf16, #tpu.memory_space<vmem>>, vector<256x768xbf16>
    %cst = arith.constant dense<0.000000e+00> : vector<128x768xf32>
    %3 = tpu.matmul %1, %2, %cst {dimension_numbers = #tpu.dot_dimension_numbers<[1], [0], [0], [1], [0, 0, 1, 1], [], []>} : vector<128x256xbf16>, vector<256x768xbf16>, vector<128x768xf32> -> vector<128x768xf32>
    %c0_4 = arith.constant 0 : index
    %c0_5 = arith.constant 0 : index
    %4 = vector.load %arg3[%c0_4, %c0_5] : memref<1x768xf32, #tpu.memory_space<vmem>>, vector<1x768xf32>
    %5 = vector.broadcast %4 : vector<1x768xf32> to vector<128x768xf32>
    %6 = arith.addf %3, %5 : vector<128x768xf32>
    %7 = arith.truncf %6 : vector<128x768xf32> to vector<128x768xbf16>
    %8 = vector.extract_strided_slice %7 {offsets = [0, 0], sizes = [128, 256], strides = [1, 1]} : vector<128x768xbf16> to vector<128x256xbf16>
    %9 = vector.extract_strided_slice %7 {offsets = [0, 256], sizes = [128, 256], strides = [1, 1]} : vector<128x768xbf16> to vector<128x256xbf16>
    %10 = vector.extract_strided_slice %7 {offsets = [0, 512], sizes = [128, 256], strides = [1, 1]} : vector<128x768xbf16> to vector<128x256xbf16>
    %11 = vector.extract_strided_slice %8 {offsets = [0, 0], sizes = [128, 32], strides = [1, 1]} : vector<128x256xbf16> to vector<128x32xbf16>
    %12 = vector.extract_strided_slice %9 {offsets = [0, 0], sizes = [128, 32], strides = [1, 1]} : vector<128x256xbf16> to vector<128x32xbf16>
    %13 = vector.extract_strided_slice %10 {offsets = [0, 0], sizes = [128, 32], strides = [1, 1]} : vector<128x256xbf16> to vector<128x32xbf16>
    %cst_6 = arith.constant dense<0.000000e+00> : vector<128x128xf32>
    %14 = tpu.matmul %11, %12, %cst_6 {dimension_numbers = #tpu.dot_dimension_numbers<[1], [1], [0], [0], [0, 0, 1, 0], [], []>} : vector<128x32xbf16>, vector<128x32xbf16>, vector<128x128xf32> -> vector<128x128xf32>
    %cst_7 = arith.constant dense<0xFF800000> : vector<128xf32>
    %15 = vector.multi_reduction <maximumf>, %14, %cst_7 [1] : vector<128x128xf32> to vector<128xf32>
    %16 = vector.shape_cast %15 : vector<128xf32> to vector<128x1xf32>
    %17 = vector.broadcast %16 : vector<128x1xf32> to vector<128x128xf32>
    %18 = arith.subf %14, %17 : vector<128x128xf32>
    %19 = math.exp %18 : vector<128x128xf32>
    %cst_8 = arith.constant dense<0.000000e+00> : vector<128xf32>
    %20 = vector.multi_reduction <add>, %19, %cst_8 [1] : vector<128x128xf32> to vector<128xf32>
    %21 = vector.shape_cast %20 : vector<128xf32> to vector<128x1xf32>
    %22 = tpu.reciprocal %21 {approx = true} : vector<128x1xf32> -> vector<128x1xf32>
    %23 = vector.broadcast %22 : vector<128x1xf32> to vector<128x128xf32>
    %24 = arith.mulf %19, %23 : vector<128x128xf32>
    %25 = arith.truncf %24 : vector<128x128xf32> to vector<128x128xbf16>
    %cst_9 = arith.constant dense<0.000000e+00> : vector<128x32xf32>
    %26 = tpu.matmul %25, %13, %cst_9 {dimension_numbers = #tpu.dot_dimension_numbers<[1], [0], [0], [1], [0, 0, 1, 1], [], []>} : vector<128x128xbf16>, vector<128x32xbf16>, vector<128x32xf32> -> vector<128x32xf32>
    %c0_10 = arith.constant 0 : index
    %c0_11 = arith.constant 0 : index
    %27 = vector.load %arg5[%c0_10, %c0_11] : memref<128x256xf32, #tpu.memory_space<vmem>>, vector<128x32xf32>
    tpu.vector_store %arg5[%c0_10, %c0_11], %26 {strides = array<i32>} : memref<128x256xf32, #tpu.memory_space<vmem>>, vector<128x32xf32>,
    %28 = vector.extract_strided_slice %8 {offsets = [0, 32], sizes = [128, 32], strides = [1, 1]} : vector<128x256xbf16> to vector<128x32xbf16>
    %29 = vector.extract_strided_slice %9 {offsets = [0, 32], sizes = [128, 32], strides = [1, 1]} : vector<128x256xbf16> to vector<128x32xbf16>
    %30 = vector.extract_strided_slice %10 {offsets = [0, 32], sizes = [128, 32], strides = [1, 1]} : vector<128x256xbf16> to vector<128x32xbf16>
    %cst_12 = arith.constant dense<0.000000e+00> : vector<128x128xf32>
    %31 = tpu.matmul %28, %29, %cst_12 {dimension_numbers = #tpu.dot_dimension_numbers<[1], [1], [0], [0], [0, 0, 1, 0], [], []>} : vector<128x32xbf16>, vector<128x32xbf16>, vector<128x128xf32> -> vector<128x128xf32>
    %cst_13 = arith.constant dense<0xFF800000> : vector<128xf32>
    %32 = vector.multi_reduction <maximumf>, %31, %cst_13 [1] : vector<128x128xf32> to vector<128xf32>
    %33 = vector.shape_cast %32 : vector<128xf32> to vector<128x1xf32>
    %34 = vector.broadcast %33 : vector<128x1xf32> to vector<128x128xf32>
    %35 = arith.subf %31, %34 : vector<128x128xf32>
    %36 = math.exp %35 : vector<128x128xf32>
    %cst_14 = arith.constant dense<0.000000e+00> : vector<128xf32>
    %37 = vector.multi_reduction <add>, %36, %cst_14 [1] : vector<128x128xf32> to vector<128xf32>
    %38 = vector.shape_cast %37 : vector<128xf32> to vector<128x1xf32>
    %39 = tpu.reciprocal %38 {approx = true} : vector<128x1xf32> -> vector<128x1xf32>
    %40 = vector.broadcast %39 : vector<128x1xf32> to vector<128x128xf32>
    %41 = arith.mulf %36, %40 : vector<128x128xf32>
    %42 = arith.truncf %41 : vector<128x128xf32> to vector<128x128xbf16>
    %cst_15 = arith.constant dense<0.000000e+00> : vector<128x32xf32>
    %43 = tpu.matmul %42, %30, %cst_15 {dimension_numbers = #tpu.dot_dimension_numbers<[1], [0], [0], [1], [0, 0, 1, 1], [], []>} : vector<128x128xbf16>, vector<128x32xbf16>, vector<128x32xf32> -> vector<128x32xf32>
    %c0_16 = arith.constant 0 : index
    %c32 = arith.constant 32 : index
    %44 = vector.load %arg5[%c0_16, %c32] : memref<128x256xf32, #tpu.memory_space<vmem>>, vector<128x32xf32>
    tpu.vector_store %arg5[%c0_16, %c32], %43 {strides = array<i32>} : memref<128x256xf32, #tpu.memory_space<vmem>>, vector<128x32xf32>,
    %45 = vector.extract_strided_slice %8 {offsets = [0, 64], sizes = [128, 32], strides = [1, 1]} : vector<128x256xbf16> to vector<128x32xbf16>
    %46 = vector.extract_strided_slice %9 {offsets = [0, 64], sizes = [128, 32], strides = [1, 1]} : vector<128x256xbf16> to vector<128x32xbf16>
    %47 = vector.extract_strided_slice %10 {offsets = [0, 64], sizes = [128, 32], strides = [1, 1]} : vector<128x256xbf16> to vector<128x32xbf16>
    %cst_17 = arith.constant dense<0.000000e+00> : vector<128x128xf32>
    %48 = tpu.matmul %45, %46, %cst_17 {dimension_numbers = #tpu.dot_dimension_numbers<[1], [1], [0], [0], [0, 0, 1, 0], [], []>} : vector<128x32xbf16>, vector<128x32xbf16>, vector<128x128xf32> -> vector<128x128xf32>
    %cst_18 = arith.constant dense<0xFF800000> : vector<128xf32>
    %49 = vector.multi_reduction <maximumf>, %48, %cst_18 [1] : vector<128x128xf32> to vector<128xf32>
    %50 = vector.shape_cast %49 : vector<128xf32> to vector<128x1xf32>
    %51 = vector.broadcast %50 : vector<128x1xf32> to vector<128x128xf32>
    %52 = arith.subf %48, %51 : vector<128x128xf32>
    %53 = math.exp %52 : vector<128x128xf32>
    %cst_19 = arith.constant dense<0.000000e+00> : vector<128xf32>
    %54 = vector.multi_reduction <add>, %53, %cst_19 [1] : vector<128x128xf32> to vector<128xf32>
    %55 = vector.shape_cast %54 : vector<128xf32> to vector<128x1xf32>
    %56 = tpu.reciprocal %55 {approx = true} : vector<128x1xf32> -> vector<128x1xf32>
    %57 = vector.broadcast %56 : vector<128x1xf32> to vector<128x128xf32>
    %58 = arith.mulf %53, %57 : vector<128x128xf32>
    %59 = arith.truncf %58 : vector<128x128xf32> to vector<128x128xbf16>
    %cst_20 = arith.constant dense<0.000000e+00> : vector<128x32xf32>
    %60 = tpu.matmul %59, %47, %cst_20 {dimension_numbers = #tpu.dot_dimension_numbers<[1], [0], [0], [1], [0, 0, 1, 1], [], []>} : vector<128x128xbf16>, vector<128x32xbf16>, vector<128x32xf32> -> vector<128x32xf32>
    %c0_21 = arith.constant 0 : index
    %c64 = arith.constant 64 : index
    %61 = vector.load %arg5[%c0_21, %c64] : memref<128x256xf32, #tpu.memory_space<vmem>>, vector<128x32xf32>
    tpu.vector_store %arg5[%c0_21, %c64], %60 {strides = array<i32>} : memref<128x256xf32, #tpu.memory_space<vmem>>, vector<128x32xf32>,
    %62 = vector.extract_strided_slice %8 {offsets = [0, 96], sizes = [128, 32], strides = [1, 1]} : vector<128x256xbf16> to vector<128x32xbf16>
    %63 = vector.extract_strided_slice %9 {offsets = [0, 96], sizes = [128, 32], strides = [1, 1]} : vector<128x256xbf16> to vector<128x32xbf16>
    %64 = vector.extract_strided_slice %10 {offsets = [0, 96], sizes = [128, 32], strides = [1, 1]} : vector<128x256xbf16> to vector<128x32xbf16>
    %cst_22 = arith.constant dense<0.000000e+00> : vector<128x128xf32>
    %65 = tpu.matmul %62, %63, %cst_22 {dimension_numbers = #tpu.dot_dimension_numbers<[1], [1], [0], [0], [0, 0, 1, 0], [], []>} : vector<128x32xbf16>, vector<128x32xbf16>, vector<128x128xf32> -> vector<128x128xf32>
    %cst_23 = arith.constant dense<0xFF800000> : vector<128xf32>
    %66 = vector.multi_reduction <maximumf>, %65, %cst_23 [1] : vector<128x128xf32> to vector<128xf32>
    %67 = vector.shape_cast %66 : vector<128xf32> to vector<128x1xf32>
    %68 = vector.broadcast %67 : vector<128x1xf32> to vector<128x128xf32>
    %69 = arith.subf %65, %68 : vector<128x128xf32>
    %70 = math.exp %69 : vector<128x128xf32>
    %cst_24 = arith.constant dense<0.000000e+00> : vector<128xf32>
    %71 = vector.multi_reduction <add>, %70, %cst_24 [1] : vector<128x128xf32> to vector<128xf32>
    %72 = vector.shape_cast %71 : vector<128xf32> to vector<128x1xf32>
    %73 = tpu.reciprocal %72 {approx = true} : vector<128x1xf32> -> vector<128x1xf32>
    %74 = vector.broadcast %73 : vector<128x1xf32> to vector<128x128xf32>
    %75 = arith.mulf %70, %74 : vector<128x128xf32>
    %76 = arith.truncf %75 : vector<128x128xf32> to vector<128x128xbf16>
    %cst_25 = arith.constant dense<0.000000e+00> : vector<128x32xf32>
    %77 = tpu.matmul %76, %64, %cst_25 {dimension_numbers = #tpu.dot_dimension_numbers<[1], [0], [0], [1], [0, 0, 1, 1], [], []>} : vector<128x128xbf16>, vector<128x32xbf16>, vector<128x32xf32> -> vector<128x32xf32>
    %c0_26 = arith.constant 0 : index
    %c96 = arith.constant 96 : index
    %78 = vector.load %arg5[%c0_26, %c96] : memref<128x256xf32, #tpu.memory_space<vmem>>, vector<128x32xf32>
    tpu.vector_store %arg5[%c0_26, %c96], %77 {strides = array<i32>} : memref<128x256xf32, #tpu.memory_space<vmem>>, vector<128x32xf32>,
    %79 = vector.extract_strided_slice %8 {offsets = [0, 128], sizes = [128, 32], strides = [1, 1]} : vector<128x256xbf16> to vector<128x32xbf16>
    %80 = vector.extract_strided_slice %9 {offsets = [0, 128], sizes = [128, 32], strides = [1, 1]} : vector<128x256xbf16> to vector<128x32xbf16>
    %81 = vector.extract_strided_slice %10 {offsets = [0, 128], sizes = [128, 32], strides = [1, 1]} : vector<128x256xbf16> to vector<128x32xbf16>
    %cst_27 = arith.constant dense<0.000000e+00> : vector<128x128xf32>
    %82 = tpu.matmul %79, %80, %cst_27 {dimension_numbers = #tpu.dot_dimension_numbers<[1], [1], [0], [0], [0, 0, 1, 0], [], []>} : vector<128x32xbf16>, vector<128x32xbf16>, vector<128x128xf32> -> vector<128x128xf32>
    %cst_28 = arith.constant dense<0xFF800000> : vector<128xf32>
    %83 = vector.multi_reduction <maximumf>, %82, %cst_28 [1] : vector<128x128xf32> to vector<128xf32>
    %84 = vector.shape_cast %83 : vector<128xf32> to vector<128x1xf32>
    %85 = vector.broadcast %84 : vector<128x1xf32> to vector<128x128xf32>
    %86 = arith.subf %82, %85 : vector<128x128xf32>
    %87 = math.exp %86 : vector<128x128xf32>
    %cst_29 = arith.constant dense<0.000000e+00> : vector<128xf32>
    %88 = vector.multi_reduction <add>, %87, %cst_29 [1] : vector<128x128xf32> to vector<128xf32>
    %89 = vector.shape_cast %88 : vector<128xf32> to vector<128x1xf32>
    %90 = tpu.reciprocal %89 {approx = true} : vector<128x1xf32> -> vector<128x1xf32>
    %91 = vector.broadcast %90 : vector<128x1xf32> to vector<128x128xf32>
    %92 = arith.mulf %87, %91 : vector<128x128xf32>
    %93 = arith.truncf %92 : vector<128x128xf32> to vector<128x128xbf16>
    %cst_30 = arith.constant dense<0.000000e+00> : vector<128x32xf32>
    %94 = tpu.matmul %93, %81, %cst_30 {dimension_numbers = #tpu.dot_dimension_numbers<[1], [0], [0], [1], [0, 0, 1, 1], [], []>} : vector<128x128xbf16>, vector<128x32xbf16>, vector<128x32xf32> -> vector<128x32xf32>
    %c0_31 = arith.constant 0 : index
    %c128 = arith.constant 128 : index
    %95 = vector.load %arg5[%c0_31, %c128] : memref<128x256xf32, #tpu.memory_space<vmem>>, vector<128x32xf32>
    tpu.vector_store %arg5[%c0_31, %c128], %94 {strides = array<i32>} : memref<128x256xf32, #tpu.memory_space<vmem>>, vector<128x32xf32>,
    %96 = vector.extract_strided_slice %8 {offsets = [0, 160], sizes = [128, 32], strides = [1, 1]} : vector<128x256xbf16> to vector<128x32xbf16>
    %97 = vector.extract_strided_slice %9 {offsets = [0, 160], sizes = [128, 32], strides = [1, 1]} : vector<128x256xbf16> to vector<128x32xbf16>
    %98 = vector.extract_strided_slice %10 {offsets = [0, 160], sizes = [128, 32], strides = [1, 1]} : vector<128x256xbf16> to vector<128x32xbf16>
    %cst_32 = arith.constant dense<0.000000e+00> : vector<128x128xf32>
    %99 = tpu.matmul %96, %97, %cst_32 {dimension_numbers = #tpu.dot_dimension_numbers<[1], [1], [0], [0], [0, 0, 1, 0], [], []>} : vector<128x32xbf16>, vector<128x32xbf16>, vector<128x128xf32> -> vector<128x128xf32>
    %cst_33 = arith.constant dense<0xFF800000> : vector<128xf32>
    %100 = vector.multi_reduction <maximumf>, %99, %cst_33 [1] : vector<128x128xf32> to vector<128xf32>
    %101 = vector.shape_cast %100 : vector<128xf32> to vector<128x1xf32>
    %102 = vector.broadcast %101 : vector<128x1xf32> to vector<128x128xf32>
    %103 = arith.subf %99, %102 : vector<128x128xf32>
    %104 = math.exp %103 : vector<128x128xf32>
    %cst_34 = arith.constant dense<0.000000e+00> : vector<128xf32>
    %105 = vector.multi_reduction <add>, %104, %cst_34 [1] : vector<128x128xf32> to vector<128xf32>
    %106 = vector.shape_cast %105 : vector<128xf32> to vector<128x1xf32>
    %107 = tpu.reciprocal %106 {approx = true} : vector<128x1xf32> -> vector<128x1xf32>
    %108 = vector.broadcast %107 : vector<128x1xf32> to vector<128x128xf32>
    %109 = arith.mulf %104, %108 : vector<128x128xf32>
    %110 = arith.truncf %109 : vector<128x128xf32> to vector<128x128xbf16>
    %cst_35 = arith.constant dense<0.000000e+00> : vector<128x32xf32>
    %111 = tpu.matmul %110, %98, %cst_35 {dimension_numbers = #tpu.dot_dimension_numbers<[1], [0], [0], [1], [0, 0, 1, 1], [], []>} : vector<128x128xbf16>, vector<128x32xbf16>, vector<128x32xf32> -> vector<128x32xf32>
    %c0_36 = arith.constant 0 : index
    %c160 = arith.constant 160 : index
    %112 = vector.load %arg5[%c0_36, %c160] : memref<128x256xf32, #tpu.memory_space<vmem>>, vector<128x32xf32>
    tpu.vector_store %arg5[%c0_36, %c160], %111 {strides = array<i32>} : memref<128x256xf32, #tpu.memory_space<vmem>>, vector<128x32xf32>,
    %113 = vector.extract_strided_slice %8 {offsets = [0, 192], sizes = [128, 32], strides = [1, 1]} : vector<128x256xbf16> to vector<128x32xbf16>
    %114 = vector.extract_strided_slice %9 {offsets = [0, 192], sizes = [128, 32], strides = [1, 1]} : vector<128x256xbf16> to vector<128x32xbf16>
    %115 = vector.extract_strided_slice %10 {offsets = [0, 192], sizes = [128, 32], strides = [1, 1]} : vector<128x256xbf16> to vector<128x32xbf16>
    %cst_37 = arith.constant dense<0.000000e+00> : vector<128x128xf32>
    %116 = tpu.matmul %113, %114, %cst_37 {dimension_numbers = #tpu.dot_dimension_numbers<[1], [1], [0], [0], [0, 0, 1, 0], [], []>} : vector<128x32xbf16>, vector<128x32xbf16>, vector<128x128xf32> -> vector<128x128xf32>
    %cst_38 = arith.constant dense<0xFF800000> : vector<128xf32>
    %117 = vector.multi_reduction <maximumf>, %116, %cst_38 [1] : vector<128x128xf32> to vector<128xf32>
    %118 = vector.shape_cast %117 : vector<128xf32> to vector<128x1xf32>
    %119 = vector.broadcast %118 : vector<128x1xf32> to vector<128x128xf32>
    %120 = arith.subf %116, %119 : vector<128x128xf32>
    %121 = math.exp %120 : vector<128x128xf32>
    %cst_39 = arith.constant dense<0.000000e+00> : vector<128xf32>
    %122 = vector.multi_reduction <add>, %121, %cst_39 [1] : vector<128x128xf32> to vector<128xf32>
    %123 = vector.shape_cast %122 : vector<128xf32> to vector<128x1xf32>
    %124 = tpu.reciprocal %123 {approx = true} : vector<128x1xf32> -> vector<128x1xf32>
    %125 = vector.broadcast %124 : vector<128x1xf32> to vector<128x128xf32>
    %126 = arith.mulf %121, %125 : vector<128x128xf32>
    %127 = arith.truncf %126 : vector<128x128xf32> to vector<128x128xbf16>
    %cst_40 = arith.constant dense<0.000000e+00> : vector<128x32xf32>
    %128 = tpu.matmul %127, %115, %cst_40 {dimension_numbers = #tpu.dot_dimension_numbers<[1], [0], [0], [1], [0, 0, 1, 1], [], []>} : vector<128x128xbf16>, vector<128x32xbf16>, vector<128x32xf32> -> vector<128x32xf32>
    %c0_41 = arith.constant 0 : index
    %c192 = arith.constant 192 : index
    %129 = vector.load %arg5[%c0_41, %c192] : memref<128x256xf32, #tpu.memory_space<vmem>>, vector<128x32xf32>
    tpu.vector_store %arg5[%c0_41, %c192], %128 {strides = array<i32>} : memref<128x256xf32, #tpu.memory_space<vmem>>, vector<128x32xf32>,
    %130 = vector.extract_strided_slice %8 {offsets = [0, 224], sizes = [128, 32], strides = [1, 1]} : vector<128x256xbf16> to vector<128x32xbf16>
    %131 = vector.extract_strided_slice %9 {offsets = [0, 224], sizes = [128, 32], strides = [1, 1]} : vector<128x256xbf16> to vector<128x32xbf16>
    %132 = vector.extract_strided_slice %10 {offsets = [0, 224], sizes = [128, 32], strides = [1, 1]} : vector<128x256xbf16> to vector<128x32xbf16>
    %cst_42 = arith.constant dense<0.000000e+00> : vector<128x128xf32>
    %133 = tpu.matmul %130, %131, %cst_42 {dimension_numbers = #tpu.dot_dimension_numbers<[1], [1], [0], [0], [0, 0, 1, 0], [], []>} : vector<128x32xbf16>, vector<128x32xbf16>, vector<128x128xf32> -> vector<128x128xf32>
    %cst_43 = arith.constant dense<0xFF800000> : vector<128xf32>
    %134 = vector.multi_reduction <maximumf>, %133, %cst_43 [1] : vector<128x128xf32> to vector<128xf32>
    %135 = vector.shape_cast %134 : vector<128xf32> to vector<128x1xf32>
    %136 = vector.broadcast %135 : vector<128x1xf32> to vector<128x128xf32>
    %137 = arith.subf %133, %136 : vector<128x128xf32>
    %138 = math.exp %137 : vector<128x128xf32>
    %cst_44 = arith.constant dense<0.000000e+00> : vector<128xf32>
    %139 = vector.multi_reduction <add>, %138, %cst_44 [1] : vector<128x128xf32> to vector<128xf32>
    %140 = vector.shape_cast %139 : vector<128xf32> to vector<128x1xf32>
    %141 = tpu.reciprocal %140 {approx = true} : vector<128x1xf32> -> vector<128x1xf32>
    %142 = vector.broadcast %141 : vector<128x1xf32> to vector<128x128xf32>
    %143 = arith.mulf %138, %142 : vector<128x128xf32>
    %144 = arith.truncf %143 : vector<128x128xf32> to vector<128x128xbf16>
    %cst_45 = arith.constant dense<0.000000e+00> : vector<128x32xf32>
    %145 = tpu.matmul %144, %132, %cst_45 {dimension_numbers = #tpu.dot_dimension_numbers<[1], [0], [0], [1], [0, 0, 1, 1], [], []>} : vector<128x128xbf16>, vector<128x32xbf16>, vector<128x32xf32> -> vector<128x32xf32>
    %c0_46 = arith.constant 0 : index
    %c224 = arith.constant 224 : index
    %146 = vector.load %arg5[%c0_46, %c224] : memref<128x256xf32, #tpu.memory_space<vmem>>, vector<128x32xf32>
    tpu.vector_store %arg5[%c0_46, %c224], %145 {strides = array<i32>} : memref<128x256xf32, #tpu.memory_space<vmem>>, vector<128x32xf32>,
    %c0_47 = arith.constant 0 : index
    %c0_48 = arith.constant 0 : index
    %147 = vector.load %arg5[%c0_47, %c0_48] : memref<128x256xf32, #tpu.memory_space<vmem>>, vector<128x256xf32>
    %148 = arith.truncf %147 : vector<128x256xf32> to vector<128x256xbf16>
    %c0_49 = arith.constant 0 : index
    %c0_50 = arith.constant 0 : index
    %c0_51 = arith.constant 0 : index
    %149 = vector.load %arg4[%c0_49, %c0_50, %c0_51] : memref<1x128x256xbf16, #tpu.memory_space<vmem>>, vector<1x128x256xbf16>
    %150 = vector.shape_cast %149 : vector<1x128x256xbf16> to vector<128x256xbf16>
    %151 = vector.shape_cast %148 : vector<128x256xbf16> to vector<1x128x256xbf16>
    tpu.vector_store %arg4[%c0_49, %c0_50, %c0_51], %151 {strides = array<i32>} : memref<1x128x256xbf16, #tpu.memory_space<vmem>>, vector<1x128x256xbf16>,
    return
  }
  func.func @transform_0(%arg0: i32) -> (i32, i32, i32) {
    %c0_i32 = arith.constant 0 : i32
    %c0_i32_0 = arith.constant 0 : i32
    %c0_i32_1 = arith.constant 0 : i32
    return %arg0, %c0_i32, %c0_i32_0 : i32, i32, i32
  }
  func.func @transform_1(%arg0: i32) -> (i32, i32) {
    %c0_i32 = arith.constant 0 : i32
    %c0_i32_0 = arith.constant 0 : i32
    %c0_i32_1 = arith.constant 0 : i32
    return %c0_i32, %c0_i32_0 : i32, i32
  }
  func.func @transform_2(%arg0: i32) -> (i32, i32) {
    %c0_i32 = arith.constant 0 : i32
    %c0_i32_0 = arith.constant 0 : i32
    %c0_i32_1 = arith.constant 0 : i32
    return %c0_i32, %c0_i32_0 : i32, i32
  }
  func.func @transform_3(%arg0: i32) -> (i32, i32, i32) {
    %c0_i32 = arith.constant 0 : i32
    %c0_i32_0 = arith.constant 0 : i32
    %c0_i32_1 = arith.constant 0 : i32
    return %arg0, %c0_i32, %c0_i32_0 : i32, i32, i32
  }
}

</mosaic_0001>

<bundles_post_ra>
// kernel: tpu_custom_call.1
= control target key start
LH: loop header
LB: loop body
LE: loop exit
PB: predicated region body
PF: predicated region fallthrough
CT: control target
= control target key end

     0   :  { %8 = vsyncpa [#allocation4], 0  ;;  %s10305_s0 = inlined_call_operand.hbm [shape: bf16[2,128,256], index: 0, kind: input, shape index: {}]   ;;  %s10306_s1 = inlined_call_operand.hbm [shape: bf16[256,768], index: 1, kind: input, shape index: {}]   ;;  %s10307_s2 = inlined_call_operand.hbm [shape: f32[1,768], index: 2, kind: input, shape index: {}]   ;;  %s10308_s3 = inlined_call_operand.hbm [shape: bf16[2,128,256], index: 3, kind: output, shape index: {}]  }
   0x1   :  { %10 = vsyncpa [#allocation4 + $0x1], 0 }
   0x2   :  { %11 = vsyncpa [#allocation7], 0 }
   0x3   :  { %12 = vsyncpa [#allocation5], 0 }
   0x4   :  { %14 = vsyncpa [#allocation5 + $0x1], 0  ;;  %s7610_s12 = smov 0   ;;  %s7612_s13 = smov 0  }
   0x5   :  { %s7614_s14 = smov 0   ;;  %s7616_s15 = smov 0  }
   0x6 LB: > { %s7631_s16 = sadd.s32 4294967295, %s7575_s15   ;;  %s5610_s17 = sadd.s32 4294967294, %s7575_s15   ;;  %s7575_s15 = sphi %s7616_s15, %s10653_s15   ;;  %s7571_s14 = sphi %s7614_s14, %s10652_s14   ;;  %s7567_s13 = sphi %s7612_s13, %s10651_s13   ;;  %s7563_s12 = sphi %s7610_s12, %s10650_s12  }
   0x7   : > { %p40_p0 = scmp.ne.s32.totalorder %s7567_s13, %s7563_s12  ;;  %p10309_p1 = scmp.eq.s32.totalorder %s7631_s16, 0 }
   0x8   : > { %p112_p3 = scmp.eq.s32.totalorder %s5610_s17, 1  ;;  %p5611_p5 = scmp.ge.s32.totalorder %s7575_s15, 1 }
   0x9   : > { %p7640_p4 = por %p10309_p1, %p40_p0  ;;  %p119_p7 = scmp.lt.s32.totalorder %s7575_s15, 3 }
   0xa   : > { %p7645_p6 = por %p112_p3, %p40_p0  ;;  %s7577_s21 = smov [#allocation6]  }
   0xb   : > { %s10366_s18 = scalar_select %p7640_p4, 1, 0 }
   0xc   : > { %s10367_s19 = scalar_select %p7645_p6, 1, 0 }
   0xd   : > { %p7650_p8 = pnand %p5611_p5, %p119_p7  ;;  %s131_s22 = sshll.u32 %s7577_s21, 4  ;;  %s132_s22 = int_to_ptr.vmem [resolvable:$true] %s131_s22 }
   0xe   : > { %s7578_s24 = smov [#allocation8]   ;;  %s7438_s26 = scalar_lea.vmem %s132_s22, 12288 }
   0xf   : > { %s10368_s20 = scalar_select %p7650_p8, 1, 0 }
  0x10   : > { %p6682_p9 = pneg %p7650_p8  ;;  %s145_s25 = sshll.u32 %s7578_s24, 4  ;;  %s146_s25 = int_to_ptr.vmem [resolvable:$true] %s145_s25 }
  0x11   : > { %p7439_p13 = scmp.ne.s32.totalorder %s132_s22, %s7438_s26  ;;  %p7446_p5 = scmp.lt.s32.totalorder %s132_s22, %s132_s22 }
  0x12   : > { %p7659_p11 = pnand %p6682_p9, %p10309_p1  ;;  %p7447_p7 = scmp.lt.s32.totalorder %s7438_s26, %s7438_s26 }
  0x14   : > { %p7429_p12 = pneg %p7659_p11  ;;  %p7448_p10 = por %p7447_p7, %p7446_p5 }
  0x16   : > { %p7441_p0 = pnand %p7439_p13, %p7429_p12 }
  0x18   : > { %p7442_p3 = pneg %p7441_p0 }
  0x1a   : > { %p7449_p9 = pnand %p7448_p10, %p7442_p3 }
  0x1c   : > { %7452 = shalt.err (!%p7449_p9)
}
  0x1d   : > { %s7579_s27 = smov 384   ;;  %s7580_s28 = smov 24  }
  0x1e   : > { %6685 = dma.hbm_to_vmem [thread:$0]  (!%p7659_p11), %s10306_s1, 12288, %s132_s22, [#allocation7], %s7579_s27, %s7579_s27, %s7580_s28  }
  0x1f   : > { %s7464_s4 = scalar_lea.vmem %s146_s25, 96  ;;  %p7472_p2 = scmp.lt.s32.totalorder %s146_s25, %s146_s25 }
  0x20   : > { %p7465_p1 = scmp.ne.s32.totalorder %s146_s25, %s7464_s4  ;;  %p7473_p6 = scmp.lt.s32.totalorder %s7464_s4, %s7464_s4 }
  0x22   : > { %p7467_p13 = pnand %p7465_p1, %p7429_p12  ;;  %p7474_p5 = por %p7473_p6, %p7472_p2 }
  0x24   : > { %p7468_p0 = pneg %p7467_p13 }
  0x26   : > { %p7475_p10 = pnand %p7474_p5, %p7468_p0 }
  0x28   : > { %7478 = shalt.err (!%p7475_p10)
}
  0x29   : > { %6688 = dma.hbm_to_vmem [thread:$0]  (!%p7659_p11), %s10307_s2, 96, %s146_s25, [#allocation7]  }
  0x2a   : > { %s7682_s7 = sadd.s32 1, %s7575_s15   ;;  %s27_s8 = sadd.s32 1, %s7571_s14 }
  0x2b   : > { %s24_s9 = ssub.s32 %s7575_s15, %s7682_s7  ;;  %p34_p1 = scmp.ne.s32.totalorder %s7571_s14, %s7567_s13 }
  0x2c   : > { %p25_p2 = scmp.eq.s32.totalorder %s24_s9, 0  ;;  %p35_p6 = scmp.eq.s32.totalorder %s7575_s15, 0 }
  0x2d   : > { %p10370_p12 = scmp.eq.s32.totalorder %s7631_s16, 1  ;;  %p6699_p7 = scmp.lt.s32.totalorder %s7575_s15, 2 }
  0x2e   : > { %s7698_s11 = scalar_select %p25_p2, %s7571_s14, %s27_s8  }
  0x2f   : > { %p7692_p3 = por %p10370_p12, %p34_p1  ;;  %p36_p9 = por %p35_p6, %p34_p1 }
  0x30   : > { %s156_s17 = sand.u32 1, %s7571_s14   ;;  %s5820_s22 = sshll.u32 %s7575_s15, 11 }
  0x31   : > { %s10371_s10 = scalar_select %p7692_p3, 1, 0 }
  0x32   : > { %s5615_s21 = sshll.u32 %s156_s17, 7  ;;  %s7705_s25 = scalar_lea.hbm %s10305_s0, %s5820_s22 }
  0x33   : > { %s160_s26 = scalar_lea.vmem [#allocation3], %s5615_s21  ;;  %p7709_p11 = pnand %p6699_p7, %p36_p9 }
  0x34   : > { %s167_s27 = sshll.u32 %s160_s26, 4  ;;  %s7713_s29 = scalar_lea.sflag [#allocation4], %s156_s17  ;;  %s7707_s27 = int_to_ptr.vmem [resolvable:$true] %s167_s27 }
  0x35   : > { %s7479_s30 = scalar_lea.hbm %s7705_s25, 2048  ;;  %p7481_p0 = pneg %p7709_p11 }
  0x36   : > { %p7480_p13 = scmp.ne.s32.totalorder %s7705_s25, %s7479_s30  ;;  %s7484_s6 = scalar_lea.hbm %s10305_s0, 4096 }
  0x37   : > { %p7485_p1 = scmp.lt.s32.totalorder %s7705_s25, %s10305_s0  ;;  %p7486_p2 = scmp.lt.s32.totalorder %s7484_s6, %s7479_s30 }
  0x38   : > { %p7482_p5 = pnand %p7481_p0, %p7480_p13 }
  0x39   : > { %p7487_p6 = por %p7486_p2, %p7485_p1 }
  0x3a   : > { %p7483_p10 = pneg %p7482_p5 }
  0x3c   : > { %p7488_p12 = pnand %p7487_p6, %p7483_p10 }
  0x3e   : > { %7491 = shalt.err (!%p7488_p12)
}
  0x3f   : > { %s7492_s17 = scalar_lea.vmem %s7707_s27, 2048  ;;  %s7581_s21 = smov [#allocation3]  }
  0x40   : > { %p7493_p7 = scmp.ne.s32.totalorder %s7707_s27, %s7492_s17  ;;  %s7497_s22 = sshll.u32 %s7581_s21, 4  ;;  %s7498_s22 = int_to_ptr.vmem [resolvable:$false] %s7497_s22 }
  0x41   : > { %s7499_s23 = scalar_lea.vmem %s7498_s22, 4096  ;;  %p7500_p5 = scmp.lt.s32.totalorder %s7707_s27, %s7498_s22 }
  0x42   : > { %p7495_p9 = pnand %p7493_p7, %p7481_p0  ;;  %p7501_p3 = scmp.lt.s32.totalorder %s7499_s23, %s7492_s17 }
  0x44   : > { %p7496_p13 = pneg %p7495_p9  ;;  %p7502_p4 = por %p7501_p3, %p7500_p5 }
  0x46   : > { %p7503_p8 = pnand %p7502_p4, %p7496_p13 }
  0x48   : > { %7506 = shalt.err (!%p7503_p8)
}
  0x49   : > { %s7582_s24 = smov 128   ;;  %s7583_s26 = smov 8  }
  0x4a   : > { %6692 = dma.hbm_to_vmem [thread:$0]  (!%p7709_p11), %s7705_s25, 2048, %s7707_s27, %s7713_s29, %s7582_s24, %s7582_s24, %s7583_s26  }
  0x4b   : > { %p10373_p0 = scmp.ne.s32.totalorder %s10368_s20, 0 }
  0x4d   : > { %179 = sbr.rel (%p10373_p0) target bundleno = 4679 (0x1247), region = 32 }
  0x52   : > { %s7737_s30 = sand.u32 1, %s7567_s13   ;;  %p10374_p4 = scmp.ne.s32.totalorder %s10366_s18, 0 }
  0x53   : > { %s5619_s4 = sshll.u32 %s7737_s30, 7  ;;  %s182_s5 = scalar_lea.sflag [#allocation4], %s7737_s30 }
  0x54   : > { %s7743_s6 = scalar_lea.vmem [#allocation3], %s5619_s4 }
  0x55   : > { %7550 = dma.done.wait (%p10374_p4), %s182_s5, 2048  }
  0x56   : > { %7552 = vsyncadd (%p10374_p4), %s182_s5, 4294965248  ;;  %p10375_p8 = scmp.eq.s32.totalorder %s7631_s16, 0 }
  0x58   : > { %7554 = dma.done.wait (%p10375_p8), [#allocation7], 12384   ;;  %p10376_p3 = pmov %p10375_p8 }
  0x59   : > { %v6746_v0 = vld [vmem:[#allocation6 + $0x15c] ss:$24 sps:$4 sm:$0xff]   ;;  %v6748_v1 = vld [vmem:[#allocation6 + $0x158] ss:$24 sps:$4 sm:$0xff]   ;;  %v6749_v2 = vld [vmem:[#allocation6 + $0x12c] ss:$24 sps:$4 sm:$0xff]  }
  0x5a   : > { %7556 = vsyncadd (%p10376_p3), [#allocation7], 4294954912  ;;  %1034 = vmatprep.subr.bf16.mxu1 %v6746_v0  ;;  %v6751_v3 = vld [vmem:[#allocation6 + $0x128] ss:$24 sps:$4 sm:$0xff]   ;;  %v6752_v4 = vld [vmem:[#allocation6 + $0xfc] ss:$24 sps:$4 sm:$0xff]  }
  0x5b   : > { %1035 = vmatpush1.bf16.msra.mxu1 %v6748_v1  ;;  %v6754_v5 = vld [vmem:[#allocation6 + $0xf8] ss:$24 sps:$4 sm:$0xff]   ;;  %v6755_v6 = vld [vmem:[#allocation6 + $0xcc] ss:$24 sps:$4 sm:$0xff]   ;;  %v6757_v7 = vld [vmem:[#allocation6 + $0xc8] ss:$24 sps:$4 sm:$0xff]  }
  0x5c   : > { %1036 = vmatprep.subr.bf16.mxu1 %v6749_v2  ;;  %v6770_v8 = vld [vmem:[#allocation6 + $0x154] ss:$24 sps:$4 sm:$0xff]   ;;  %v6774_v10 = vld [vmem:[#allocation6 + $0x150] ss:$24 sps:$4 sm:$0xff]   ;;  %v6776_v11 = vld [vmem:[#allocation6 + $0x124] ss:$24 sps:$4 sm:$0xff]  }
  0x5d   : > { %v6758_v9 = vld [vmem:[#allocation6 + $0x9c] ss:$24 sps:$4 sm:$0xff]   ;;  %921 = vmatprep.subr.bf16.mxu0 %v6770_v8  ;;  %v6760_v12 = vld [vmem:[#allocation6 + $0x98] ss:$24 sps:$4 sm:$0xff]   ;;  %v6761_v13 = vld [vmem:[#allocation6 + $0x6c] ss:$24 sps:$4 sm:$0xff]  }
  0x5e   : > { %922 = vmatpush1.bf16.msra.mxu0 %v6774_v10  ;;  %v6780_v14 = vld [vmem:[#allocation6 + $0x120] ss:$24 sps:$4 sm:$0xff]   ;;  %v6782_v15 = vld [vmem:[#allocation6 + $0xf4] ss:$24 sps:$4 sm:$0xff]   ;;  %v6786_v17 = vld [vmem:[#allocation6 + $0xf0] ss:$24 sps:$4 sm:$0xff]  }
  0x5f   : > { %1037 = vmatpush1.bf16.msra.mxu1 %v6751_v3  ;;  %923 = vmatprep.subr.bf16.mxu0 %v6776_v11  ;;  %v6763_v16 = vld [vmem:[#allocation6 + $0x68] ss:$24 sps:$4 sm:$0xff]   ;;  %v6788_v18 = vld [vmem:[#allocation6 + $0xc4] ss:$24 sps:$4 sm:$0xff]   ;;  %v6766_v21 = vld [vmem:[#allocation6 + $0x38] ss:$24 sps:$4 sm:$0xff]  }
  0x60   : > { %1038 = vmatprep.subr.bf16.mxu1 %v6752_v4  ;;  %v6764_v19 = vld [vmem:[#allocation6 + $0x3c] ss:$24 sps:$4 sm:$0xff]   ;;  %v6792_v20 = vld [vmem:[#allocation6 + $0xc0] ss:$24 sps:$4 sm:$0xff]   ;;  %v6767_v23 = vld [vmem:[#allocation6 + $0xc] ss:$24 sps:$4 sm:$0xff]  }
  0x61   : > { %v6794_v22 = vld [vmem:[#allocation6 + $0x94] ss:$24 sps:$4 sm:$0xff]   ;;  %v6769_v24 = vld [vmem:[#allocation6 + $0x8] ss:$24 sps:$4 sm:$0xff]   ;;  %v6800_v26 = vld [vmem:[#allocation6 + $0x64] ss:$24 sps:$4 sm:$0xff]  }
  0x62   : > { %924 = vmatpush1.bf16.msra.mxu0 %v6780_v14  ;;  %v6798_v25 = vld [vmem:[#allocation6 + $0x90] ss:$24 sps:$4 sm:$0xff]   ;;  %v6772_v27 = vld [vmem:[#allocation6 + $0x2dc] ss:$24 sps:$4 sm:$0xff]   ;;  %v6804_v28 = vld [vmem:[#allocation6 + $0x60] ss:$24 sps:$4 sm:$0xff]  }
  0x63   : > { %1039 = vmatpush1.bf16.msra.mxu1 %v6754_v5  ;;  %925 = vmatprep.subr.bf16.mxu0 %v6782_v15  ;;  %v6775_v29 = vld [vmem:[#allocation6 + $0x2d8] ss:$24 sps:$4 sm:$0xff]   ;;  %v6778_v30 = vld [vmem:[#allocation6 + $0x2ac] ss:$24 sps:$4 sm:$0xff]   ;;  %v6781_v34 = vld [vmem:[#allocation6 + $0x2a8] ss:$24 sps:$4 sm:$0xff]  }
  0x64   : > { %1040 = vmatprep.subr.bf16.mxu1 %v6755_v6  ;;  %v6806_v31 = vld [vmem:[#allocation6 + $0x34] ss:$24 sps:$4 sm:$0xff]   ;;  %v6810_v33 = vld [vmem:[#allocation6 + $0x30] ss:$24 sps:$4 sm:$0xff]   ;;  %v6812_v35 = vld [vmem:[#allocation6 + $0x4] ss:$24 sps:$4 sm:$0xff]  }
  0x65   : > { %v7754_v32 = vld [vmem:[%s7743_s6 + $0x4] ss:$8 sps:$4 sm:$0xff]   ;;  %v6784_v36 = vld [vmem:[#allocation6 + $0x27c] ss:$24 sps:$4 sm:$0xff]   ;;  %v6816_v37 = vld [vmem:[#allocation6] ss:$24 sps:$4 sm:$0xff]  }
  0x66   : > { %926 = vmatpush1.bf16.msra.mxu0 %v6786_v17  ;;  %1066 = vmatprep.mubr.bf16.mxu1 %v7754_v32  ;;  %v6787_v38 = vld [vmem:[#allocation6 + $0x278] ss:$24 sps:$4 sm:$0xff]   ;;  %v6820_v39 = vld [vmem:[#allocation6 + $0x2d4] ss:$24 sps:$4 sm:$0xff]   ;;  %v6793_v42 = vld [vmem:[#allocation6 + $0x248] ss:$24 sps:$4 sm:$0xff]  }
  0x67   : > { %1041 = vmatpush1.bf16.msra.mxu1 %v6757_v7  ;;  %927 = vmatprep.subr.bf16.mxu0 %v6788_v18  ;;  %v6790_v40 = vld [vmem:[#allocation6 + $0x24c] ss:$24 sps:$4 sm:$0xff]   ;;  %v6823_v41 = vld [vmem:[#allocation6 + $0x2d0] ss:$24 sps:$4 sm:$0xff]   ;;  %v6796_v44 = vld [vmem:[#allocation6 + $0x21c] ss:$24 sps:$4 sm:$0xff]  }
  0x68   : > { %1042 = vmatprep.subr.bf16.mxu1 %v6758_v9  ;;  %953 = vmatprep.mubr.bf16.mxu0 %v7754_v32  ;;  %v6824_v43 = vld [vmem:[#allocation6 + $0x2a4] ss:$24 sps:$4 sm:$0xff]   ;;  %v6826_v45 = vld [vmem:[#allocation6 + $0x2a0] ss:$24 sps:$4 sm:$0xff]   ;;  %v6829_v47 = vld [vmem:[#allocation6 + $0x274] ss:$24 sps:$4 sm:$0xff]  }
  0x69   : > { %v6799_v46 = vld [vmem:[#allocation6 + $0x218] ss:$24 sps:$4 sm:$0xff]   ;;  %v6802_v48 = vld [vmem:[#allocation6 + $0x1ec] ss:$24 sps:$4 sm:$0xff]   ;;  %v6805_v50 = vld [vmem:[#allocation6 + $0x1e8] ss:$24 sps:$4 sm:$0xff]  }
  0x6a   : > { %928 = vmatpush1.bf16.msra.mxu0 %v6792_v20  ;;  %v6832_v49 = vld [vmem:[#allocation6 + $0x270] ss:$24 sps:$4 sm:$0xff]   ;;  %v6833_v51 = vld [vmem:[#allocation6 + $0x244] ss:$24 sps:$4 sm:$0xff]   ;;  %v6835_v53 = vld [vmem:[#allocation6 + $0x240] ss:$24 sps:$4 sm:$0xff]  }
  0x6b   : > { %1043 = vmatpush1.bf16.msra.mxu1 %v6760_v12  ;;  %929 = vmatprep.subr.bf16.mxu0 %v6794_v22  ;;  %v6808_v52 = vld [vmem:[#allocation6 + $0x1bc] ss:$24 sps:$4 sm:$0xff]   ;;  %v6811_v54 = vld [vmem:[#allocation6 + $0x1b8] ss:$24 sps:$4 sm:$0xff]   ;;  %v6814_v56 = vld [vmem:[#allocation6 + $0x18c] ss:$24 sps:$4 sm:$0xff]  }
  0x6c   : > { %1044 = vmatprep.subr.bf16.mxu1 %v6761_v13  ;;  %v6838_v55 = vld [vmem:[#allocation6 + $0x214] ss:$24 sps:$4 sm:$0xff]   ;;  %v6841_v57 = vld [vmem:[#allocation6 + $0x210] ss:$24 sps:$4 sm:$0xff]   ;;  %v6842_v59 = vld [vmem:[#allocation6 + $0x1e4] ss:$24 sps:$4 sm:$0xff]  }
  0x6d   : > { %v6817_v58 = vld [vmem:[#allocation6 + $0x188] ss:$24 sps:$4 sm:$0xff]   ;;  %v7762_v62 = vld [vmem:[%s7743_s6 + $0x14] ss:$8 sps:$4 sm:$0xff]   ;;  %v7767_v2 = vld [vmem:[%s7743_s6 + $0x10] ss:$8 sps:$4 sm:$0xff]  }
  0x6e   : > { %930 = vmatpush1.bf16.msra.mxu0 %v6798_v25  ;;  %v7759_v60 = vld [vmem:[%s7743_s6] ss:$8 sps:$4 sm:$0xff]   ;;  %v6847_v63 = vld [vmem:[#allocation6 + $0x1b4] ss:$24 sps:$4 sm:$0xff]   ;;  %v6851_v1 = vld [vmem:[#allocation6 + $0x184] ss:$24 sps:$4 sm:$0xff]  }
  0x6f   : > { %1045 = vmatpush1.bf16.msra.mxu1 %v6763_v16  ;;  %931 = vmatprep.subr.bf16.mxu0 %v6800_v26  ;;  %v6844_v61 = vld [vmem:[#allocation6 + $0x1e0] ss:$24 sps:$4 sm:$0xff]   ;;  %v6850_v0 = vld [vmem:[#allocation6 + $0x1b0] ss:$24 sps:$4 sm:$0xff]   ;;  %v7770_v4 = vld [vmem:[%s7743_s6 + $0x24] ss:$8 sps:$4 sm:$0xff]  }
  0x70   : > { %1046 = vmatprep.subr.bf16.mxu1 %v6764_v19  ;;  %v6853_v3 = vld [vmem:[#allocation6 + $0x180] ss:$24 sps:$4 sm:$0xff]   ;;  %v6868_v5 = vld [vmem:[#allocation6 + $0x164] ss:$24 sps:$4 sm:$0xff]   ;;  %v6871_v7 = vld [vmem:[#allocation6 + $0x134] ss:$24 sps:$4 sm:$0xff]  }
  0x71   : > { %v6866_v6 = vld [vmem:[#allocation6 + $0x160] ss:$24 sps:$4 sm:$0xff]   ;;  %v6869_v9 = vld [vmem:[#allocation6 + $0x130] ss:$24 sps:$4 sm:$0xff]   ;;  %v7780_v10 = vld [vmem:[%s7743_s6 + $0x34] ss:$8 sps:$4 sm:$0xff]  }
  0x72   : > { %932 = vmatpush1.bf16.msra.mxu0 %v6804_v28  ;;  %v7776_v8 = vld [vmem:[%s7743_s6 + $0x20] ss:$8 sps:$4 sm:$0xff]   ;;  %v6874_v11 = vld [vmem:[#allocation6 + $0x104] ss:$24 sps:$4 sm:$0xff]   ;;  %v6877_v13 = vld [vmem:[#allocation6 + $0xd4] ss:$24 sps:$4 sm:$0xff]  }
  0x73   : > { %1047 = vmatpush1.bf16.msra.mxu1 %v6766_v21  ;;  %933 = vmatprep.subr.bf16.mxu0 %v6806_v31  ;;  %v6872_v12 = vld [vmem:[#allocation6 + $0x100] ss:$24 sps:$4 sm:$0xff]   ;;  %v6875_v15 = vld [vmem:[#allocation6 + $0xd0] ss:$24 sps:$4 sm:$0xff]   ;;  %v7790_v16 = vld [vmem:[%s7743_s6 + $0x44] ss:$8 sps:$4 sm:$0xff]  }
  0x74   : > { %1048 = vmatprep.subr.bf16.mxu1 %v6767_v23  ;;  %v7786_v14 = vld [vmem:[%s7743_s6 + $0x30] ss:$8 sps:$4 sm:$0xff]   ;;  %v6880_v17 = vld [vmem:[#allocation6 + $0xa4] ss:$24 sps:$4 sm:$0xff]   ;;  %v6883_v19 = vld [vmem:[#allocation6 + $0x74] ss:$24 sps:$4 sm:$0xff]  }
  0x75   : > { %v6878_v18 = vld [vmem:[#allocation6 + $0xa0] ss:$24 sps:$4 sm:$0xff]   ;;  %v6881_v21 = vld [vmem:[#allocation6 + $0x70] ss:$24 sps:$4 sm:$0xff]   ;;  %v7800_v22 = vld [vmem:[%s7743_s6 + $0x54] ss:$8 sps:$4 sm:$0xff]  }
  0x76   : > { %934 = vmatpush1.bf16.msra.mxu0 %v6810_v33  ;;  %v7796_v20 = vld [vmem:[%s7743_s6 + $0x40] ss:$8 sps:$4 sm:$0xff]   ;;  %v6886_v23 = vld [vmem:[#allocation6 + $0x44] ss:$24 sps:$4 sm:$0xff]   ;;  %v6889_v25 = vld [vmem:[#allocation6 + $0x14] ss:$24 sps:$4 sm:$0xff]  }
  0x77   : > { %1049 = vmatpush1.bf16.msra.mxu1 %v6769_v24  ;;  %935 = vmatprep.subr.bf16.mxu0 %v6812_v35  ;;  %v6884_v24 = vld [vmem:[#allocation6 + $0x40] ss:$24 sps:$4 sm:$0xff]   ;;  %v6860_v28 = vld [vmem:[%s7743_s6 + $0x64] ss:$8 sps:$4 sm:$0xff]   ;;  %v6863_v35 = vld [vmem:[%s7743_s6 + $0x74] ss:$8 sps:$4 sm:$0xff]  }
  0x78   : > { %1050 = vmatprep.subr.bf16.mxu1 %v6772_v27  ;;  %v7806_v26 = vld [vmem:[%s7743_s6 + $0x50] ss:$8 sps:$4 sm:$0xff]   ;;  %v6895_v31 = vld [vmem:[#allocation6 + $0x2b4] ss:$24 sps:$4 sm:$0xff]   ;;  %v6862_v33 = vld [vmem:[%s7743_s6 + $0x60] ss:$8 sps:$4 sm:$0xff]  }
  0x79   : > { %v6887_v27 = vld [vmem:[#allocation6 + $0x10] ss:$24 sps:$4 sm:$0xff]   ;;  %vm1308_vm0 = vcmask 261120   ;;  %s7584_s18 = smov 96   ;;  %s7585_s20 = smov 64   ;;  %vm2257_vm1 = vcmask 523520  }
  0x7a   : > { %936 = vmatpush1.bf16.msra.mxu0 %v6816_v37  ;;  %v6896_v37 = vld [vmem:[#allocation6 + $0x280] ss:$24 sps:$4 sm:$0xff]   ;;  %s7586_s25 = smov 32   ;;  %vm2788_vm2 = vcmask 785920   ;;  %vm3319_vm3 = vcmask 1048320   ;;  %s10226_s27 = scalar_lea.vmem [#allocation9], %s5619_s4 }
  0x7b   : > { %1051 = vmatpush2.bf16.msra.mxu1 %v6775_v29  ;;  %937 = vmatprep.subr.bf16.mxu0 %v6820_v39  ;;  %v6892_v29 = vld [vmem:[#allocation6 + $0x2e4] ss:$24 sps:$4 sm:$0xff]   ;;  %v6865_v39 = vld [vmem:[%s7743_s6 + $0x70] ss:$8 sps:$4 sm:$0xff]   ;;  %s5837_s28 = sshll.u32 %s7631_s16, 11  ;;  %s5518_s29 = sshll.u32 %s10226_s27, 4  ;;  %s10261_s29 = int_to_ptr.vmem [resolvable:$true] %s5518_s29 }
  0x7c   : > { %1052 = vmatprep.subr.bf16.mxu1 %v6778_v30  ;;  %v6890_v30 = vld [vmem:[#allocation6 + $0x2e0] ss:$24 sps:$4 sm:$0xff]   ;;  %s10259_s17 = scalar_lea.hbm %s10308_s3, %s5837_s28  ;;  %s5505_s21 = scalar_lea.sflag [#allocation5], %s7737_s30 }
  0x7d   : > { %s7507_s22 = scalar_lea.vmem %s10261_s29, 2048  ;;  %p10647_p10 = scmp.ne.s32.totalorder %s10371_s10, 0 }
  0x7e   : > { %938 = vmatpush2.bf16.msra.mxu0 %v6823_v41  ;;  %v6904_v41 = vld [vmem:[#allocation6 + $0x224] ss:$24 sps:$4 sm:$0xff]   ;;  %p7508_p11 = scmp.ne.s32.totalorder %s10261_s29, %s7507_s22  ;;  %s7587_s16 = smov [#allocation9]  }
  0x7f   : > { %1053 = vmatpush2.bf16.msra.mxu1 %v6781_v34  ;;  %939 = vmatprep.subr.bf16.mxu0 %v6824_v43  ;;  %v6893_v34 = vld [vmem:[#allocation6 + $0x2b0] ss:$24 sps:$4 sm:$0xff]   ;;  %v6907_v43 = vld [vmem:[#allocation6 + $0x1f4] ss:$24 sps:$4 sm:$0xff]   ;;  %s7511_s23 = sshll.u32 %s7587_s16, 4  ;;  %s7512_s23 = int_to_ptr.vmem [resolvable:$false] %s7511_s23 }
  0x80   : > { %1054 = vmatprep.subr.bf16.mxu1 %v6784_v36  ;;  %v6898_v36 = vld [vmem:[#allocation6 + $0x284] ss:$24 sps:$4 sm:$0xff]   ;;  %p7509_p1 = pnand %p7508_p11, %p10647_p10  ;;  %s7513_s24 = scalar_lea.vmem %s7512_s23, 4096 }
  0x81   : > { %p7514_p6 = scmp.lt.s32.totalorder %s10261_s29, %s7512_s23  ;;  %p7515_p12 = scmp.lt.s32.totalorder %s7513_s24, %s7507_s22 }
  0x82   : > { %940 = vmatpush2.bf16.msra.mxu0 %v6826_v45  ;;  %v6910_v45 = vld [vmem:[#allocation6 + $0x1c4] ss:$24 sps:$4 sm:$0xff]   ;;  %p7510_p2 = pneg %p7509_p1 }
  0x83   : > { %1055 = vmatpush2.bf16.msra.mxu1 %v6787_v38  ;;  %941 = vmatprep.subr.bf16.mxu0 %v6829_v47  ;;  %v6901_v38 = vld [vmem:[#allocation6 + $0x254] ss:$24 sps:$4 sm:$0xff]   ;;  %p7516_p7 = por %p7515_p12, %p7514_p6 }
  0x84   : > { %1056 = vmatprep.subr.bf16.mxu1 %v6790_v40  ;;  %v6899_v40 = vld [vmem:[#allocation6 + $0x250] ss:$24 sps:$4 sm:$0xff]   ;;  %v6913_v47 = vld [vmem:[#allocation6 + $0x194] ss:$24 sps:$4 sm:$0xff]  }
  0x85   : > { %p7517_p9 = pnand %p7516_p7, %p7510_p2 }
  0x86   : > { %942 = vmatpush2.bf16.msra.mxu0 %v6832_v49 }
  0x87   : > { %1057 = vmatpush2.bf16.msra.mxu1 %v6793_v42  ;;  %943 = vmatprep.subr.bf16.mxu0 %v6833_v51  ;;  %v6902_v42 = vld [vmem:[#allocation6 + $0x220] ss:$24 sps:$4 sm:$0xff]  }
  0x88   : > { %1058 = vmatprep.subr.bf16.mxu1 %v6796_v44  ;;  %v6905_v44 = vld [vmem:[#allocation6 + $0x1f0] ss:$24 sps:$4 sm:$0xff]   ;;  %v7832_v51 = vld [vmem:[#allocation8] sm:$0x3f] }
  0x8a   : > { %944 = vmatpush2.bf16.msra.mxu0 %v6835_v53 }
  0x8b   : > { %1059 = vmatpush2.bf16.msra.mxu1 %v6799_v46  ;;  %945 = vmatprep.subr.bf16.mxu0 %v6838_v55  ;;  %v6908_v46 = vld [vmem:[#allocation6 + $0x1c0] ss:$24 sps:$4 sm:$0xff]  }
  0x8c   : > { %1060 = vmatprep.subr.bf16.mxu1 %v6802_v48  ;;  %v6911_v48 = vld [vmem:[#allocation6 + $0x190] ss:$24 sps:$4 sm:$0xff]  }
  0x8e   : > { %946 = vmatpush2.bf16.msra.mxu0 %v6841_v57 }
  0x8f   : > { %1061 = vmatpush2.bf16.msra.mxu1 %v6805_v50  ;;  %947 = vmatprep.subr.bf16.mxu0 %v6842_v59 }
  0x90   : > { %1062 = vmatprep.subr.bf16.mxu1 %v6808_v52 }
  0x92   : > { %948 = vmatpush2.bf16.msra.mxu0 %v6844_v61 }
  0x93   : > { %1063 = vmatpush2.bf16.msra.mxu1 %v6811_v54  ;;  %949 = vmatprep.subr.bf16.mxu0 %v6847_v63 }
  0x94   : > { %1064 = vmatprep.subr.bf16.mxu1 %v6814_v56 }
  0x96   : > { %950 = vmatpush2.bf16.msra.mxu0 %v6850_v0 }
  0x97   : > { %1065 = vmatpush2.bf16.msra.mxu1 %v6817_v58  ;;  %951 = vmatprep.subr.bf16.mxu0 %v6851_v1 }
  0x9a   : > { %1067 = vmatmul.mubr.bf16.vlgmr.msra.gmra.mxu1 %v7759_v60  ;;  %952 = vmatpush2.bf16.msra.mxu0 %v6853_v3 }
  0x9b   : > { %1076 = vmatprep.mubr.bf16.mxu1 %v7762_v62  ;;  %1147 = vmatprep.subr.bf16.mxu0 %v6868_v5 }
  0x9d   : > { %954 = vmatmul.mubr.bf16.vlgmr.msra.gmra.mxu0 %v7759_v60 }
  0x9e   : > { %963 = vmatprep.mubr.bf16.mxu0 %v7762_v62  ;;  %1148 = vmatpush1.bf16.msra.mxu0 %v6866_v6 }
  0x9f   : > { %1149 = vmatprep.subr.bf16.mxu0 %v6871_v7 }
  0xa2   : > { %1077 = vmatmul.mubr.bf16.gmra.mxu1 %v7767_v2  ;;  %1150 = vmatpush1.bf16.msra.mxu0 %v6869_v9 }
  0xa3   : > { %1086 = vmatprep.mubr.bf16.mxu1 %v7770_v4  ;;  %1151 = vmatprep.subr.bf16.mxu0 %v6874_v11 }
  0xa5   : > { %964 = vmatmul.mubr.bf16.gmra.mxu0 %v7767_v2 }
  0xa6   : > { %973 = vmatprep.mubr.bf16.mxu0 %v7770_v4  ;;  %1152 = vmatpush1.bf16.msra.mxu0 %v6872_v12 }
  0xa7   : > { %1153 = vmatprep.subr.bf16.mxu0 %v6877_v13 }
  0xaa   : > { %1087 = vmatmul.mubr.bf16.gmra.mxu1 %v7776_v8  ;;  %1154 = vmatpush1.bf16.msra.mxu0 %v6875_v15 }
  0xab   : > { %1096 = vmatprep.mubr.bf16.mxu1 %v7780_v10  ;;  %1155 = vmatprep.subr.bf16.mxu0 %v6880_v17 }
  0xad   : > { %974 = vmatmul.mubr.bf16.gmra.mxu0 %v7776_v8 }
  0xae   : > { %983 = vmatprep.mubr.bf16.mxu0 %v7780_v10  ;;  %1156 = vmatpush1.bf16.msra.mxu0 %v6878_v18 }
  0xaf   : > { %1157 = vmatprep.subr.bf16.mxu0 %v6883_v19 }
  0xb2   : > { %1097 = vmatmul.mubr.bf16.gmra.mxu1 %v7786_v14  ;;  %1158 = vmatpush1.bf16.msra.mxu0 %v6881_v21 }
  0xb3   : > { %1106 = vmatprep.mubr.bf16.mxu1 %v7790_v16  ;;  %1159 = vmatprep.subr.bf16.mxu0 %v6886_v23 }
  0xb5   : > { %984 = vmatmul.mubr.bf16.gmra.mxu0 %v7786_v14 }
  0xb6   : > { %993 = vmatprep.mubr.bf16.mxu0 %v7790_v16  ;;  %1160 = vmatpush1.bf16.msra.mxu0 %v6884_v24 }
  0xb7   : > { %1161 = vmatprep.subr.bf16.mxu0 %v6889_v25 }
  0xba   : > { %1107 = vmatmul.mubr.bf16.gmra.mxu1 %v7796_v20  ;;  %1162 = vmatpush1.bf16.msra.mxu0 %v6887_v27 }
  0xbb   : > { %1116 = vmatprep.mubr.bf16.mxu1 %v7800_v22  ;;  %1163 = vmatprep.subr.bf16.mxu0 %v6892_v29 }
  0xbd   : > { %994 = vmatmul.mubr.bf16.gmra.mxu0 %v7796_v20 }
  0xbe   : > { %1003 = vmatprep.mubr.bf16.mxu0 %v7800_v22  ;;  %1164 = vmatpush2.bf16.msra.mxu0 %v6890_v30 }
  0xbf   : > { %1165 = vmatprep.subr.bf16.mxu0 %v6895_v31 }
  0xc2   : > { %1117 = vmatmul.mubr.bf16.gmra.mxu1 %v7806_v26  ;;  %1166 = vmatpush2.bf16.msra.mxu0 %v6893_v34 }
  0xc3   : > { %1126 = vmatprep.mubr.bf16.mxu1 %v6860_v28  ;;  %1167 = vmatprep.subr.bf16.mxu0 %v6898_v36 }
  0xc5   : > { %1004 = vmatmul.mubr.bf16.gmra.mxu0 %v7806_v26 }
  0xc6   : > { %1013 = vmatprep.mubr.bf16.mxu0 %v6860_v28  ;;  %1168 = vmatpush2.bf16.msra.mxu0 %v6896_v37 }
  0xc7   : > { %1169 = vmatprep.subr.bf16.mxu0 %v6901_v38 }
  0xca   : > { %1127 = vmatmul.mubr.bf16.gmra.mxu1 %v6862_v33  ;;  %1170 = vmatpush2.bf16.msra.mxu0 %v6899_v40 }
  0xcb   : > { %1136 = vmatprep.mubr.bf16.mxu1 %v6863_v35  ;;  %1171 = vmatprep.subr.bf16.mxu0 %v6904_v41 }
  0xcd   : > { %1014 = vmatmul.mubr.bf16.gmra.mxu0 %v6862_v33 }
  0xce   : > { %1023 = vmatprep.mubr.bf16.mxu0 %v6863_v35  ;;  %1172 = vmatpush2.bf16.msra.mxu0 %v6902_v42 }
  0xcf   : > { %1173 = vmatprep.subr.bf16.mxu0 %v6907_v43 }
  0xd2   : > { %1137 = vmatmul.mubr.bf16.gmra.mxu1 %v6865_v39  ;;  %1174 = vmatpush2.bf16.msra.mxu0 %v6905_v44 }
  0xd3   : > { %1175 = vmatprep.subr.bf16.mxu0 %v6910_v45 }
  0xd5   : > { %1024 = vmatmul.mubr.bf16.gmra.mxu0 %v6865_v39 }
  0xd6   : > { %1176 = vmatpush2.bf16.msra.mxu0 %v6908_v46  ;;  %1179 = vmatprep.mubr.bf16.mxu0 %v7754_v32  ;;  %v331_v32 = vlaneseq }
  0xd7   : > { %1177 = vmatprep.subr.bf16.mxu0 %v6913_v47 }
  0xd8   : > { %v7829_v49 = vshrl.u32 %v331_v32, 7 }
  0xda   : > { %1178 = vmatpush2.bf16.msra.mxu0 %v6911_v48  ;;  %10377 = vst [vmem:[#allocation13_spill] sm:$0xff] %v7829_v49  ;;  %v345_v50 = vsub.s32 3, %v7829_v49  ;;  %v341_v42 = vsub.s32 2, %v7829_v49 }
  0xdc   : > { %v7835_v52 = vrot.slane %v7832_v51, %v345_v50  ;;  %v7911_v32 = vrot.slane %v7832_v51, %v341_v42 }
  0xdd   : > { %1180 = vmatmul.mubr.bf16.vlgmr.msra.gmra.mxu0 %v7759_v60  ;;  %v333_v60 = vsub.s32 0, %v7829_v49 }
  0xde   : > { %1189 = vmatprep.mubr.bf16.mxu0 %v7762_v62  ;;  %10378 = vst [vmem:[#allocation14_spill] sm:$0xff] %v7835_v52 }
  0xe5   : > { %1190 = vmatmul.mubr.bf16.gmra.mxu0 %v7767_v2  ;;  %v7852_v2 = vrot.slane %v7832_v51, %v333_v60 }
  0xe6   : > { %1199 = vmatprep.mubr.bf16.mxu0 %v7770_v4 }
  0xed   : > { %1200 = vmatmul.mubr.bf16.gmra.mxu0 %v7776_v8 }
  0xee   : > { %1209 = vmatprep.mubr.bf16.mxu0 %v7780_v10 }
  0xf5   : > { %1210 = vmatmul.mubr.bf16.gmra.mxu0 %v7786_v14 }
  0xf6   : > { %1219 = vmatprep.mubr.bf16.mxu0 %v7790_v16 }
  0xfd   : > { %1220 = vmatmul.mubr.bf16.gmra.mxu0 %v7796_v20 }
  0xfe   : > { %1229 = vmatprep.mubr.bf16.mxu0 %v7800_v22 }
 0x105   : > { %1230 = vmatmul.mubr.bf16.gmra.mxu0 %v7806_v26 }
 0x106   : > { %1239 = vmatprep.mubr.bf16.mxu0 %v6860_v28 }
 0x10d   : > { %1240 = vmatmul.mubr.bf16.gmra.mxu0 %v6862_v33 }
 0x10e   : > { %1249 = vmatprep.mubr.bf16.mxu0 %v6863_v35 }
 0x115   : > { %1250 = vmatmul.mubr.bf16.gmra.mxu0 %v6865_v39 }
 0x15a   : > { %v7837_v53 = vpop.f32.mrf.mxu1 }
 0x15c   : > { %v1070_v54 = vpop.f32.mrf.mxu1 }
 0x15d   : > { %v1071_v55 = vadd.f32 %v1070_v54, %v7835_v52  ;;  %v955_v0 = vpop.f32.mrf.mxu0 }
 0x15e   : > { %v7840_v56 = vpop.f32.mrf.mxu1  ;;  %v956_v5 = vadd.f32 %v955_v0, %v7852_v2 }
 0x15f   : > { %v7854_v3 = vpop.f32.mrf.mxu0 }
 0x160   : > { %v1074_v57 = vpop.f32.mrf.mxu1  ;;  %10380 = vst [vmem:[#allocation16_spill] sm:$0xff] %v7854_v3 }
 0x161   : > { %v1075_v58 = vadd.f32 %v1074_v57, %v7835_v52  ;;  %v959_v7 = vpop.f32.mrf.mxu0 }
 0x162   : > { %v7843_v59 = vpop.f32.mrf.mxu1  ;;  %v960_v9 = vadd.f32 %v959_v7, %v7852_v2 }
 0x163   : > { %v7846_v61 = vpack.c.bf16 %v1075_v58, %v1071_v55  ;;  %v7863_v11 = vpop.f32.mrf.mxu0 }
 0x164   : > { %v1080_v62 = vpop.f32.mrf.mxu1  ;;  %10382 = vst [vmem:[#allocation18_spill] sm:$0xff] %v7863_v11  ;;  %v7865_v13 = vpack.c.bf16 %v960_v9, %v956_v5 }
 0x165   : > { %10379 = vst [vmem:[#allocation15_spill] sm:$0xff] %v7846_v61  ;;  %v1081_v63 = vadd.f32 %v1080_v62, %v7835_v52  ;;  %v7868_v15 = vpop.f32.mrf.mxu0 }
 0x166   : > { %v7849_v1 = vpop.f32.mrf.mxu1  ;;  %10383 = vst [vmem:[#allocation19_spill] sm:$0xff] %v7865_v13  ;;  %6110 = vmatprep.mubr.msk.bf16.mxu1 %vm1308_vm0, %v7865_v13 }
 0x167   : > { %v7872_v17 = vpop.f32.mrf.mxu0 }
 0x168   : > { %v1084_v4 = vpop.f32.mrf.mxu1  ;;  %10384 = vst [vmem:[#allocation20_spill] sm:$0xff] %v7872_v17 }
 0x169   : > { %v1085_v6 = vadd.f32 %v1084_v4, %v7835_v52  ;;  %v7875_v20 = vpop.f32.mrf.mxu0 }
 0x16a   : > { %v7858_v8 = vpop.f32.mrf.mxu1 }
 0x16b   : > { %v7861_v10 = vpack.c.bf16 %v1085_v6, %v1081_v63  ;;  %v7881_v23 = vpop.f32.mrf.mxu0 }
 0x16c   : > { %v1090_v12 = vpop.f32.mrf.mxu1  ;;  %10386 = vst [vmem:[#allocation22_spill] sm:$0xff] %v7881_v23 }
 0x16d   : > { %10381 = vst [vmem:[#allocation17_spill] sm:$0xff] %v7861_v10  ;;  %v1091_v14 = vadd.f32 %v1090_v12, %v7835_v52  ;;  %v7884_v26 = vpop.f32.mrf.mxu0 }
 0x16e   : > { %v1092_v16 = vpop.f32.mrf.mxu1 }
 0x16f   : > { %v7888_v28 = vpop.f32.mrf.mxu0 }
 0x170   : > { %v1094_v18 = vpop.f32.mrf.mxu1  ;;  %10387 = vst [vmem:[#allocation23_spill] sm:$0xff] %v7888_v28 }
 0x171   : > { %v1095_v19 = vadd.f32 %v1094_v18, %v7835_v52  ;;  %v7891_v31 = vpop.f32.mrf.mxu0  ;;  %v1093_v18 = vadd.f32 %v1092_v16, %v7911_v32 }
 0x172   : > { %v7877_v21 = vpop.f32.mrf.mxu1 }
 0x173   : > { %v7879_v22 = vpack.c.bf16 %v1095_v19, %v1091_v14  ;;  %v7895_v35 = vpop.f32.mrf.mxu0 }
 0x174   : > { %v1100_v24 = vpop.f32.mrf.mxu1  ;;  %10389 = vst [vmem:[#allocation25_spill] sm:$0xff] %v7895_v35 }
 0x175   : > { %10385 = vst [vmem:[#allocation21_spill] sm:$0xff] %v7879_v22  ;;  %v1101_v25 = vadd.f32 %v1100_v24, %v7835_v52  ;;  %v7898_v38 = vpop.f32.mrf.mxu0 }
 0x176   : > { %v7886_v27 = vpop.f32.mrf.mxu1 }
 0x177   : > { %v7900_v40 = vpop.f32.mrf.mxu0 }
 0x178   : > { %v1104_v29 = vpop.f32.mrf.mxu1  ;;  %10390 = vst [vmem:[#allocation26_spill] sm:$0xff] %v7900_v40 }
 0x179   : > { %v1105_v30 = vadd.f32 %v1104_v29, %v7835_v52  ;;  %v7904_v44 = vpop.f32.mrf.mxu0 }
 0x17a   : > { %v1108_v33 = vpop.f32.mrf.mxu1 }
 0x17b   : > { %v7893_v34 = vpack.c.bf16 %v1105_v30, %v1101_v25  ;;  %v7908_v47 = vpop.f32.mrf.mxu0  ;;  %v1109_v7 = vadd.f32 %v1108_v33, %v7911_v32  ;;  %v1089_v30 = vadd.f32 %v7858_v8, %v7911_v32 }
 0x17c   : > { %v1110_v36 = vpop.f32.mrf.mxu1  ;;  %10392 = vst [vmem:[#allocation28_spill] sm:$0xff] %v7908_v47 }
 0x17d   : > { %10388 = vst [vmem:[#allocation24_spill] sm:$0xff] %v7893_v34  ;;  %v1111_v37 = vadd.f32 %v1110_v36, %v7835_v52  ;;  %v7914_v54 = vpop.f32.mrf.mxu0 }
 0x17e   : > { %v1112_v39 = vpop.f32.mrf.mxu1 }
 0x17f   : > { %v7918_v60 = vpop.f32.mrf.mxu0  ;;  %v1113_v63 = vadd.f32 %v1112_v39, %v7911_v32  ;;  %v7945_v39 = vpack.c.bf16 %v1093_v18, %v1089_v30  ;;  %v1099_v30 = vadd.f32 %v7877_v21, %v7911_v32 }
 0x180   : > { %v1114_v41 = vpop.f32.mrf.mxu1  ;;  %10393 = vst [vmem:[#allocation29_spill] sm:$0xff] %v7918_v60 }
 0x181   : > { %v1115_v43 = vadd.f32 %v1114_v41, %v7835_v52  ;;  %v7924_v5 = vpop.f32.mrf.mxu0  ;;  %v7934_v19 = vpack.c.bf16 %v1113_v63, %v1109_v7  ;;  %10397 = vst [vmem:[#allocation33_spill] sm:$0xff] %v7945_v39 }
 0x182   : > { %v1118_v45 = vpop.f32.mrf.mxu1 }
 0x183   : > { %v7906_v46 = vpack.c.bf16 %v1115_v43, %v1111_v37  ;;  %v1119_v57 = vadd.f32 %v1118_v45, %v7911_v32  ;;  %v7931_v12 = vpop.f32.mrf.mxu0  ;;  %v1073_v37 = vadd.f32 %v7840_v56, %v7911_v32  ;;  %v1069_v43 = vadd.f32 %v7837_v53, %v7911_v32 }
 0x184   : > { %v1120_v48 = vpop.f32.mrf.mxu1  ;;  %10395 = vst [vmem:[#allocation31_spill] sm:$0xff] %v7931_v12 }
 0x185   : > { %10391 = vst [vmem:[#allocation27_spill] sm:$0xff] %v7906_v46  ;;  %v1121_v50 = vadd.f32 %v1120_v48, %v7835_v52  ;;  %v1005_v25 = vpop.f32.mrf.mxu0 }
 0x186   : > { %v1122_v55 = vpop.f32.mrf.mxu1 }
 0x187   : > { %v1123_v58 = vadd.f32 %v1122_v55, %v7911_v32  ;;  %v7941_v33 = vpop.f32.mrf.mxu0 }
 0x188   : > { %v1124_v62 = vpop.f32.mrf.mxu1  ;;  %10396 = vst [vmem:[#allocation32_spill] sm:$0xff] %v7941_v33 }
 0x189   : > { %v7921_v0 = vpack.c.bf16 %v1123_v58, %v1119_v57  ;;  %v1125_v4 = vadd.f32 %v1124_v62, %v7835_v52  ;;  %v1009_v41 = vpop.f32.mrf.mxu0 }
 0x18a   : > { %v1128_v6 = vpop.f32.mrf.mxu1 }
 0x18b   : > { %v7927_v9 = vpack.c.bf16 %v1125_v4, %v1121_v50  ;;  %1761 = vrot.lane.b32.xlu1 %v7921_v0, %s7584_s18  ;;  %v7954_v8 = vpop.f32.mrf.mxu0  ;;  %v7958_v50 = vpack.c.bf16 %v1073_v37, %v1069_v43  ;;  %v1129_v63 = vadd.f32 %v1128_v6, %v7911_v32  ;;  %v1103_v6 = vadd.f32 %v7886_v27, %v7911_v32 }
 0x18c   : > { %v1130_v14 = vpop.f32.mrf.mxu1  ;;  %10399 = vst [vmem:[#allocation35_spill] sm:$0xff] %v7954_v8  ;;  %v976_v37 = vadd.f32 %v7884_v26, %v7852_v2  ;;  %v1083_v27 = vadd.f32 %v7849_v1, %v7911_v32  ;;  %v1079_v43 = vadd.f32 %v7843_v59, %v7911_v32 }
 0x18d   : > { %10394 = vst [vmem:[#allocation30_spill] sm:$0xff] %v7927_v9  ;;  %v1131_v24 = vadd.f32 %v1130_v14, %v7835_v52  ;;  %10401 = vst [vmem:[#allocation37_spill] sm:$0xff] %v7958_v50  ;;  %v1015_v56 = vpop.f32.mrf.mxu0 }
 0x18e   : > { %v1132_v29 = vpop.f32.mrf.mxu1  ;;  %v8016_v1 = vpack.c.bf16 %v1083_v27, %v1079_v43  ;;  %v990_v43 = vadd.f32 %v7904_v44, %v7852_v2  ;;  %v996_v44 = vadd.f32 %v7914_v54, %v7852_v2 }
 0x18f   : > { %1759 = vrot.lane.b32.xlu1 %v7934_v19, %s7584_s18  ;;  %v1133_v57 = vadd.f32 %v1132_v29, %v7911_v32  ;;  %v7965_v53 = vpop.f32.mrf.mxu0 }
 0x190   : > { %v1134_v36 = vpop.f32.mrf.mxu1  ;;  %10402 = vst [vmem:[#allocation38_spill] sm:$0xff] %v7965_v53  ;;  %10407 = vst [vmem:[#allocation43_spill] sm:$0xff] %v8016_v1 }
 0x191   : > { %v1135_v16 = vadd.f32 %v1134_v36, %v7835_v52  ;;  %v1019_v7 = vpop.f32.mrf.mxu0  ;;  %v7970_v14 = vpack.c.bf16 %v1133_v57, %v1129_v63  ;;  %v970_v57 = vadd.f32 %v7875_v20, %v7852_v2  ;;  %v1010_v63 = vadd.f32 %v1009_v41, %v7852_v2 }
 0x192   : > { %v1138_v42 = vpop.f32.mrf.mxu1  ;;  %v1020_v41 = vadd.f32 %v1019_v7, %v7852_v2  ;;  %v986_v7 = vadd.f32 %v7898_v38, %v7852_v2 }
 0x193   : > { %v7950_v45 = vpack.c.bf16 %v1135_v16, %v1131_v24  ;;  %1755 = vrot.lane.b32.xlu1 %v7945_v39, %s7584_s18  ;;  %v1139_v58 = vadd.f32 %v1138_v42, %v7911_v32  ;;  %v7978_v24 = vpop.f32.mrf.mxu0  ;;  %v980_v16 = vadd.f32 %v7891_v31, %v7852_v2  ;;  %v8002_v42 = vpack.c.bf16 %v1103_v6, %v1099_v30 }
 0x194   : > { %v7956_v48 = vpop.f32.mrf.mxu1  ;;  %10403 = vst [vmem:[#allocation39_spill] sm:$0xff] %v7978_v24  ;;  %v1352_v26 = vsel %vm1308_vm0, %v7970_v14, 0  ;;  %v8078_v38 = vpack.c.bf16 %v990_v43, %v986_v7 }
 0x195   : > { %10398 = vst [vmem:[#allocation34_spill] sm:$0xff] %v7950_v45  ;;  %10400 = vst [vmem:[#allocation36_spill] sm:$0xff] %v7956_v48  ;;  %v7986_v29 = vpop.f32.mrf.mxu0  ;;  %v8012_v31 = vpack.c.bf16 %v980_v16, %v976_v37  ;;  %v1343_v54 = vsel %vm1308_vm0, %v8002_v42, 0 }
 0x196   : > { %v1142_v55 = vpop.f32.mrf.mxu1  ;;  %10415 = vst [vmem:[#allocation51_spill] sm:$0xff] %v8078_v38  ;;  %v1026_v7 = vadd.f32 %v7986_v29, %v7852_v2  ;;  %v1340_v29 = vsel %vm1308_vm0, %v7945_v39, 0 }
 0x197   : > { %v1143_v62 = vadd.f32 %v1142_v55, %v7911_v32  ;;  %1751 = vrot.lane.b32.xlu1 %v7958_v50, %s7584_s18  ;;  %v7992_v36 = vpop.f32.mrf.mxu0  ;;  %10406 = vst [vmem:[#allocation42_spill] sm:$0xff] %v8012_v31  ;;  %v966_v32 = vadd.f32 %v7868_v15, %v7852_v2  ;;  %v1349_v15 = vsel %vm1308_vm0, %v7921_v0, 0 }
 0x198   : > { %10404 = vst [vmem:[#allocation40_spill] sm:$0xff] %v7992_v36 }
 0x199   : > { %v7968_v4 = vpack.c.bf16 %v1143_v62, %v1139_v58  ;;  %v1029_v21 = vpop.f32.mrf.mxu0  ;;  %v1006_v62 = vadd.f32 %v1005_v25, %v7852_v2  ;;  %v8034_v6 = vpack.c.bf16 %v970_v57, %v966_v32  ;;  %v1016_v25 = vadd.f32 %v1015_v56, %v7852_v2 }
 0x19a   : > { %v1030_v43 = vadd.f32 %v1029_v21, %v7852_v2 }
 0x19b   : > { %1765 = vrot.lane.b32.xlu0 %v7968_v4, %s7584_s18  ;;  %6606 = vmatprep.subr.msk.bf16.mxu1 %vm1308_vm0, %v7968_v4  ;;  %v1355_v18 = vsel %vm1308_vm0, %v7968_v4, 0  ;;  %v8010_v55 = vpop.f32.mrf.mxu0  ;;  %10409 = vst [vmem:[#allocation45_spill] sm:$0xff] %v8034_v6  ;;  %v8042_v30 = vpack.c.bf16 %v1010_v63, %v1006_v62  ;;  %v8056_v27 = vpack.c.bf16 %v1020_v41, %v1016_v25 }
 0x19c   : > { %2304 = vrot.lane.b32.xlu1 %v7968_v4, %s7585_s20  ;;  %6095 = vmatpush3.bf16.xpose.msra.mxu1 %v1355_v18  ;;  %10405 = vst [vmem:[#allocation41_spill] sm:$0xff] %v8010_v55  ;;  %v1000_v62 = vadd.f32 %v7924_v5, %v7852_v2 }
 0x19d   : > { %6607 = vmatprep.subr.msk.bf16.mxu1 %vm1308_vm0, %v7970_v14  ;;  %v8020_v59 = vpop.f32.mrf.mxu0  ;;  %10411 = vst [vmem:[#allocation47_spill] sm:$0xff] %v8042_v30  ;;  %10413 = vst [vmem:[#allocation49_spill] sm:$0xff] %v8056_v27 }
 0x19e   : > { %v8092_v25 = vpack.c.bf16 %v1000_v62, %v996_v44  ;;  %v349_v62 = vsub.s32 4, %v7829_v49 }
 0x19f   : > { %1763 = vrot.lane.b32.xlu0 %v7970_v14, %s7584_s18  ;;  %v8028_v58 = vpop.f32.mrf.mxu0 }
 0x1a0   : > { %2302 = vrot.lane.b32.xlu1 %v7970_v14, %s7585_s20  ;;  %10408 = vst [vmem:[#allocation44_spill] sm:$0xff] %v8028_v58  ;;  %10417 = vst [vmem:[#allocation53_spill] sm:$0xff] %v8092_v25  ;;  %v8127_v21 = vrot.slane %v7832_v51, %v349_v62  ;;  %v1337_v51 = vsel %vm1308_vm0, %v8016_v1, 0 }
 0x1a1   : > { %v1185_v18 = vpop.f32.mrf.mxu0 }
 0x1a3   : > { %1757 = vrot.lane.b32.xlu0 %v8002_v42, %s7584_s18  ;;  %v8040_v20 = vpop.f32.mrf.mxu0 }
 0x1a4   : > { %2298 = vrot.lane.b32.xlu1 %v7934_v19, %s7585_s20  ;;  %6097 = vmatpush3.bf16.xpose.msra.mxu1 %v1352_v26  ;;  %10410 = vst [vmem:[#allocation46_spill] sm:$0xff] %v8040_v20  ;;  %v1346_v26 = vsel %vm1308_vm0, %v7934_v19, 0 }
 0x1a5   : > { %6608 = vmatprep.subr.msk.bf16.mxu1 %vm1308_vm0, %v7921_v0  ;;  %v8050_v37 = vpop.f32.mrf.mxu0 }
 0x1a6   : > { %v1192_v60 = vadd.f32 %v8050_v37, %v8127_v21 }
 0x1a7   : > { %1753 = vrot.lane.b32.xlu0 %v8016_v1, %s7584_s18  ;;  %v8054_v16 = vpop.f32.mrf.mxu0 }
 0x1a8   : > { %1731 = vrot.lane.b32.xlu1 %v8012_v31, %s7584_s18  ;;  %10412 = vst [vmem:[#allocation48_spill] sm:$0xff] %v8054_v16 }
 0x1a9   : > { %v8060_v56 = vpop.f32.mrf.mxu0 }
 0x1aa   : > { %v1196_v47 = vadd.f32 %v8060_v56, %v8127_v21 }
 0x1ab   : > { %1727 = vrot.lane.b32.xlu0 %v7865_v13, %s7584_s18  ;;  %v8070_v32 = vpop.f32.mrf.mxu0 }
 0x1ac   : > { %2294 = vrot.lane.b32.xlu1 %v7945_v39, %s7585_s20  ;;  %6099 = vmatpush3.bf16.xpose.msra.mxu1 %v1349_v15  ;;  %10414 = vst [vmem:[#allocation50_spill] sm:$0xff] %v8070_v32  ;;  %v8210_v37 = vpack.c.bf16 %v1196_v47, %v1192_v60 }
 0x1ad   : > { %6609 = vmatprep.subr.msk.bf16.mxu1 %vm1308_vm0, %v7934_v19  ;;  %v8076_v57 = vpop.f32.mrf.mxu0 }
 0x1ae   : > { %10434 = vst [vmem:[#allocation70_spill] sm:$0xff] %v8210_v37 }
 0x1af   : > { %1729 = vrot.lane.b32.xlu0 %v8034_v6, %s7584_s18  ;;  %v8086_v63 = vpop.f32.mrf.mxu0 }
 0x1b0   : > { %1737 = vrot.lane.b32.xlu1 %v8042_v30, %s7584_s18  ;;  %10416 = vst [vmem:[#allocation52_spill] sm:$0xff] %v8086_v63 }
 0x1b1   : > { %v8090_v15 = vpop.f32.mrf.mxu0 }
 0x1b3   : > { %2300 = vrot.lane.b32.xlu0 %v7921_v0, %s7585_s20  ;;  %v8098_v41 = vpop.f32.mrf.mxu0 }
 0x1b4   : > { %1739 = vrot.lane.b32.xlu1 %v8056_v27, %s7584_s18  ;;  %6101 = vmatpush3.bf16.xpose.msra.mxu1 %v1346_v26  ;;  %10418 = vst [vmem:[#allocation54_spill] sm:$0xff] %v8098_v41 }
 0x1b5   : > { %6610 = vmatprep.subr.msk.bf16.mxu1 %vm1308_vm0, %v8002_v42  ;;  %v1211_v5 = vpop.f32.mrf.mxu0 }
 0x1b7   : > { %2296 = vrot.lane.b32.xlu0 %v8002_v42, %s7585_s20  ;;  %v8109_v26 = vpop.f32.mrf.mxu0 }
 0x1b8   : > { %2290 = vrot.lane.b32.xlu1 %v7958_v50, %s7585_s20  ;;  %10419 = vst [vmem:[#allocation55_spill] sm:$0xff] %v8109_v26 }
 0x1b9   : > { %v1215_v44 = vpop.f32.mrf.mxu0 }
 0x1ba   : > { %v1216_v53 = vadd.f32 %v1215_v44, %v8127_v21 }
 0x1bb   : > { %1733 = vrot.lane.b32.xlu0 %v8078_v38, %s7584_s18  ;;  %v8120_v55 = vpop.f32.mrf.mxu0 }
 0x1bc   : > { %2276 = vrot.lane.b32.xlu1 %v8034_v6, %s7585_s20  ;;  %6103 = vmatpush3.bf16.xpose.msra.mxu1 %v1343_v54  ;;  %v8114_v54 = vpack.c.bf16 %v1030_v43, %v1026_v7  ;;  %10421 = vst [vmem:[#allocation57_spill] sm:$0xff] %v8120_v55  ;;  %v1182_v43 = vadd.f32 %v8020_v59, %v8127_v21 }
 0x1bd   : > { %6611 = vmatprep.subr.msk.bf16.mxu1 %vm1308_vm0, %v7945_v39  ;;  %v1221_v2 = vpop.f32.mrf.mxu0 }
 0x1be   : > { %10420 = vst [vmem:[#allocation56_spill] sm:$0xff] %v8114_v54 }
 0x1bf   : > { %1735 = vrot.lane.b32.xlu0 %v8092_v25, %s7584_s18  ;;  %v8131_v7 = vpop.f32.mrf.mxu0 }
 0x1c0   : > { %2280 = vrot.lane.b32.xlu1 %v8078_v38, %s7585_s20  ;;  %10422 = vst [vmem:[#allocation58_spill] sm:$0xff] %v8131_v7 }
 0x1c1   : > { %v1225_v36 = vpop.f32.mrf.mxu0 }
 0x1c3   : > { %2292 = vrot.lane.b32.xlu0 %v8016_v1, %s7585_s20  ;;  %v8142_v62 = vpop.f32.mrf.mxu0 }
 0x1c4   : > { %2284 = vrot.lane.b32.xlu1 %v8042_v30, %s7585_s20  ;;  %6105 = vmatpush3.bf16.xpose.msra.mxu1 %v1340_v29  ;;  %v1186_v29 = vadd.f32 %v1185_v18, %v8127_v21  ;;  %10423 = vst [vmem:[#allocation59_spill] sm:$0xff] %v8142_v62  ;;  %v1212_v18 = vadd.f32 %v1211_v5, %v8127_v21  ;;  %v1334_v5 = vsel %vm1308_vm0, %v7958_v50, 0 }
 0x1c5   : > { %6612 = vmatprep.subr.msk.bf16.mxu1 %vm1308_vm0, %v8016_v1  ;;  %v1231_v59 = vpop.f32.mrf.mxu0 }
 0x1c6   : > { %v8146_v24 = vpack.c.bf16 %v1186_v29, %v1182_v43  ;;  %v1222_v43 = vadd.f32 %v1221_v2, %v8127_v21  ;;  %v1226_v29 = vadd.f32 %v1225_v36, %v8127_v21  ;;  %v1232_v56 = vadd.f32 %v1231_v59, %v8127_v21 }
 0x1c7   : > { %1741 = vrot.lane.b32.xlu0 %v8114_v54, %s7584_s18  ;;  %v8154_v8 = vpop.f32.mrf.mxu0 }
 0x1c8   : > { %2288 = vrot.lane.b32.xlu1 %v8114_v54, %s7585_s20  ;;  %10424 = vst [vmem:[#allocation60_spill] sm:$0xff] %v8146_v24  ;;  %10425 = vst [vmem:[#allocation61_spill] sm:$0xff] %v8154_v8  ;;  %v8170_v12 = vpack.c.bf16 %v1226_v29, %v1222_v43 }
 0x1ca   : > { %10428 = vst [vmem:[#allocation64_spill] sm:$0xff] %v8170_v12 }
 0x1cb   : > { %2274 = vrot.lane.b32.xlu0 %v7865_v13, %s7585_s20 }
 0x1cc   : > { %2835 = vrot.lane.b32.xlu1 %v7968_v4, %s7586_s25  ;;  %6107 = vmatpush3.bf16.xpose.msra.mxu1 %v1337_v51  ;;  %v1235_v4 = vpop.f32.mrf.mxu0  ;;  %v8158_v51 = vpack.c.bf16 %v1216_v53, %v1212_v18 }
 0x1cd   : > { %6613 = vmatprep.subr.msk.bf16.mxu1 %vm1308_vm0, %v7958_v50 }
 0x1ce   : > { %10426 = vst [vmem:[#allocation62_spill] sm:$0xff] %v8158_v51  ;;  %v8166_v44 = vpop.f32.mrf.mxu0 }
 0x1cf   : > { %2278 = vrot.lane.b32.xlu0 %v8012_v31, %s7585_s20  ;;  %10427 = vst [vmem:[#allocation63_spill] sm:$0xff] %v8166_v44 }
 0x1d0   : > { %2072 = vrot.lane.b32.xlu1 %v8146_v24, %s7584_s18  ;;  %v1241_v33 = vpop.f32.mrf.mxu0 }
 0x1d1   : > { %v1242_v29 = vadd.f32 %v1241_v33, %v8127_v21 }
 0x1d2   : > { %v8174_v53 = vpop.f32.mrf.mxu0 }
 0x1d3   : > { %2282 = vrot.lane.b32.xlu0 %v8092_v25, %s7585_s20  ;;  %10429 = vst [vmem:[#allocation65_spill] sm:$0xff] %v8174_v53 }
 0x1d4   : > { %6109 = vmatpush3.bf16.xpose.msra.mxu1 %v1334_v5  ;;  %2078 = vrot.lane.b32.xlu1 %v8158_v51, %s7584_s18  ;;  %v1245_v36 = vpop.f32.mrf.mxu0 }
 0x1d6   : > { %v8182_v2 = vpop.f32.mrf.mxu0 }
 0x1d7   : > { %2286 = vrot.lane.b32.xlu0 %v8056_v27, %s7585_s20  ;;  %10430 = vst [vmem:[#allocation66_spill] sm:$0xff] %v8182_v2 }
 0x1d8   : > { %2080 = vrot.lane.b32.xlu1 %v8170_v12, %s7584_s18  ;;  %v1251_v18 = vpop.f32.mrf.mxu0 }
 0x1d9   : > { %v1252_v5 = vadd.f32 %v1251_v18, %v8127_v21 }
 0x1da   : > { %v8190_v43 = vpop.f32.mrf.mxu0 }
 0x1db   : > { %2833 = vrot.lane.b32.xlu0 %v7970_v14, %s7586_s25  ;;  %6111 = vmatmul.mubr.msk.bf16.vlgmr.msra.gmra.mxu1 %vm1308_vm0, %v8034_v6  ;;  %10431 = vst [vmem:[#allocation67_spill] sm:$0xff] %v8190_v43  ;;  %v1246_v14 = vadd.f32 %v1245_v36, %v8127_v21  ;;  %v1236_v36 = vadd.f32 %v1235_v4, %v8127_v21 }
 0x1dc   : > { %6114 = vmatprep.mubr.msk.bf16.mxu1 %vm1308_vm0, %v8012_v31  ;;  %2611 = vrot.lane.b32.xlu1 %v8170_v12, %s7585_s20  ;;  %v1255_v40 = vpop.f32.mrf.mxu0 }
 0x1dd   : > { %v1256_v35 = vadd.f32 %v1255_v40, %v8127_v21  ;;  %v1206_v40 = vadd.f32 %v8090_v15, %v8127_v21  ;;  %v8225_v47 = vpack.c.bf16 %v1236_v36, %v1232_v56 }
 0x1df   : > { %2831 = vrot.lane.b32.xlu0 %v7921_v0, %s7586_s25  ;;  %v8206_v0 = vpack.c.bf16 %v1246_v14, %v1242_v29  ;;  %v8208_v33 = vpack.c.bf16 %v1256_v35, %v1252_v5  ;;  %v1202_v35 = vadd.f32 %v8076_v57, %v8127_v21  ;;  %10435 = vst [vmem:[#allocation71_spill] sm:$0xff] %v8225_v47 }
 0x1e1   : > { %10432 = vst [vmem:[#allocation68_spill] sm:$0xff] %v8206_v0  ;;  %10433 = vst [vmem:[#allocation69_spill] sm:$0xff] %v8208_v33  ;;  %6126 = vmatprep.subr.bf16.mxu1 %v8208_v33  ;;  %2086 = vrot.lane.b32.xlu1 %v8208_v33, %s7584_s18  ;;  %v8236_v60 = vpack.c.bf16 %v1206_v40, %v1202_v35 }
 0x1e2   : > { %6127 = vmatpush3.bf16.msra.mxu1 %v8208_v33 }
 0x1e3   : > { %6115 = vmatmul.mubr.msk.bf16.gmra.mxu1 %vm1308_vm0, %v8078_v38  ;;  %2603 = vrot.lane.b32.xlu0 %v8146_v24, %s7585_s20  ;;  %10436 = vst [vmem:[#allocation72_spill] sm:$0xff] %v8236_v60 }
 0x1e4   : > { %6118 = vmatprep.mubr.msk.bf16.mxu1 %vm1308_vm0, %v8092_v25  ;;  %6128 = vmatprep.subr.bf16.mxu1 %v8206_v0 }
 0x1e5   : > { %2617 = vrot.lane.b32.xlu1 %v8208_v33, %s7585_s20 }
 0x1e6   : > { %6129 = vmatpush3.bf16.msra.mxu1 %v8206_v0 }
 0x1e7   : > { %2074 = vrot.lane.b32.xlu0 %v8210_v37, %s7584_s18  ;;  %6130 = vmatprep.subr.bf16.mxu1 %v8225_v47 }
 0x1ea   : > { %6131 = vmatpush3.bf16.msra.mxu1 %v8225_v47 }
 0x1eb   : > { %6119 = vmatmul.mubr.msk.bf16.gmra.mxu1 %vm1308_vm0, %v8042_v30  ;;  %2605 = vrot.lane.b32.xlu0 %v8210_v37, %s7585_s20 }
 0x1ec   : > { %6122 = vmatprep.mubr.msk.bf16.mxu1 %vm1308_vm0, %v8056_v27  ;;  %6132 = vmatprep.subr.bf16.mxu1 %v8170_v12 }
 0x1ee   : > { %6133 = vmatpush3.bf16.msra.mxu1 %v8170_v12 }
 0x1ef   : > { %2076 = vrot.lane.b32.xlu0 %v8236_v60, %s7584_s18  ;;  %6134 = vmatprep.subr.bf16.mxu1 %v8158_v51 }
 0x1f2   : > { %6135 = vmatpush3.bf16.msra.mxu1 %v8158_v51 }
 0x1f3   : > { %6123 = vmatmul.mubr.msk.bf16.gmra.mxu1 %vm1308_vm0, %v8114_v54  ;;  %2607 = vrot.lane.b32.xlu0 %v8236_v60, %s7585_s20 }
 0x1f4   : > { %6136 = vmatprep.subr.bf16.mxu1 %v8236_v60 }
 0x1f6   : > { %6137 = vmatpush3.bf16.msra.mxu1 %v8236_v60 }
 0x1f7   : > { %2609 = vrot.lane.b32.xlu0 %v8158_v51, %s7585_s20  ;;  %6138 = vmatprep.subr.bf16.mxu1 %v8210_v37  ;;  %v8410_v51 = vpop.f32.mrf.mxu0 }
 0x1f8   : > { %10446 = vst [vmem:[#allocation82_spill] sm:$0xff] %v8410_v51 }
 0x1fa   : > { %6139 = vmatpush3.bf16.msra.mxu1 %v8210_v37 }
 0x1fb   : > { %2082 = vrot.lane.b32.xlu0 %v8225_v47, %s7584_s18  ;;  %6140 = vmatprep.subr.bf16.mxu1 %v8146_v24 }
 0x1fd   : > { %v1762_v57 = vpop.permute.xlu1 %1761 }
 0x1fe   : > { %6141 = vmatpush3.bf16.msra.mxu1 %v8146_v24 }
 0x1ff   : > { %2613 = vrot.lane.b32.xlu0 %v8225_v47, %s7585_s20 }
 0x201   : > { %v1760_v15 = vpop.permute.xlu1 %1759 }
 0x202   : > { %v1804_v3 = vsel %vm1308_vm0, %v1760_v15, 0 }
 0x203   : > { %2084 = vrot.lane.b32.xlu0 %v8206_v0, %s7584_s18 }
 0x205   : > { %v1756_v21 = vpop.permute.xlu1 %1755 }
 0x207   : > { %2615 = vrot.lane.b32.xlu0 %v8206_v0, %s7585_s20 }
 0x209   : > { %v1752_v59 = vpop.permute.xlu1 %1751 }
 0x20a   : > { %v1792_v34 = vsel %vm1308_vm0, %v1752_v59, 0 }
 0x20d   : > { %v1766_v4 = vpop.permute.xlu0 %1765 }
 0x20e   : > { %v2305_v18 = vpop.permute.xlu1 %2304  ;;  %6614 = vmatprep.subr.msk.bf16.mxu0 %vm1308_vm0, %v1766_v4  ;;  %v1813_v29 = vsel %vm1308_vm0, %v1766_v4, 0  ;;  %v1807_v4 = vsel %vm1308_vm0, %v1762_v57, 0 }
 0x20f   : > { %6159 = vmatpush3.bf16.xpose.msra.mxu0 %v1813_v29 }
 0x211   : > { %v1764_v14 = vpop.permute.xlu0 %1763 }
 0x212   : > { %v2303_v5 = vpop.permute.xlu1 %2302  ;;  %6615 = vmatprep.subr.msk.bf16.mxu0 %vm1308_vm0, %v1764_v14  ;;  %v1810_v35 = vsel %vm1308_vm0, %v1764_v14, 0 }
 0x215   : > { %v1758_v56 = vpop.permute.xlu0 %1757 }
 0x216   : > { %v8269_v36 = vpop.permute.xlu1 %2298  ;;  %v1801_v61 = vsel %vm1308_vm0, %v1758_v56, 0 }
 0x217   : > { %6161 = vmatpush3.bf16.xpose.msra.mxu0 %v1810_v35 }
 0x218   : > { %6616 = vmatprep.subr.msk.bf16.mxu0 %vm1308_vm0, %v1762_v57 }
 0x219   : > { %v1754_v40 = vpop.permute.xlu0 %1753 }
 0x21a   : > { %v1732_v28 = vpop.permute.xlu1 %1731  ;;  %v1795_v10 = vsel %vm1308_vm0, %v1754_v40, 0 }
 0x21d   : > { %v1728_v23 = vpop.permute.xlu0 %1727 }
 0x21e   : > { %v8273_v17 = vpop.permute.xlu1 %2294  ;;  %6174 = vmatprep.mubr.msk.bf16.mxu0 %vm1308_vm0, %v1728_v23 }
 0x21f   : > { %6163 = vmatpush3.bf16.xpose.msra.mxu0 %v1807_v4  ;;  %v1798_v4 = vsel %vm1308_vm0, %v1756_v21, 0 }
 0x220   : > { %6617 = vmatprep.subr.msk.bf16.mxu0 %vm1308_vm0, %v1760_v15 }
 0x222   : > { %v1738_v29 = vpop.permute.xlu1 %1737 }
 0x226   : > { %v1740_v11 = vpop.permute.xlu1 %1739 }
 0x227   : > { %6165 = vmatpush3.bf16.xpose.msra.mxu0 %v1804_v3  ;;  %v1730_v3 = vpop.permute.xlu0 %1729 }
 0x228   : > { %6618 = vmatprep.subr.msk.bf16.mxu0 %vm1308_vm0, %v1758_v56 }
 0x22a   : > { %v2291_v14 = vpop.permute.xlu1 %2290 }
 0x22e   : > { %v8280_v35 = vpop.permute.xlu1 %2276 }
 0x22f   : > { %6167 = vmatpush3.bf16.xpose.msra.mxu0 %v1801_v61  ;;  %v2301_v61 = vpop.permute.xlu0 %2300 }
 0x230   : > { %6619 = vmatprep.subr.msk.bf16.mxu0 %vm1308_vm0, %v1756_v21 }
 0x232   : > { %v2281_v57 = vpop.permute.xlu1 %2280 }
 0x233   : > { %v2297_v21 = vpop.permute.xlu0 %2296 }
 0x236   : > { %v8284_v23 = vpop.permute.xlu1 %2284 }
 0x237   : > { %6169 = vmatpush3.bf16.xpose.msra.mxu0 %v1798_v4  ;;  %v1734_v46 = vpop.permute.xlu0 %1733 }
 0x238   : > { %6620 = vmatprep.subr.msk.bf16.mxu0 %vm1308_vm0, %v1754_v40 }
 0x23a   : > { %v8288_v15 = vpop.permute.xlu1 %2288 }
 0x23b   : > { %v1736_v9 = vpop.permute.xlu0 %1735 }
 0x23e   : > { %v8291_v22 = vpop.permute.xlu1 %2835 }
 0x23f   : > { %6171 = vmatpush3.bf16.xpose.msra.mxu0 %v1795_v10  ;;  %10437 = vst [vmem:[#allocation73_spill] sm:$0xff] %v8291_v22  ;;  %v2352_v10 = vsel %vm1308_vm0, %v2305_v18, 0 }
 0x240   : > { %6621 = vmatprep.subr.msk.bf16.mxu0 %vm1308_vm0, %v1752_v59 }
 0x242   : > { %v8294_v56 = vpop.permute.xlu1 %2072 }
 0x246   : > { %v8298_v4 = vpop.permute.xlu1 %2078 }
 0x247   : > { %6173 = vmatpush3.bf16.xpose.msra.mxu0 %v1792_v34  ;;  %v2349_v34 = vsel %vm1308_vm0, %v2303_v5, 0 }
 0x248   : > { %6622 = vmatprep.subr.msk.bf16.mxu0 %vm1308_vm0, %v2305_v18 }
 0x24a   : > { %v8302_v40 = vpop.permute.xlu1 %2080 }
 0x24e   : > { %6175 = vmatmul.mubr.msk.bf16.vlgmr.msra.gmra.mxu0 %vm1308_vm0, %v1730_v3  ;;  %v8306_v59 = vpop.permute.xlu1 %2611  ;;  %v2346_v3 = vsel %vm1308_vm0, %v2301_v61, 0 }
 0x24f   : > { %6178 = vmatprep.mubr.msk.bf16.mxu0 %vm1308_vm0, %v1732_v28  ;;  %6223 = vmatpush3.bf16.xpose.msra.mxu0 %v2352_v10  ;;  %10438 = vst [vmem:[#allocation74_spill] sm:$0xff] %v8306_v59  ;;  %v2293_v28 = vpop.permute.xlu0 %2292 }
 0x250   : > { %6623 = vmatprep.subr.msk.bf16.mxu0 %vm1308_vm0, %v2303_v5  ;;  %v2343_v5 = vsel %vm1308_vm0, %v8269_v36, 0 }
 0x253   : > { %v8312_v18 = vpop.permute.xlu1 %2086 }
 0x254   : > { %6190 = vmatprep.subr.bf16.mxu1 %v8312_v18 }
 0x256   : > { %6179 = vmatmul.mubr.msk.bf16.gmra.mxu0 %vm1308_vm0, %v1734_v46  ;;  %v1742_v46 = vpop.permute.xlu0 %1741 }
 0x257   : > { %6182 = vmatprep.mubr.msk.bf16.mxu0 %vm1308_vm0, %v1736_v9  ;;  %6225 = vmatpush3.bf16.xpose.msra.mxu0 %v2349_v34  ;;  %v8458_v43 = vpop.permute.xlu1 %2617 }
 0x258   : > { %6624 = vmatprep.subr.msk.bf16.mxu0 %vm1308_vm0, %v2301_v61  ;;  %v2334_v61 = vsel %vm1308_vm0, %v2293_v28, 0 }
 0x25a   : > { %v2275_v9 = vpop.permute.xlu0 %2274 }
 0x25e   : > { %6183 = vmatmul.mubr.msk.bf16.gmra.mxu0 %vm1308_vm0, %v1738_v29  ;;  %v2340_v29 = vsel %vm1308_vm0, %v2297_v21, 0  ;;  %v2279_v10 = vpop.permute.xlu0 %2278 }
 0x25f   : > { %6227 = vmatpush3.bf16.xpose.msra.mxu0 %v2346_v3  ;;  %6186 = vmatprep.mubr.msk.bf16.mxu0 %vm1308_vm0, %v1740_v11  ;;  %v2337_v11 = vsel %vm1308_vm0, %v8273_v17, 0 }
 0x260   : > { %6625 = vmatprep.subr.msk.bf16.mxu0 %vm1308_vm0, %v8269_v36  ;;  %v2331_v36 = vsel %vm1308_vm0, %v2291_v14, 0 }
 0x266   : > { %6187 = vmatmul.mubr.msk.bf16.gmra.mxu0 %vm1308_vm0, %v1742_v46 }
 0x267   : > { %6229 = vmatpush3.bf16.xpose.msra.mxu0 %v2343_v5  ;;  %6238 = vmatprep.mubr.msk.bf16.mxu0 %vm1308_vm0, %v2275_v9 }
 0x268   : > { %6626 = vmatprep.subr.msk.bf16.mxu0 %vm1308_vm0, %v2297_v21  ;;  %v2283_v21 = vpop.permute.xlu0 %2282 }
 0x26f   : > { %6231 = vmatpush3.bf16.xpose.msra.mxu0 %v2340_v29 }
 0x270   : > { %6627 = vmatprep.subr.msk.bf16.mxu0 %vm1308_vm0, %v8273_v17  ;;  %v8339_v17 = vpop.f32.mrf.mxu1 }
 0x271   : > { %10439 = vst [vmem:[#allocation75_spill] sm:$0xff] %v8339_v17 }
 0x277   : > { %6233 = vmatpush3.bf16.xpose.msra.mxu0 %v2337_v11 }
 0x278   : > { %6628 = vmatprep.subr.msk.bf16.mxu0 %vm1308_vm0, %v2293_v28 }
 0x27f   : > { %6235 = vmatpush3.bf16.xpose.msra.mxu0 %v2334_v61 }
 0x280   : > { %6629 = vmatprep.subr.msk.bf16.mxu0 %vm1308_vm0, %v2291_v14  ;;  %v2287_v14 = vpop.permute.xlu0 %2286 }
 0x287   : > { %6237 = vmatpush3.bf16.xpose.msra.mxu0 %v2331_v36 }
 0x28e   : > { %6239 = vmatmul.mubr.msk.bf16.vlgmr.msra.gmra.mxu0 %vm1308_vm0, %v8280_v35 }
 0x28f   : > { %6242 = vmatprep.mubr.msk.bf16.mxu0 %vm1308_vm0, %v2279_v10 }
 0x296   : > { %6243 = vmatmul.mubr.msk.bf16.gmra.mxu0 %vm1308_vm0, %v2281_v57 }
 0x297   : > { %6246 = vmatprep.mubr.msk.bf16.mxu0 %vm1308_vm0, %v2283_v21 }
 0x29b   : > { %v8341_v34 = vpop.f32.mrf.mxu1 }
 0x29c   : > { %1458 = vmax.xlane.f32.xlu0 %v8341_v34 }
 0x29d   : > { %v8344_v28 = vpop.f32.mrf.mxu1 }
 0x29e   : > { %6247 = vmatmul.mubr.msk.bf16.gmra.mxu0 %vm1308_vm0, %v8284_v23 }
 0x29f   : > { %v8348_v35 = vpop.f32.mrf.mxu1  ;;  %6250 = vmatprep.mubr.msk.bf16.mxu0 %vm1308_vm0, %v2287_v14  ;;  %v8394_v14 = vpop.permute.xlu0 %2833 }
 0x2a0   : > { %1454 = vmax.xlane.f32.xlu0 %v8344_v28  ;;  %10440 = vst [vmem:[#allocation76_spill] sm:$0xff] %v8394_v14 }
 0x2a1   : > { %v8352_v57 = vpop.f32.mrf.mxu1 }
 0x2a2   : > { %1456 = vmax.xlane.f32.xlu1 %v8352_v57 }
 0x2a3   : > { %v8355_v3 = vpop.f32.mrf.mxu1  ;;  %v8396_v45 = vpop.permute.xlu0 %2831 }
 0x2a4   : > { %1460 = vmax.xlane.f32.xlu0 %v8348_v35  ;;  %10441 = vst [vmem:[#allocation77_spill] sm:$0xff] %v8396_v45 }
 0x2a5   : > { %v8358_v46 = vpop.f32.mrf.mxu1 }
 0x2a6   : > { %6251 = vmatmul.mubr.msk.bf16.gmra.mxu0 %vm1308_vm0, %v8288_v15  ;;  %1466 = vmax.xlane.f32.xlu1 %v8355_v3 }
 0x2a7   : > { %v8363_v23 = vpop.f32.mrf.mxu1  ;;  %v8398_v48 = vpop.permute.xlu0 %2603 }
 0x2a8   : > { %1468 = vmax.xlane.f32.xlu0 %v8363_v23  ;;  %10442 = vst [vmem:[#allocation78_spill] sm:$0xff] %v8398_v48 }
 0x2a9   : > { %v8366_v9 = vpop.f32.mrf.mxu1 }
 0x2aa   : > { %1462 = vmax.xlane.f32.xlu1 %v8358_v46 }
 0x2ab   : > { %v8369_v5 = vpop.f32.mrf.mxu1  ;;  %v8400_v17 = vpop.permute.xlu0 %2074 }
 0x2ac   : > { %1464 = vmax.xlane.f32.xlu0 %v8366_v9 }
 0x2ad   : > { %v8372_v29 = vpop.f32.mrf.mxu1 }
 0x2ae   : > { %1474 = vmax.xlane.f32.xlu1 %v8369_v5 }
 0x2af   : > { %v8375_v11 = vpop.f32.mrf.mxu1  ;;  %v8402_v52 = vpop.permute.xlu0 %2605 }
 0x2b0   : > { %1476 = vmax.xlane.f32.xlu0 %v8375_v11  ;;  %10443 = vst [vmem:[#allocation79_spill] sm:$0xff] %v8402_v52 }
 0x2b1   : > { %v8378_v15 = vpop.f32.mrf.mxu1 }
 0x2b2   : > { %1470 = vmax.xlane.f32.xlu1 %v8372_v29 }
 0x2b3   : > { %v8381_v61 = vpop.f32.mrf.mxu1  ;;  %v8404_v37 = vpop.permute.xlu0 %2076 }
 0x2b4   : > { %1472 = vmax.xlane.f32.xlu0 %v8378_v15 }
 0x2b5   : > { %v8384_v36 = vpop.f32.mrf.mxu1 }
 0x2b6   : > { %1482 = vmax.xlane.f32.xlu1 %v8381_v61 }
 0x2b7   : > { %v8387_v10 = vpop.f32.mrf.mxu1  ;;  %v8406_v24 = vpop.permute.xlu0 %2607 }
 0x2b8   : > { %1484 = vmax.xlane.f32.xlu0 %v8387_v10  ;;  %10444 = vst [vmem:[#allocation80_spill] sm:$0xff] %v8406_v24 }
 0x2b9   : > { %v8391_v21 = vpop.f32.mrf.mxu1 }
 0x2ba   : > { %1478 = vmax.xlane.f32.xlu1 %v8384_v36 }
 0x2bb   : > { %v8408_v60 = vpop.permute.xlu0 %2609 }
 0x2bc   : > { %1480 = vmax.xlane.f32.xlu0 %v8391_v21  ;;  %10445 = vst [vmem:[#allocation81_spill] sm:$0xff] %v8408_v60 }
 0x2bf   : > { %v8414_v47 = vpop.permute.xlu0 %2082 }
 0x2c3   : > { %v8425_v58 = vpop.permute.xlu0 %2613 }
 0x2c4   : > { %10447 = vst [vmem:[#allocation83_spill] sm:$0xff] %v8425_v58 }
 0x2c7   : > { %v8435_v63 = vpop.permute.xlu0 %2084 }
 0x2cb   : > { %v8447_v7 = vpop.permute.xlu0 %2615 }
 0x2cc   : > { %10448 = vst [vmem:[#allocation84_spill] sm:$0xff] %v8447_v7 }
 0x30e   : > { %v8412_v12 = vpop.f32.mrf.mxu0 }
 0x30f   : > { %1916 = vmax.xlane.f32.xlu1 %v8412_v12 }
 0x310   : > { %v8417_v33 = vpop.f32.mrf.mxu0 }
 0x312   : > { %v8419_v0 = vpop.f32.mrf.mxu0 }
 0x313   : > { %1912 = vmax.xlane.f32.xlu1 %v8417_v33  ;;  %1918 = vmax.xlane.f32.xlu0 %v8419_v0 }
 0x314   : > { %v8423_v20 = vpop.f32.mrf.mxu0 }
 0x316   : > { %v8427_v32 = vpop.f32.mrf.mxu0 }
 0x317   : > { %1924 = vmax.xlane.f32.xlu1 %v8427_v32  ;;  %1914 = vmax.xlane.f32.xlu0 %v8423_v20 }
 0x318   : > { %v8431_v16 = vpop.f32.mrf.mxu0 }
 0x31a   : > { %v8433_v41 = vpop.f32.mrf.mxu0 }
 0x31b   : > { %1920 = vmax.xlane.f32.xlu1 %v8431_v16  ;;  %1926 = vmax.xlane.f32.xlu0 %v8433_v41 }
 0x31c   : > { %v8439_v55 = vpop.f32.mrf.mxu0 }
 0x31e   : > { %v8441_v26 = vpop.f32.mrf.mxu0 }
 0x31f   : > { %1932 = vmax.xlane.f32.xlu1 %v8441_v26  ;;  %1922 = vmax.xlane.f32.xlu0 %v8439_v55 }
 0x320   : > { %v8445_v62 = vpop.f32.mrf.mxu0 }
 0x322   : > { %v8449_v44 = vpop.f32.mrf.mxu0 }
 0x323   : > { %1928 = vmax.xlane.f32.xlu1 %v8445_v62  ;;  %1934 = vmax.xlane.f32.xlu0 %v8449_v44 }
 0x324   : > { %v8453_v8 = vpop.f32.mrf.mxu0 }
 0x325   : > { %v1459_v2 = vpop.xlane.xlu0 %1458 }
 0x326   : > { %v1488_v53 = vsub.f32 %v8341_v34, %v1459_v2  ;;  %v8456_v51 = vpop.f32.mrf.mxu0 }
 0x327   : > { %1940 = vmax.xlane.f32.xlu1 %v8456_v51  ;;  %1930 = vmax.xlane.f32.xlu0 %v8453_v8 }
 0x328   : > { %v1506_v49 = vmul.f32 1.442695, %v1488_v53  ;;  %v8462_v45 = vpop.f32.mrf.mxu0 }
 0x329   : > { %v1455_v14 = vpop.xlane.xlu0 %1454 }
 0x32a   : > { %6914 = vpow2.f32 %v1506_v49  ;;  %v1486_v22 = vsub.f32 %v8344_v28, %v1455_v14  ;;  %v8465_v48 = vpop.f32.mrf.mxu0 }
 0x32b   : > { %v1457_v54 = vpop.xlane.xlu1 %1456  ;;  %1936 = vmax.xlane.f32.xlu1 %v8462_v45  ;;  %1942 = vmax.xlane.f32.xlu0 %v8465_v48 }
 0x32c   : > { %v1502_v2 = vmul.f32 1.442695, %v1486_v22  ;;  %v1487_v52 = vsub.f32 %v8352_v57, %v1457_v54  ;;  %v8470_v30 = vpop.f32.mrf.mxu0 }
 0x32d   : > { %v1461_v34 = vpop.xlane.xlu0 %1460 }
 0x32e   : > { %6916 = vpow2.f32 %v1502_v2  ;;  %v1489_v53 = vsub.f32 %v8348_v35, %v1461_v34  ;;  %v1504_v27 = vmul.f32 1.442695, %v1487_v52 }
 0x32f   : > { %v1467_v24 = vpop.xlane.xlu1 %1466  ;;  %1938 = vmax.xlane.f32.xlu0 %v8470_v30 }
 0x330   : > { %v1508_v49 = vmul.f32 1.442695, %v1489_v53  ;;  %v1492_v28 = vsub.f32 %v8355_v3, %v1467_v24 }
 0x331   : > { %v1469_v14 = vpop.xlane.xlu0 %1468 }
 0x332   : > { %6918 = vpow2.f32 %v1508_v49  ;;  %v1514_v38 = vmul.f32 1.442695, %v1492_v28  ;;  %v1493_v22 = vsub.f32 %v8363_v23, %v1469_v14 }
 0x333   : > { %v1463_v60 = vpop.xlane.xlu1 %1462 }
 0x334   : > { %6920 = vpow2.f32 %v1514_v38  ;;  %v1490_v54 = vsub.f32 %v8358_v46, %v1463_v60  ;;  %v1516_v2 = vmul.f32 1.442695, %v1493_v22 }
 0x335   : > { %v1465_v57 = vpop.xlane.xlu0 %1464  ;;  %6922 = vpow2.f32 %v1504_v27 }
 0x336   : > { %v1510_v35 = vmul.f32 1.442695, %v1490_v54  ;;  %v1491_v34 = vsub.f32 %v8366_v9, %v1465_v57 }
 0x337   : > { %v8478_v25 = vpop.eup %6914  ;;  %v1475_v53 = vpop.xlane.xlu1 %1474 }
 0x338   : > { %6924 = vpow2.f32 %v1510_v35  ;;  %v1496_v52 = vsub.f32 %v8369_v5, %v1475_v53  ;;  %1538 = vadd.xlane.f32.xlu1 %v8478_v25  ;;  %v1512_v3 = vmul.f32 1.442695, %v1491_v34 }
 0x339   : > { %v1477_v24 = vpop.xlane.xlu0 %1476  ;;  %6926 = vpow2.f32 %v1516_v2 }
 0x33a   : > { %v1522_v38 = vmul.f32 1.442695, %v1496_v52  ;;  %v1497_v60 = vsub.f32 %v8375_v11, %v1477_v24 }
 0x33b   : > { %v8483_v46 = vpop.eup %6916  ;;  %v1471_v27 = vpop.xlane.xlu1 %1470 }
 0x33c   : > { %6928 = vpow2.f32 %v1522_v38  ;;  %v1494_v23 = vsub.f32 %v8372_v29, %v1471_v27  ;;  %1534 = vadd.xlane.f32.xlu1 %v8483_v46  ;;  %v1524_v49 = vmul.f32 1.442695, %v1497_v60 }
 0x33d   : > { %v1473_v9 = vpop.xlane.xlu0 %1472  ;;  %6930 = vpow2.f32 %v1512_v3 }
 0x33e   : > { %v1518_v5 = vmul.f32 1.442695, %v1494_v23  ;;  %v1495_v28 = vsub.f32 %v8378_v15, %v1473_v9 }
 0x33f   : > { %v8488_v14 = vpop.eup %6918  ;;  %v1483_v22 = vpop.xlane.xlu1 %1482 }
 0x340   : > { %6932 = vpow2.f32 %v1518_v5  ;;  %v1500_v11 = vsub.f32 %v8381_v61, %v1483_v22  ;;  %1540 = vadd.xlane.f32.xlu0 %v8488_v14  ;;  %v1520_v29 = vmul.f32 1.442695, %v1495_v28 }
 0x341   : > { %v8492_v54 = vpop.eup %6920  ;;  %6934 = vpow2.f32 %v1524_v49  ;;  %v1485_v2 = vpop.xlane.xlu0 %1484 }
 0x342   : > { %1546 = vadd.xlane.f32.xlu1 %v8492_v54  ;;  %v8495_v57 = vpop.eup %6922  ;;  %v1530_v35 = vmul.f32 1.442695, %v1500_v11  ;;  %6936 = vpow2.f32 %v1520_v29  ;;  %v1501_v61 = vsub.f32 %v8387_v10, %v1485_v2 }
 0x343   : > { %v1479_v34 = vpop.xlane.xlu1 %1478 }
 0x344   : > { %1536 = vadd.xlane.f32.xlu0 %v8495_v57  ;;  %6938 = vpow2.f32 %v1530_v35  ;;  %v1498_v52 = vsub.f32 %v8384_v36, %v1479_v34  ;;  %v1532_v3 = vmul.f32 1.442695, %v1501_v61 }
 0x345   : > { %v8498_v15 = vpop.eup %6924  ;;  %v1481_v60 = vpop.xlane.xlu0 %1480 }
 0x346   : > { %1542 = vadd.xlane.f32.xlu1 %v8498_v15  ;;  %v8502_v53 = vpop.eup %6926  ;;  %v1526_v27 = vmul.f32 1.442695, %v1498_v52  ;;  %6940 = vpow2.f32 %v1532_v3  ;;  %v1499_v23 = vsub.f32 %v8391_v21, %v1481_v60 }
 0x348   : > { %1548 = vadd.xlane.f32.xlu0 %v8502_v53  ;;  %6942 = vpow2.f32 %v1526_v27  ;;  %v1528_v5 = vmul.f32 1.442695, %v1499_v23 }
 0x349   : > { %v8506_v24 = vpop.eup %6928 }
 0x34a   : > { %1554 = vadd.xlane.f32.xlu1 %v8506_v24  ;;  %v8509_v38 = vpop.eup %6930  ;;  %6944 = vpow2.f32 %v1528_v5 }
 0x34c   : > { %1544 = vadd.xlane.f32.xlu0 %v8509_v38 }
 0x34d   : > { %v8512_v10 = vpop.eup %6932 }
 0x34e   : > { %v8515_v9 = vpop.f32.mrf.mxu0  ;;  %1550 = vadd.xlane.f32.xlu1 %v8512_v10  ;;  %v8518_v36 = vpop.eup %6934 }
 0x34f   : > { %v8526_v22 = vpop.eup %6936 }
 0x350   : > { %v8520_v49 = vpop.f32.mrf.mxu0  ;;  %1556 = vadd.xlane.f32.xlu0 %v8518_v36 }
 0x351   : > { %v8531_v21 = vpop.eup %6938 }
 0x352   : > { %v8523_v28 = vpop.f32.mrf.mxu0  ;;  %2455 = vmax.xlane.f32.xlu1 %v8515_v9 }
 0x353   : > { %v8542_v34 = vpop.eup %6940 }
 0x354   : > { %v8528_v11 = vpop.f32.mrf.mxu0  ;;  %1552 = vadd.xlane.f32.xlu0 %v8526_v22 }
 0x355   : > { %v8545_v61 = vpop.eup %6942 }
 0x356   : > { %v8533_v29 = vpop.f32.mrf.mxu0  ;;  %1562 = vadd.xlane.f32.xlu1 %v8531_v21 }
 0x357   : > { %v8554_v60 = vpop.eup %6944 }
 0x358   : > { %v8536_v2 = vpop.f32.mrf.mxu0  ;;  %2457 = vmax.xlane.f32.xlu0 %v8523_v28 }
 0x35a   : > { %v8539_v35 = vpop.f32.mrf.mxu0  ;;  %2451 = vmax.xlane.f32.xlu1 %v8520_v49 }
 0x35c   : > { %1564 = vadd.xlane.f32.xlu0 %v8542_v34  ;;  %v8547_v52 = vpop.f32.mrf.mxu0 }
 0x35d   : > { %10449 = vst [vmem:[#allocation85_spill] sm:$0xff] %v8547_v52 }
 0x35e   : > { %1558 = vadd.xlane.f32.xlu1 %v8545_v61  ;;  %v8551_v3 = vpop.f32.mrf.mxu0 }
 0x35f   : > { %10450 = vst [vmem:[#allocation86_spill] sm:$0xff] %v8551_v3 }
 0x360   : > { %2453 = vmax.xlane.f32.xlu0 %v8528_v11  ;;  %v8557_v27 = vpop.f32.mrf.mxu0 }
 0x361   : > { %10451 = vst [vmem:[#allocation87_spill] sm:$0xff] %v8557_v27 }
 0x362   : > { %2463 = vmax.xlane.f32.xlu1 %v8533_v29  ;;  %v8561_v23 = vpop.f32.mrf.mxu0 }
 0x363   : > { %10452 = vst [vmem:[#allocation88_spill] sm:$0xff] %v8561_v23 }
 0x364   : > { %1560 = vadd.xlane.f32.xlu0 %v8554_v60  ;;  %v8565_v5 = vpop.f32.mrf.mxu0 }
 0x365   : > { %10453 = vst [vmem:[#allocation89_spill] sm:$0xff] %v8565_v5 }
 0x366   : > { %2459 = vmax.xlane.f32.xlu1 %v8536_v2  ;;  %v8569_v6 = vpop.f32.mrf.mxu0 }
 0x367   : > { %10454 = vst [vmem:[#allocation90_spill] sm:$0xff] %v8569_v6 }
 0x368   : > { %2465 = vmax.xlane.f32.xlu0 %v8539_v35  ;;  %v8573_v59 = vpop.f32.mrf.mxu0 }
 0x369   : > { %10455 = vst [vmem:[#allocation91_spill] sm:$0xff] %v8573_v59 }
 0x36a   : > { %2471 = vmax.xlane.f32.xlu1 %v8551_v3  ;;  %v8576_v31 = vpop.f32.mrf.mxu0 }
 0x36b   : > { %10456 = vst [vmem:[#allocation92_spill] sm:$0xff] %v8576_v31 }
 0x36c   : > { %2461 = vmax.xlane.f32.xlu0 %v8547_v52  ;;  %v8579_v50 = vpop.f32.mrf.mxu0 }
 0x36d   : > { %10457 = vst [vmem:[#allocation93_spill] sm:$0xff] %v8579_v50 }
 0x36e   : > { %2467 = vmax.xlane.f32.xlu1 %v8557_v27 }
 0x370   : > { %2473 = vmax.xlane.f32.xlu0 %v8561_v23 }
 0x372   : > { %2479 = vmax.xlane.f32.xlu1 %v8569_v6 }
 0x374   : > { %2469 = vmax.xlane.f32.xlu0 %v8565_v5 }
 0x378   : > { %2475 = vmax.xlane.f32.xlu0 %v8573_v59 }
 0x37c   : > { %2481 = vmax.xlane.f32.xlu0 %v8576_v31 }
 0x380   : > { %2477 = vmax.xlane.f32.xlu0 %v8579_v50 }
 0x398   : > { %v1917_v58 = vpop.xlane.xlu1 %1916 }
 0x399   : > { %v1946_v13 = vsub.f32 %v8412_v12, %v1917_v58 }
 0x39b   : > { %v1964_v1 = vmul.f32 1.442695, %v1946_v13 }
 0x39c   : > { %v1913_v7 = vpop.xlane.xlu1 %1912  ;;  %v1919_v39 = vpop.xlane.xlu0 %1918 }
 0x39d   : > { %6946 = vpow2.f32 %v1964_v1  ;;  %v1944_v5 = vsub.f32 %v8417_v33, %v1913_v7  ;;  %v1947_v23 = vsub.f32 %v8419_v0, %v1919_v39 }
 0x39f   : > { %v1960_v59 = vmul.f32 1.442695, %v1944_v5  ;;  %v1966_v6 = vmul.f32 1.442695, %v1947_v23 }
 0x3a0   : > { %v1925_v27 = vpop.xlane.xlu1 %1924  ;;  %v1915_v52 = vpop.xlane.xlu0 %1914 }
 0x3a1   : > { %6948 = vpow2.f32 %v1960_v59  ;;  %v1950_v31 = vsub.f32 %v8427_v32, %v1925_v27  ;;  %v1945_v50 = vsub.f32 %v8423_v20, %v1915_v52 }
 0x3a2   : > { %6950 = vpow2.f32 %v1966_v6 }
 0x3a3   : > { %v1972_v3 = vmul.f32 1.442695, %v1950_v31  ;;  %v1962_v12 = vmul.f32 1.442695, %v1945_v50 }
 0x3a4   : > { %v1921_v13 = vpop.xlane.xlu1 %1920  ;;  %v1927_v58 = vpop.xlane.xlu0 %1926 }
 0x3a5   : > { %6952 = vpow2.f32 %v1972_v3  ;;  %v1948_v1 = vsub.f32 %v8431_v16, %v1921_v13  ;;  %v1951_v7 = vsub.f32 %v8433_v41, %v1927_v58 }
 0x3a6   : > { %6954 = vpow2.f32 %v1962_v12 }
 0x3a7   : > { %v1968_v39 = vmul.f32 1.442695, %v1948_v1  ;;  %v1974_v59 = vmul.f32 1.442695, %v1951_v7 }
 0x3a8   : > { %v1933_v0 = vpop.xlane.xlu1 %1932  ;;  %v1923_v33 = vpop.xlane.xlu0 %1922 }
 0x3a9   : > { %6956 = vpow2.f32 %v1968_v39  ;;  %v1949_v32 = vsub.f32 %v8439_v55, %v1923_v33  ;;  %v1954_v31 = vsub.f32 %v8441_v26, %v1933_v0 }
 0x3aa   : > { %v8590_v27 = vpop.eup %6946  ;;  %6958 = vpow2.f32 %v1974_v59 }
 0x3ab   : > { %v1970_v50 = vmul.f32 1.442695, %v1949_v32  ;;  %1996 = vadd.xlane.f32.xlu0 %v8590_v27  ;;  %v1980_v52 = vmul.f32 1.442695, %v1954_v31 }
 0x3ac   : > { %v1929_v6 = vpop.xlane.xlu1 %1928  ;;  %v1935_v20 = vpop.xlane.xlu0 %1934 }
 0x3ad   : > { %v1952_v16 = vsub.f32 %v8445_v62, %v1929_v6  ;;  %6960 = vpow2.f32 %v1970_v50  ;;  %v1955_v3 = vsub.f32 %v8449_v44, %v1935_v20 }
 0x3ae   : > { %v8595_v41 = vpop.eup %6948 }
 0x3af   : > { %v1976_v23 = vmul.f32 1.442695, %v1952_v16  ;;  %1992 = vadd.xlane.f32.xlu0 %v8595_v41  ;;  %v8599_v26 = vpop.eup %6950  ;;  %v1982_v62 = vmul.f32 1.442695, %v1955_v3 }
 0x3b0   : > { %v1941_v55 = vpop.xlane.xlu1 %1940  ;;  %v1931_v5 = vpop.xlane.xlu0 %1930 }
 0x3b1   : > { %6962 = vpow2.f32 %v1976_v23  ;;  %v1958_v12 = vsub.f32 %v8456_v51, %v1941_v55  ;;  %v1953_v58 = vsub.f32 %v8453_v8, %v1931_v5 }
 0x3b2   : > { %v8602_v13 = vpop.eup %6952  ;;  %6964 = vpow2.f32 %v1980_v52 }
 0x3b3   : > { %v1988_v1 = vmul.f32 1.442695, %v1958_v12  ;;  %2004 = vadd.xlane.f32.xlu1 %v8602_v13  ;;  %1998 = vadd.xlane.f32.xlu0 %v8599_v26  ;;  %v8607_v39 = vpop.eup %6954  ;;  %v1978_v59 = vmul.f32 1.442695, %v1953_v58 }
 0x3b4   : > { %v1937_v44 = vpop.xlane.xlu1 %1936  ;;  %v1943_v7 = vpop.xlane.xlu0 %1942 }
 0x3b5   : > { %6966 = vpow2.f32 %v1988_v1  ;;  %v1956_v0 = vsub.f32 %v8462_v45, %v1937_v44  ;;  %v1959_v51 = vsub.f32 %v8465_v48, %v1943_v7 }
 0x3b6   : > { %v8611_v33 = vpop.eup %6956  ;;  %6968 = vpow2.f32 %v1982_v62 }
 0x3b7   : > { %v1984_v32 = vmul.f32 1.442695, %v1956_v0  ;;  %2000 = vadd.xlane.f32.xlu1 %v8611_v33  ;;  %1994 = vadd.xlane.f32.xlu0 %v8607_v39  ;;  %v1990_v8 = vmul.f32 1.442695, %v1959_v51  ;;  %v8616_v6 = vpop.eup %6958 }
 0x3b8   : > { %v1939_v31 = vpop.xlane.xlu0 %1938 }
 0x3b9   : > { %6970 = vpow2.f32 %v1984_v32  ;;  %v1957_v50 = vsub.f32 %v8470_v30, %v1939_v31 }
 0x3ba   : > { %6972 = vpow2.f32 %v1978_v59  ;;  %v8618_v45 = vpop.eup %6960 }
 0x3bb   : > { %v1986_v48 = vmul.f32 1.442695, %v1957_v50  ;;  %2006 = vadd.xlane.f32.xlu1 %v8616_v6  ;;  %6974 = vpow2.f32 %v1990_v8  ;;  %2002 = vadd.xlane.f32.xlu0 %v8618_v45 }
 0x3bd   : > { %6976 = vpow2.f32 %v1986_v48 }
 0x3be   : > { %v8622_v20 = vpop.eup %6962 }
 0x3bf   : > { %v8624_v16 = vpop.eup %6964  ;;  %2008 = vadd.xlane.f32.xlu1 %v8622_v20 }
 0x3c0   : > { %2012 = vadd.xlane.f32.xlu0 %v8624_v16 }
 0x3c1   : > { %v1539_v30 = vpop.xlane.xlu1 %1538 }
 0x3c2   : > { %v8628_v52 = vpop.eup %6966 }
 0x3c3   : > { %10458 = vst [vmem:[#allocation94_spill] sm:$0xff] %v8628_v52  ;;  %v8630_v3 = vpop.eup %6968  ;;  %2020 = vadd.xlane.f32.xlu1 %v8628_v52 }
 0x3c4   : > { %2014 = vadd.xlane.f32.xlu0 %v8630_v3 }
 0x3c5   : > { %v1535_v5 = vpop.xlane.xlu1 %1534 }
 0x3c6   : > { %v8634_v23 = vpop.eup %6970 }
 0x3c7   : > { %10459 = vst [vmem:[#allocation95_spill] sm:$0xff] %v8634_v23  ;;  %v8636_v55 = vpop.eup %6972  ;;  %2016 = vadd.xlane.f32.xlu1 %v8634_v23 }
 0x3c8   : > { %2010 = vadd.xlane.f32.xlu0 %v8636_v55  ;;  %v8640_v12 = vpop.eup %6974 }
 0x3c9   : > { %10460 = vst [vmem:[#allocation96_spill] sm:$0xff] %v8640_v12  ;;  %v1541_v62 = vpop.xlane.xlu0 %1540 }
 0x3ca   : > { %v8642_v58 = vpop.eup %6976  ;;  %6978 = vrcp.f32 %v1541_v62 }
 0x3cb   : > { %10461 = vst [vmem:[#allocation97_spill] sm:$0xff] %v8642_v58  ;;  %v1547_v1 = vpop.xlane.xlu1 %1546  ;;  %2022 = vadd.xlane.f32.xlu1 %v8640_v12  ;;  %6980 = vrcp.f32 %v1535_v5 }
 0x3cc   : > { %2018 = vadd.xlane.f32.xlu0 %v8642_v58  ;;  %6982 = vrcp.f32 %v1539_v30 }
 0x3cd   : > { %v1537_v44 = vpop.xlane.xlu0 %1536 }
 0x3ce   : > { %6984 = vrcp.f32 %v1537_v44 }
 0x3cf   : > { %v1543_v7 = vpop.xlane.xlu1 %1542 }
 0x3d1   : > { %v1549_v0 = vpop.xlane.xlu0 %1548 }
 0x3d2   : > { %6986 = vrcp.f32 %v1549_v0 }
 0x3d3   : > { %v1555_v51 = vpop.xlane.xlu1 %1554  ;;  %6988 = vrcp.f32 %v1543_v7 }
 0x3d4   : > { %6990 = vrcp.f32 %v1547_v1 }
 0x3d5   : > { %v1545_v59 = vpop.xlane.xlu0 %1544 }
 0x3d6   : > { %6992 = vrcp.f32 %v1545_v59 }
 0x3d7   : > { %v1551_v32 = vpop.xlane.xlu1 %1550  ;;  %v6979_v8 = vpop.eup %6978 }
 0x3d8   : > { %v6981_v31 = vpop.eup %6980  ;;  %v1585_v30 = vmul.f32 %v6979_v8, %v8488_v14 }
 0x3d9   : > { %v1557_v50 = vpop.xlane.xlu0 %1556  ;;  %v6983_v48 = vpop.eup %6982  ;;  %v1582_v0 = vmul.f32 %v6981_v31, %v8483_v46 }
 0x3da   : > { %6994 = vrcp.f32 %v1557_v50  ;;  %v1584_v59 = vmul.f32 %v6983_v48, %v8478_v25 }
 0x3db   : > { %v6985_v62 = vpop.eup %6984  ;;  %v2456_v5 = vpop.xlane.xlu1 %2455  ;;  %6996 = vrcp.f32 %v1551_v32 }
 0x3dc   : > { %v2485_v44 = vsub.f32 %v8515_v9, %v2456_v5  ;;  %v1583_v7 = vmul.f32 %v6985_v62, %v8495_v57  ;;  %6998 = vrcp.f32 %v1555_v51  ;;  %v1599_v23 = vpack.c.bf16 %v1585_v30, %v1584_v59 }
 0x3dd   : > { %v1553_v1 = vpop.xlane.xlu0 %1552 }
 0x3de   : > { %v2503_v52 = vmul.f32 1.442695, %v2485_v44  ;;  %7000 = vrcp.f32 %v1553_v1  ;;  %v1598_v12 = vpack.c.bf16 %v1583_v7, %v1582_v0 }
 0x3df   : > { %v1563_v58 = vpop.xlane.xlu1 %1562  ;;  %v6987_v50 = vpop.eup %6986 }
 0x3e0   : > { %7002 = vpow2.f32 %v2503_v52  ;;  %6142 = vmatprep.mubr.bf16.mxu1 %v1598_v12  ;;  %v6989_v14 = vpop.eup %6988  ;;  %v1589_v51 = vmul.f32 %v6987_v50, %v8502_v53 }
 0x3e1   : > { %6143 = vmatmul.mubr.bf16.vlgmr.msra.gmra.mxu1 %v1599_v23  ;;  %v2458_v32 = vpop.xlane.xlu0 %2457  ;;  %v6991_v9 = vpop.eup %6990  ;;  %v1586_v52 = vmul.f32 %v6989_v14, %v8498_v15 }
 0x3e2   : > { %6191 = vmatpush3.bf16.msra.mxu1 %v8312_v18  ;;  %v2486_v46 = vsub.f32 %v8523_v28, %v2458_v32  ;;  %v1588_v48 = vmul.f32 %v6991_v9, %v8492_v54 }
 0x3e3   : > { %v6993_v57 = vpop.eup %6992  ;;  %6192 = vmatprep.subr.bf16.mxu1 %v8435_v63  ;;  %v2452_v25 = vpop.xlane.xlu1 %2451 }
 0x3e4   : > { %v2505_v8 = vmul.f32 1.442695, %v2486_v46  ;;  %v2483_v31 = vsub.f32 %v8520_v49, %v2452_v25  ;;  %v1587_v12 = vmul.f32 %v6993_v57, %v8509_v38  ;;  %v1601_v62 = vpack.c.bf16 %v1589_v51, %v1588_v48 }
 0x3e5   : > { %v1565_v23 = vpop.xlane.xlu0 %1564 }
 0x3e6   : > { %7004 = vpow2.f32 %v2505_v8  ;;  %v2499_v18 = vmul.f32 1.442695, %v2483_v31  ;;  %6193 = vmatpush3.bf16.msra.mxu1 %v8435_v63  ;;  %v1600_v28 = vpack.c.bf16 %v1587_v12, %v1586_v52 }
 0x3e7   : > { %6194 = vmatprep.subr.bf16.mxu1 %v8414_v47  ;;  %v6995_v5 = vpop.eup %6994  ;;  %v1559_v30 = vpop.xlane.xlu1 %1558 }
 0x3e8   : > { %7006 = vpow2.f32 %v2499_v18  ;;  %6146 = vmatprep.mubr.bf16.mxu1 %v1600_v28  ;;  %v6997_v53 = vpop.eup %6996  ;;  %v1593_v63 = vmul.f32 %v6995_v5, %v8518_v36 }
 0x3e9   : > { %6147 = vmatmul.mubr.bf16.gmra.mxu1 %v1601_v62  ;;  %v2454_v49 = vpop.xlane.xlu0 %2453  ;;  %v6999_v15 = vpop.eup %6998  ;;  %7008 = vrcp.f32 %v1563_v58  ;;  %v1590_v0 = vmul.f32 %v6997_v53, %v8512_v10  ;;  %v10463_v62 = vld [vmem:[#allocation85_spill] sm:$0xff] }
 0x3ea   : > { %6195 = vmatpush3.bf16.msra.mxu1 %v8414_v47  ;;  %v2484_v54 = vsub.f32 %v8528_v11, %v2454_v49  ;;  %7010 = vrcp.f32 %v1565_v23  ;;  %v1592_v47 = vmul.f32 %v6999_v15, %v8506_v24  ;;  %v10464_v49 = vld [vmem:[#allocation87_spill] sm:$0xff] }
 0x3eb   : > { %v7001_v38 = vpop.eup %7000  ;;  %6196 = vmatprep.subr.bf16.mxu1 %v8302_v40  ;;  %7012 = vrcp.f32 %v1559_v30  ;;  %v2464_v25 = vpop.xlane.xlu1 %2463  ;;  %v10465_v30 = vld [vmem:[#allocation90_spill] sm:$0xff] }
 0x3ec   : > { %v2501_v44 = vmul.f32 1.442695, %v2484_v54  ;;  %v1591_v7 = vmul.f32 %v7001_v38, %v8526_v22  ;;  %v1603_v36 = vpack.c.bf16 %v1593_v63, %v1592_v47  ;;  %v2489_v12 = vsub.f32 %v8533_v29, %v2464_v25  ;;  %v10466_v38 = vld [vmem:[#allocation88_spill] sm:$0xff]  ;;  %v10468_v47 = vld [vmem:[#allocation89_spill] sm:$0xff] }
 0x3ed   : > { %v8667_v1 = vpop.eup %7002  ;;  %v1561_v59 = vpop.xlane.xlu0 %1560 }
 0x3ee   : > { %7014 = vpow2.f32 %v2501_v44  ;;  %6197 = vmatpush3.bf16.msra.mxu1 %v8302_v40  ;;  %2535 = vadd.xlane.f32.xlu0 %v8667_v1  ;;  %v1602_v11 = vpack.c.bf16 %v1591_v7, %v1590_v0  ;;  %v2511_v28 = vmul.f32 1.442695, %v2489_v12  ;;  %v10467_v0 = vld [vmem:[#allocation91_spill] sm:$0xff] }
 0x3ef   : > { %7016 = vrcp.f32 %v1561_v59  ;;  %6198 = vmatprep.subr.bf16.mxu1 %v8298_v4  ;;  %v2460_v51 = vpop.xlane.xlu1 %2459 }
 0x3f0   : > { %6150 = vmatprep.mubr.bf16.mxu1 %v1602_v11 }
 0x3f1   : > { %6151 = vmatmul.mubr.bf16.gmra.mxu1 %v1603_v36  ;;  %v2466_v57 = vpop.xlane.xlu0 %2465 }
 0x3f2   : > { %6199 = vmatpush3.bf16.msra.mxu1 %v8298_v4  ;;  %v2490_v31 = vsub.f32 %v8539_v35, %v2466_v57 }
 0x3f3   : > { %v8674_v10 = vpop.eup %7004  ;;  %6200 = vmatprep.subr.bf16.mxu1 %v8404_v37 }
 0x3f4   : > { %2537 = vadd.xlane.f32.xlu0 %v8674_v10  ;;  %v2513_v23 = vmul.f32 1.442695, %v2490_v31 }
 0x3f5   : > { %v8678_v24 = vpop.eup %7006 }
 0x3f6   : > { %6201 = vmatpush3.bf16.msra.mxu1 %v8404_v37  ;;  %2531 = vadd.xlane.f32.xlu1 %v8678_v24  ;;  %v7009_v40 = vpop.eup %7008 }
 0x3f7   : > { %6202 = vmatprep.subr.bf16.mxu1 %v8400_v17  ;;  %v7011_v22 = vpop.eup %7010  ;;  %v1596_v9 = vmul.f32 %v7009_v40, %v8531_v21  ;;  %v2487_v21 = vsub.f32 %v8536_v2, %v2460_v51 }
 0x3f8   : > { %v7013_v58 = vpop.eup %7012  ;;  %v1597_v14 = vmul.f32 %v7011_v22, %v8542_v34  ;;  %v2462_v34 = vpop.xlane.xlu0 %2461 }
 0x3f9   : > { %v1594_v37 = vmul.f32 %v7013_v58, %v8545_v61  ;;  %v2507_v8 = vmul.f32 1.442695, %v2487_v21  ;;  %v2488_v5 = vsub.f32 %v10463_v62, %v2462_v34  ;;  %v10469_v58 = vld [vmem:[#allocation92_spill] sm:$0xff] }
 0x3fa   : > { %6203 = vmatpush3.bf16.msra.mxu1 %v8400_v17  ;;  %v1605_v46 = vpack.c.bf16 %v1597_v14, %v1596_v9 }
 0x3fb   : > { %v8684_v4 = vpop.eup %7014  ;;  %6204 = vmatprep.subr.bf16.mxu1 %v8294_v56  ;;  %7018 = vpow2.f32 %v2507_v8  ;;  %v2509_v15 = vmul.f32 1.442695, %v2488_v5 }
 0x3fc   : > { %v7017_v50 = vpop.eup %7016  ;;  %2533 = vadd.xlane.f32.xlu0 %v8684_v4  ;;  %v2474_v61 = vpop.xlane.xlu0 %2473  ;;  %7020 = vpow2.f32 %v2513_v23 }
 0x3fd   : > { %v1595_v32 = vmul.f32 %v7017_v50, %v8554_v60  ;;  %7022 = vpow2.f32 %v2511_v28  ;;  %v2494_v63 = vsub.f32 %v10466_v38, %v2474_v61 }
 0x3fe   : > { %6205 = vmatpush3.bf16.msra.mxu1 %v8294_v56  ;;  %v2472_v56 = vpop.xlane.xlu1 %2471 }
 0x3ff   : > { %6254 = vmatprep.subr.bf16.mxu1 %v8458_v43  ;;  %v1604_v17 = vpack.c.bf16 %v1595_v32, %v1594_v37  ;;  %v2521_v59 = vmul.f32 1.442695, %v2494_v63  ;;  %v10470_v37 = vld [vmem:[#allocation93_spill] sm:$0xff] }
 0x400   : > { %v2470_v60 = vpop.xlane.xlu0 %2469 }
 0x401   : > { %6154 = vmatprep.mubr.bf16.mxu1 %v1604_v17  ;;  %v2492_v11 = vsub.f32 %v10468_v47, %v2470_v60 }
 0x402   : > { %6155 = vmatmul.mubr.bf16.gmra.mxu1 %v1605_v46  ;;  %v2468_v52 = vpop.xlane.xlu1 %2467 }
 0x403   : > { %v2491_v2 = vsub.f32 %v10464_v49, %v2468_v52  ;;  %v2517_v14 = vmul.f32 1.442695, %v2492_v11 }
 0x404   : > { %v2476_v18 = vpop.xlane.xlu0 %2475 }
 0x405   : > { %v2515_v29 = vmul.f32 1.442695, %v2491_v2  ;;  %v2495_v7 = vsub.f32 %v10467_v0, %v2476_v18 }
 0x406   : > { %v2480_v53 = vpop.xlane.xlu1 %2479 }
 0x407   : > { %2829 = vrot.lane.b32.xlu1 %v7934_v19, %s7586_s25  ;;  %v10462_v19 = vld [vmem:[#allocation86_spill] sm:$0xff]  ;;  %v2497_v35 = vsub.f32 %v10465_v30, %v2480_v53  ;;  %v2523_v22 = vmul.f32 1.442695, %v2495_v7 }
 0x408   : > { %v2493_v48 = vsub.f32 %v10462_v19, %v2472_v56  ;;  %v2482_v54 = vpop.xlane.xlu0 %2481  ;;  %v8708_v36 = vpop.eup %7018 }
 0x409   : > { %v2527_v44 = vmul.f32 1.442695, %v2497_v35  ;;  %v2498_v50 = vsub.f32 %v10469_v58, %v2482_v54  ;;  %v8713_v9 = vpop.eup %7020 }
 0x40a   : > { %v8716_v46 = vpop.eup %7022 }
 0x40b   : > { %v2529_v17 = vmul.f32 1.442695, %v2498_v50 }
 0x40c   : > { %v2478_v40 = vpop.xlane.xlu0 %2477 }
 0x40d   : > { %v2496_v32 = vsub.f32 %v10470_v37, %v2478_v40  ;;  %v10473_v37 = vld [vmem:[#allocation43_spill] sm:$0xff] }
 0x40f   : > { %v2525_v57 = vmul.f32 1.442695, %v2496_v32 }
 0x412   : > { %2827 = vrot.lane.b32.xlu0 %v8002_v42, %s7586_s25  ;;  %v2519_v42 = vmul.f32 1.442695, %v2493_v48 }
 0x414   : > { %7024 = vpow2.f32 %v2519_v42 }
 0x415   : > { %7026 = vpow2.f32 %v2509_v15 }
 0x416   : > { %7028 = vpow2.f32 %v2515_v29 }
 0x417   : > { %7030 = vpow2.f32 %v2527_v44 }
 0x418   : > { %7032 = vpow2.f32 %v2521_v59 }
 0x419   : > { %7034 = vpow2.f32 %v2523_v22 }
 0x41a   : > { %7036 = vpow2.f32 %v2517_v14  ;;  %v10472_v14 = vld [vmem:[#allocation84_spill] sm:$0xff] }
 0x41b   : > { %7038 = vpow2.f32 %v2529_v17  ;;  %v10476_v17 = vld [vmem:[#allocation37_spill] sm:$0xff] }
 0x41c   : > { %7040 = vpow2.f32 %v2525_v57 }
 0x421   : > { %v8719_v25 = vpop.eup %7024 }
 0x422   : > { %v8722_v34 = vpop.eup %7026 }
 0x423   : > { %v8725_v61 = vpop.eup %7028 }
 0x424   : > { %v8728_v56 = vpop.eup %7030 }
 0x425   : > { %v8731_v60 = vpop.eup %7032 }
 0x426   : > { %v8734_v8 = vpop.eup %7034 }
 0x427   : > { %v8737_v12 = vpop.eup %7036 }
 0x428   : > { %v8740_v23 = vpop.eup %7038 }
 0x429   : > { %v8743_v18 = vpop.eup %7040 }
 0x42b   : > { %2539 = vadd.xlane.f32.xlu1 %v8708_v36 }
 0x42f   : > { %2545 = vadd.xlane.f32.xlu1 %v8713_v9 }
 0x431   : > { %2543 = vadd.xlane.f32.xlu0 %v8716_v46 }
 0x433   : > { %2551 = vadd.xlane.f32.xlu1 %v8719_v25 }
 0x434   : > { %v1997_v51 = vpop.xlane.xlu0 %1996 }
 0x435   : > { %2541 = vadd.xlane.f32.xlu0 %v8722_v34 }
 0x437   : > { %2547 = vadd.xlane.f32.xlu1 %v8725_v61 }
 0x438   : > { %v1993_v21 = vpop.xlane.xlu0 %1992 }
 0x439   : > { %2559 = vadd.xlane.f32.xlu0 %v8728_v56 }
 0x43b   : > { %2553 = vadd.xlane.f32.xlu1 %v8731_v60 }
 0x43c   : > { %v2005_v31 = vpop.xlane.xlu1 %2004  ;;  %v1999_v52 = vpop.xlane.xlu0 %1998 }
 0x43d   : > { %2555 = vadd.xlane.f32.xlu0 %v8734_v8  ;;  %7042 = vrcp.f32 %v1999_v52 }
 0x43e   : > { %7044 = vrcp.f32 %v1993_v21  ;;  %v10477_v21 = vld [vmem:[#allocation42_spill] sm:$0xff] }
 0x43f   : > { %2549 = vadd.xlane.f32.xlu1 %v8737_v12  ;;  %7046 = vrcp.f32 %v1997_v51 }
 0x440   : > { %v2001_v19 = vpop.xlane.xlu1 %2000  ;;  %v1995_v48 = vpop.xlane.xlu0 %1994 }
 0x441   : > { %2561 = vadd.xlane.f32.xlu0 %v8740_v23  ;;  %7048 = vrcp.f32 %v1995_v48 }
 0x442   : > { %7050 = vrcp.f32 %v2001_v19  ;;  %v10478_v19 = vld [vmem:[#allocation74_spill] sm:$0xff] }
 0x443   : > { %2557 = vadd.xlane.f32.xlu1 %v8743_v18 }
 0x444   : > { %v2007_v28 = vpop.xlane.xlu1 %2006  ;;  %v2003_v62 = vpop.xlane.xlu0 %2002 }
 0x445   : > { %7052 = vrcp.f32 %v2003_v62 }
 0x446   : > { %7054 = vrcp.f32 %v2007_v28  ;;  %v10480_v28 = vld [vmem:[#allocation53_spill] sm:$0xff] }
 0x447   : > { %7056 = vrcp.f32 %v2005_v31 }
 0x448   : > { %v2009_v5 = vpop.xlane.xlu1 %2008 }
 0x449   : > { %v2013_v53 = vpop.xlane.xlu0 %2012 }
 0x44a   : > { %v7043_v42 = vpop.eup %7042 }
 0x44b   : > { %v7045_v2 = vpop.eup %7044  ;;  %v2043_v54 = vmul.f32 %v7043_v42, %v8599_v26  ;;  %v10471_v26 = vld [vmem:[#allocation33_spill] sm:$0xff] }
 0x44c   : > { %v2021_v49 = vpop.xlane.xlu1 %2020  ;;  %v7047_v30 = vpop.eup %7046  ;;  %v2040_v38 = vmul.f32 %v7045_v2, %v8595_v41 }
 0x44d   : > { %v2015_v15 = vpop.xlane.xlu0 %2014  ;;  %v2042_v7 = vmul.f32 %v7047_v30, %v8590_v27  ;;  %v10482_v30 = vld [vmem:[#allocation51_spill] sm:$0xff] }
 0x44e   : > { %v7049_v35 = vpop.eup %7048  ;;  %7058 = vrcp.f32 %v2015_v15  ;;  %v10481_v15 = vld [vmem:[#allocation81_spill] sm:$0xff] }
 0x44f   : > { %7060 = vrcp.f32 %v2009_v5  ;;  %v2041_v63 = vmul.f32 %v7049_v35, %v8607_v39  ;;  %v7051_v44 = vpop.eup %7050  ;;  %v2057_v11 = vpack.c.bf16 %v2043_v54, %v2042_v7  ;;  %v10483_v54 = vld [vmem:[#allocation49_spill] sm:$0xff]  ;;  %v10488_v7 = vld [vmem:[#allocation96_spill] sm:$0xff] }
 0x450   : > { %v2017_v29 = vpop.xlane.xlu1 %2016  ;;  %7062 = vrcp.f32 %v2013_v53  ;;  %v2044_v41 = vmul.f32 %v7051_v44, %v8611_v33  ;;  %v10474_v33 = vld [vmem:[#allocation19_spill] sm:$0xff]  ;;  %v10486_v44 = vld [vmem:[#allocation80_spill] sm:$0xff] }
 0x451   : > { %v2011_v0 = vpop.xlane.xlu0 %2010  ;;  %v2056_v59 = vpack.c.bf16 %v2041_v63, %v2040_v38 }
 0x452   : > { %7064 = vrcp.f32 %v2011_v0  ;;  %v7053_v47 = vpop.eup %7052  ;;  %v10487_v0 = vld [vmem:[#allocation47_spill] sm:$0xff] }
 0x453   : > { %v7055_v40 = vpop.eup %7054  ;;  %7066 = vrcp.f32 %v2017_v29  ;;  %6206 = vmatprep.mubr.bf16.mxu1 %v2056_v59  ;;  %v2045_v39 = vmul.f32 %v7053_v47, %v8618_v45  ;;  %v10485_v29 = vld [vmem:[#allocation97_spill] sm:$0xff]  ;;  %v10489_v47 = vld [vmem:[#allocation94_spill] sm:$0xff] }
 0x454   : > { %v2023_v22 = vpop.xlane.xlu1 %2022  ;;  %2825 = vrot.lane.b32.xlu1 %v10471_v26, %s7586_s25  ;;  %6207 = vmatmul.mubr.bf16.vlgmr.msra.gmra.mxu1 %v2057_v11  ;;  %v7057_v50 = vpop.eup %7056  ;;  %v2047_v32 = vmul.f32 %v7055_v40, %v8616_v6  ;;  %v10490_v40 = vld [vmem:[#allocation79_spill] sm:$0xff] }
 0x455   : > { %v2019_v58 = vpop.xlane.xlu0 %2018  ;;  %6255 = vmatpush3.bf16.msra.mxu1 %v8458_v43  ;;  %v2058_v27 = vpack.c.bf16 %v2045_v39, %v2044_v41  ;;  %v2046_v45 = vmul.f32 %v7057_v50, %v8602_v13  ;;  %v10475_v43 = vld [vmem:[#allocation83_spill] sm:$0xff]  ;;  %v10479_v13 = vld [vmem:[#allocation45_spill] sm:$0xff]  ;;  %v10492_v41 = vld [vmem:[#allocation78_spill] sm:$0xff] }
 0x456   : > { %7068 = vrcp.f32 %v2019_v58  ;;  %6256 = vmatprep.subr.bf16.mxu1 %v10472_v14  ;;  %v10493_v39 = vld [vmem:[#allocation73_spill] sm:$0xff] }
 0x457   : > { %7070 = vrcp.f32 %v2023_v22  ;;  %2823 = vrot.lane.b32.xlu0 %v10473_v37, %s7586_s25  ;;  %6210 = vmatprep.mubr.bf16.mxu1 %v2058_v27  ;;  %v2059_v57 = vpack.c.bf16 %v2047_v32, %v2046_v45  ;;  %v10491_v22 = vld [vmem:[#allocation56_spill] sm:$0xff] }
 0x458   : > { %2805 = vrot.lane.b32.xlu1 %v10474_v33, %s7586_s25  ;;  %7072 = vrcp.f32 %v2021_v49 }
 0x459   : > { %6257 = vmatpush3.bf16.msra.mxu1 %v10472_v14 }
 0x45a   : > { %6258 = vmatprep.subr.bf16.mxu1 %v10475_v43 }
 0x45b   : > { %2821 = vrot.lane.b32.xlu0 %v10476_v17, %s7586_s25  ;;  %v7059_v51 = vpop.eup %7058 }
 0x45c   : > { %2809 = vrot.lane.b32.xlu1 %v10477_v21, %s7586_s25  ;;  %v7061_v6 = vpop.eup %7060  ;;  %6211 = vmatmul.mubr.bf16.gmra.mxu1 %v2059_v57  ;;  %v2051_v48 = vmul.f32 %v7059_v51, %v8630_v3 }
 0x45d   : > { %v7063_v31 = vpop.eup %7062  ;;  %6259 = vmatpush3.bf16.msra.mxu1 %v10475_v43  ;;  %v2048_v62 = vmul.f32 %v7061_v6, %v8622_v20  ;;  %v10484_v20 = vld [vmem:[#allocation95_spill] sm:$0xff] }
 0x45e   : > { %6260 = vmatprep.subr.bf16.mxu1 %v10478_v19  ;;  %v2050_v42 = vmul.f32 %v7063_v31, %v8624_v16  ;;  %v2883_v31 = vsel %vm1308_vm0, %v10493_v39, 0 }
 0x45f   : > { %v7065_v52 = vpop.eup %7064  ;;  %2807 = vrot.lane.b32.xlu0 %v10479_v13, %s7586_s25 }
 0x460   : > { %2813 = vrot.lane.b32.xlu1 %v10480_v28, %s7586_s25  ;;  %v2049_v5 = vmul.f32 %v7065_v52, %v8636_v55  ;;  %v7067_v53 = vpop.eup %7066  ;;  %v2061_v3 = vpack.c.bf16 %v2051_v48, %v2050_v42  ;;  %v10494_v52 = vld [vmem:[#allocation76_spill] sm:$0xff] }
 0x461   : > { %6261 = vmatpush3.bf16.msra.mxu1 %v10478_v19  ;;  %v2052_v55 = vmul.f32 %v7067_v53, %v10484_v20 }
 0x462   : > { %v2060_v49 = vpack.c.bf16 %v2049_v5, %v2048_v62  ;;  %6262 = vmatprep.subr.bf16.mxu1 %v10481_v15 }
 0x463   : > { %v7069_v2 = vpop.eup %7068  ;;  %2811 = vrot.lane.b32.xlu0 %v10482_v30, %s7586_s25 }
 0x464   : > { %v7071_v35 = vpop.eup %7070  ;;  %6214 = vmatprep.mubr.bf16.mxu1 %v2060_v49  ;;  %2817 = vrot.lane.b32.xlu1 %v10483_v54, %s7586_s25  ;;  %v2053_v38 = vmul.f32 %v7069_v2, %v10485_v29 }
 0x465   : > { %6215 = vmatmul.mubr.bf16.gmra.mxu1 %v2061_v3  ;;  %v7073_v16 = vpop.eup %7072  ;;  %v2055_v59 = vmul.f32 %v7071_v35, %v10488_v7 }
 0x466   : > { %6263 = vmatpush3.bf16.msra.mxu1 %v10481_v15  ;;  %v2062_v63 = vpack.c.bf16 %v2053_v38, %v2052_v55  ;;  %v2054_v11 = vmul.f32 %v7073_v16, %v10489_v47 }
 0x467   : > { %6264 = vmatprep.subr.bf16.mxu1 %v10486_v44  ;;  %2815 = vrot.lane.b32.xlu0 %v10487_v0, %s7586_s25 }
 0x468   : > { %6218 = vmatprep.mubr.bf16.mxu1 %v2062_v63  ;;  %v2063_v26 = vpack.c.bf16 %v2055_v59, %v2054_v11 }
 0x46a   : > { %6265 = vmatpush3.bf16.msra.mxu1 %v10486_v44 }
 0x46b   : > { %6266 = vmatprep.subr.bf16.mxu1 %v10490_v40  ;;  %2819 = vrot.lane.b32.xlu0 %v10491_v22, %s7586_s25 }
 0x46d   : > { %6219 = vmatmul.mubr.bf16.gmra.mxu1 %v2063_v26 }
 0x46e   : > { %6267 = vmatpush3.bf16.msra.mxu1 %v10490_v40 }
 0x46f   : > { %6268 = vmatprep.subr.bf16.mxu1 %v10492_v41 }
 0x472   : > { %6269 = vmatpush3.bf16.msra.mxu1 %v10492_v41 }
 0x473   : > { %6630 = vmatprep.subr.msk.bf16.mxu1 %vm1308_vm0, %v10493_v39 }
 0x477   : > { %v2536_v58 = vpop.xlane.xlu0 %2535 }
 0x47d   : > { %v2538_v50 = vpop.xlane.xlu0 %2537 }
 0x47e   : > { %7074 = vrcp.f32 %v2538_v50 }
 0x47f   : > { %v2532_v27 = vpop.xlane.xlu1 %2531 }
 0x480   : > { %7076 = vrcp.f32 %v2532_v27 }
 0x481   : > { %7078 = vrcp.f32 %v2536_v58 }
 0x483   : > { %v2830_v62 = vpop.permute.xlu1 %2829 }
 0x484   : > { %v2874_v2 = vsel %vm1308_vm0, %v2830_v62, 0 }
 0x485   : > { %v2534_v14 = vpop.xlane.xlu0 %2533 }
 0x486   : > { %7080 = vrcp.f32 %v2534_v14 }
 0x489   : > { %v2828_v15 = vpop.permute.xlu0 %2827 }
 0x48a   : > { %v2871_v55 = vsel %vm1308_vm0, %v2828_v15, 0 }
 0x48b   : > { %v7075_v37 = vpop.eup %7074 }
 0x48c   : > { %v2582_v43 = vmul.f32 %v7075_v37, %v8674_v10  ;;  %v2880_v10 = vsel %vm1308_vm0, %v10494_v52, 0 }
 0x48d   : > { %v7077_v32 = vpop.eup %7076 }
 0x48e   : > { %v7079_v33 = vpop.eup %7078  ;;  %v2579_v17 = vmul.f32 %v7077_v32, %v8678_v24  ;;  %v10495_v24 = vld [vmem:[#allocation77_spill] sm:$0xff] }
 0x48f   : > { %v2581_v51 = vmul.f32 %v7079_v33, %v8667_v1  ;;  %v2877_v28 = vsel %vm1308_vm0, %v10495_v24, 0 }
 0x491   : > { %v2596_v6 = vpack.c.bf16 %v2582_v43, %v2581_v51 }
 0x493   : > { %v7081_v45 = vpop.eup %7080 }
 0x494   : > { %v2580_v57 = vmul.f32 %v7081_v45, %v8684_v4 }
 0x496   : > { %v2595_v21 = vpack.c.bf16 %v2580_v57, %v2579_v17 }
 0x498   : > { %6270 = vmatprep.mubr.bf16.mxu1 %v2595_v21 }
 0x499   : > { %6271 = vmatmul.mubr.bf16.vlgmr.msra.gmra.mxu1 %v2596_v6 }
 0x49a   : > { %6287 = vmatpush3.bf16.xpose.msra.mxu1 %v2883_v31 }
 0x49b   : > { %6631 = vmatprep.subr.msk.bf16.mxu1 %vm1308_vm0, %v10494_v52 }
 0x4a1   : > { %v6144_v19 = vpop.f32.mrf.mxu1 }
 0x4a2   : > { %1705 = vst.msk [vmem:[#allocation2 + $0x20] sm:$0xff] %vm1308_vm0, %v6144_v19  ;;  %6289 = vmatpush3.bf16.xpose.msra.mxu1 %v2880_v10  ;;  %v10496_v19 = vld [vmem:[#allocation13_spill] sm:$0xff] }
 0x4a3   : > { %6632 = vmatprep.subr.msk.bf16.mxu1 %vm1308_vm0, %v10495_v24  ;;  %v1640_v1 = vpop.f32.mrf.mxu1  ;;  %v353_v10 = vsub.s32 5, %v10496_v19 }
 0x4a4   : > { %1703 = vst.msk [vmem:[#allocation2] sm:$0xff] %vm1308_vm0, %v1640_v1 }
 0x4a5   : > { %v6145_v4 = vpop.f32.mrf.mxu1 }
 0x4a6   : > { %1706 = vst.msk [vmem:[#allocation2 + $0x30] sm:$0xff] %vm1308_vm0, %v6145_v4 }
 0x4a7   : > { %v1643_v13 = vpop.f32.mrf.mxu1 }
 0x4a8   : > { %1704 = vst.msk [vmem:[#allocation2 + $0x10] sm:$0xff] %vm1308_vm0, %v1643_v13 }
 0x4a9   : > { %v6148_v48 = vpop.f32.mrf.mxu1 }
 0x4aa   : > { %1709 = vst.msk [vmem:[#allocation2 + $0x60] sm:$0xff] %vm1308_vm0, %v6148_v48  ;;  %6291 = vmatpush3.bf16.xpose.msra.mxu1 %v2877_v28 }
 0x4ab   : > { %6633 = vmatprep.subr.msk.bf16.mxu1 %vm1308_vm0, %v2830_v62  ;;  %v1656_v5 = vpop.f32.mrf.mxu1 }
 0x4ac   : > { %1707 = vst.msk [vmem:[#allocation2 + $0x40] sm:$0xff] %vm1308_vm0, %v1656_v5  ;;  %v8850_v5 = vld [vmem:[#allocation8] sm:$0x3f] }
 0x4ad   : > { %v6149_v53 = vpop.f32.mrf.mxu1 }
 0x4ae   : > { %1710 = vst.msk [vmem:[#allocation2 + $0x70] sm:$0xff] %vm1308_vm0, %v6149_v53 }
 0x4af   : > { %v1659_v42 = vpop.f32.mrf.mxu1 }
 0x4b0   : > { %1708 = vst.msk [vmem:[#allocation2 + $0x50] sm:$0xff] %vm1308_vm0, %v1659_v42  ;;  %v10497_v42 = vld [vmem:[#allocation67_spill] sm:$0xff] }
 0x4b1   : > { %v6152_v49 = vpop.f32.mrf.mxu1 }
 0x4b2   : > { %1713 = vst.msk [vmem:[#allocation2 + $0xa0] sm:$0xff] %vm1308_vm0, %v6152_v49  ;;  %6293 = vmatpush3.bf16.xpose.msra.mxu1 %v2874_v2  ;;  %v10498_v2 = vld [vmem:[#allocation82_spill] sm:$0xff] }
 0x4b3   : > { %6634 = vmatprep.subr.msk.bf16.mxu1 %vm1308_vm0, %v2828_v15  ;;  %v1672_v30 = vpop.f32.mrf.mxu1 }
 0x4b4   : > { %1711 = vst.msk [vmem:[#allocation2 + $0x80] sm:$0xff] %vm1308_vm0, %v1672_v30  ;;  %v2540_v3 = vpop.xlane.xlu1 %2539 }
 0x4b5   : > { %v6153_v35 = vpop.f32.mrf.mxu1 }
 0x4b6   : > { %1714 = vst.msk [vmem:[#allocation2 + $0xb0] sm:$0xff] %vm1308_vm0, %v6153_v35 }
 0x4b7   : > { %v1675_v54 = vpop.f32.mrf.mxu1 }
 0x4b8   : > { %1712 = vst.msk [vmem:[#allocation2 + $0x90] sm:$0xff] %vm1308_vm0, %v1675_v54  ;;  %v2546_v20 = vpop.xlane.xlu1 %2545 }
 0x4ba   : > { %6295 = vmatpush3.bf16.xpose.msra.mxu1 %v2871_v55  ;;  %v2544_v29 = vpop.xlane.xlu0 %2543 }
 0x4bb   : > { %7082 = vrcp.f32 %v2544_v29  ;;  %v10500_v29 = vld [vmem:[#allocation66_spill] sm:$0xff] }
 0x4bc   : > { %v2552_v38 = vpop.xlane.xlu1 %2551  ;;  %7084 = vrcp.f32 %v2540_v3 }
 0x4bd   : > { %7086 = vrcp.f32 %v2546_v20  ;;  %v10499_v20 = vld [vmem:[#allocation65_spill] sm:$0xff] }
 0x4be   : > { %v2542_v16 = vpop.xlane.xlu0 %2541 }
 0x4bf   : > { %7088 = vrcp.f32 %v2542_v16  ;;  %v10501_v16 = vld [vmem:[#allocation61_spill] sm:$0xff] }
 0x4c0   : > { %v2548_v63 = vpop.xlane.xlu1 %2547 }
 0x4c2   : > { %v6156_v44 = vpop.f32.mrf.mxu1  ;;  %v2560_v0 = vpop.xlane.xlu0 %2559 }
 0x4c3   : > { %1717 = vst.msk [vmem:[#allocation2 + $0xe0] sm:$0xff] %vm1308_vm0, %v6156_v44 }
 0x4c4   : > { %v1688_v7 = vpop.f32.mrf.mxu1  ;;  %v2554_v59 = vpop.xlane.xlu1 %2553 }
 0x4c5   : > { %1715 = vst.msk [vmem:[#allocation2 + $0xc0] sm:$0xff] %vm1308_vm0, %v1688_v7  ;;  %7090 = vrcp.f32 %v2554_v59  ;;  %v10503_v59 = vld [vmem:[#allocation58_spill] sm:$0xff] }
 0x4c6   : > { %v6157_v47 = vpop.f32.mrf.mxu1  ;;  %v2556_v11 = vpop.xlane.xlu0 %2555  ;;  %7092 = vrcp.f32 %v2548_v63 }
 0x4c7   : > { %1718 = vst.msk [vmem:[#allocation2 + $0xf0] sm:$0xff] %vm1308_vm0, %v6157_v47  ;;  %7094 = vrcp.f32 %v2552_v38 }
 0x4c8   : > { %v1691_v40 = vpop.f32.mrf.mxu1  ;;  %v2550_v22 = vpop.xlane.xlu1 %2549 }
 0x4c9   : > { %v7083_v26 = vpop.eup %7082  ;;  %1716 = vst.msk [vmem:[#allocation2 + $0xd0] sm:$0xff] %vm1308_vm0, %v1691_v40  ;;  %7096 = vrcp.f32 %v2550_v22 }
 0x4ca   : > { %v7085_v41 = vpop.eup %7084  ;;  %7098 = vrcp.f32 %v2556_v11  ;;  %v2562_v58 = vpop.xlane.xlu0 %2561  ;;  %v2585_v14 = vmul.f32 %v7083_v26, %v8716_v46  ;;  %v10504_v11 = vld [vmem:[#allocation59_spill] sm:$0xff] }
 0x4cb   : > { %v7087_v39 = vpop.eup %7086  ;;  %v2583_v37 = vmul.f32 %v7085_v41, %v8708_v36  ;;  %v10505_v41 = vld [vmem:[#allocation55_spill] sm:$0xff] }
 0x4cc   : > { %v7089_v50 = vpop.eup %7088  ;;  %v2558_v27 = vpop.xlane.xlu1 %2557  ;;  %v2586_v33 = vmul.f32 %v7087_v39, %v8713_v9 }
 0x4cd   : > { %7100 = vrcp.f32 %v2558_v27  ;;  %v2584_v32 = vmul.f32 %v7089_v50, %v8722_v34 }
 0x4ce   : > { %7102 = vrcp.f32 %v2562_v58  ;;  %v2598_v17 = vpack.c.bf16 %v2586_v33, %v2585_v14  ;;  %v2824_v46 = vpop.permute.xlu0 %2823  ;;  %v10506_v58 = vld [vmem:[#allocation57_spill] sm:$0xff]  ;;  %v10508_v33 = vld [vmem:[#allocation54_spill] sm:$0xff] }
 0x4cf   : > { %v2597_v45 = vpack.c.bf16 %v2584_v32, %v2583_v37  ;;  %7104 = vrcp.f32 %v2560_v0  ;;  %v2865_v13 = vsel %vm1308_vm0, %v2824_v46, 0  ;;  %v10507_v37 = vld [vmem:[#allocation52_spill] sm:$0xff] }
 0x4d0   : > { %v2826_v43 = vpop.permute.xlu1 %2825 }
 0x4d1   : > { %6274 = vmatprep.mubr.bf16.mxu1 %v2597_v45  ;;  %6635 = vmatprep.subr.msk.bf16.mxu1 %vm1308_vm0, %v2826_v43  ;;  %v2868_v57 = vsel %vm1308_vm0, %v2826_v43, 0 }
 0x4d2   : > { %6275 = vmatmul.mubr.bf16.gmra.mxu1 %v2598_v17  ;;  %v7091_v51 = vpop.eup %7090  ;;  %v2822_v62 = vpop.permute.xlu0 %2821 }
 0x4d3   : > { %6297 = vmatpush3.bf16.xpose.msra.mxu1 %v2868_v57  ;;  %v7093_v21 = vpop.eup %7092  ;;  %v2590_v9 = vmul.f32 %v7091_v51, %v8731_v60  ;;  %v10509_v57 = vld [vmem:[#allocation48_spill] sm:$0xff] }
 0x4d4   : > { %6636 = vmatprep.subr.msk.bf16.mxu1 %vm1308_vm0, %v2824_v46  ;;  %v7095_v36 = vpop.eup %7094  ;;  %v2587_v6 = vmul.f32 %v7093_v21, %v8725_v61  ;;  %v2806_v54 = vpop.permute.xlu1 %2805  ;;  %v10510_v46 = vld [vmem:[#allocation50_spill] sm:$0xff] }
 0x4d5   : > { %v2589_v24 = vmul.f32 %v7095_v36, %v8719_v25 }
 0x4d6   : > { %v7097_v34 = vpop.eup %7096 }
 0x4d7   : > { %v2588_v31 = vmul.f32 %v7097_v34, %v8737_v12  ;;  %v7099_v52 = vpop.eup %7098  ;;  %v2600_v48 = vpack.c.bf16 %v2590_v9, %v2589_v24  ;;  %v354_v12 = vrot.slane %v8850_v5, %v353_v10  ;;  %v10511_v9 = vld [vmem:[#allocation44_spill] sm:$0xff] }
 0x4d8   : > { %v2591_v60 = vmul.f32 %v7099_v52, %v8734_v8  ;;  %v2810_v7 = vpop.permute.xlu1 %2809 }
 0x4d9   : > { %v2599_v1 = vpack.c.bf16 %v2588_v31, %v2587_v6  ;;  %v1254_v49 = vadd.f32 %v10497_v42, %v354_v12  ;;  %v1258_v15 = vadd.f32 %v10498_v2, %v354_v12  ;;  %v1244_v55 = vadd.f32 %v10499_v20, %v354_v12  ;;  %v10512_v31 = vld [vmem:[#allocation46_spill] sm:$0xff] }
 0x4da   : > { %v7101_v4 = vpop.eup %7100  ;;  %v1248_v38 = vadd.f32 %v10500_v29, %v354_v12  ;;  %v1234_v63 = vadd.f32 %v10501_v16, %v354_v12  ;;  %v1224_v47 = vadd.f32 %v10503_v59, %v354_v12  ;;  %v1228_v40 = vadd.f32 %v10504_v11, %v354_v12 }
 0x4db   : > { %v7103_v28 = vpop.eup %7102  ;;  %6299 = vmatpush3.bf16.xpose.msra.mxu1 %v2865_v13  ;;  %6278 = vmatprep.mubr.bf16.mxu1 %v2599_v1  ;;  %v2592_v61 = vmul.f32 %v7101_v4, %v8743_v18  ;;  %v8858_v3 = vpack.c.bf16 %v1258_v15, %v1254_v49  ;;  %v2862_v18 = vsel %vm1308_vm0, %v2822_v62, 0  ;;  %v1214_v39 = vadd.f32 %v10505_v41, %v354_v12 }
 0x4dc   : > { %6637 = vmatprep.subr.msk.bf16.mxu1 %vm1308_vm0, %v2822_v62  ;;  %6279 = vmatmul.mubr.bf16.gmra.mxu1 %v2600_v48  ;;  %v7105_v25 = vpop.eup %7104  ;;  %v2594_v30 = vmul.f32 %v7103_v28, %v8740_v23  ;;  %v2808_v23 = vpop.permute.xlu0 %2807  ;;  %v8867_v0 = vpack.c.bf16 %v1248_v38, %v1244_v55  ;;  %v1218_v50 = vadd.f32 %v10506_v58, %v354_v12  ;;  %v10540_v58 = vld [vmem:[#allocation68_spill] sm:$0xff] }
 0x4dd   : > { %v2601_v53 = vpack.c.bf16 %v2592_v61, %v2591_v60  ;;  %v2593_v8 = vmul.f32 %v7105_v25, %v8728_v56  ;;  %v10502_v56 = vld [vmem:[#allocation63_spill] sm:$0xff]  ;;  %v8881_v27 = vpack.c.bf16 %v1228_v40, %v1224_v47  ;;  %v2814_v14 = vpop.permute.xlu1 %2813  ;;  %v1204_v32 = vadd.f32 %v10507_v37, %v354_v12 }
 0x4de   : > { %v1238_v44 = vadd.f32 %v10502_v56, %v354_v12  ;;  %v1208_v45 = vadd.f32 %v10508_v33, %v354_v12  ;;  %v8889_v43 = vpack.c.bf16 %v1218_v50, %v1214_v39  ;;  %v1194_v51 = vadd.f32 %v10509_v57, %v354_v12  ;;  %v10541_v50 = vld [vmem:[#allocation69_spill] sm:$0xff] }
 0x4df   : > { %6282 = vmatprep.mubr.bf16.mxu1 %v2601_v53  ;;  %v2602_v35 = vpack.c.bf16 %v2594_v30, %v2593_v8  ;;  %v1198_v21 = vadd.f32 %v10510_v46, %v354_v12  ;;  %v1184_v6 = vadd.f32 %v10511_v9, %v354_v12  ;;  %v1188_v52 = vadd.f32 %v10512_v31, %v354_v12  ;;  %v10543_v31 = vld [vmem:[#allocation64_spill] sm:$0xff] }
 0x4e0   : > { %v8875_v22 = vpack.c.bf16 %v1238_v44, %v1234_v63  ;;  %v2812_v26 = vpop.permute.xlu0 %2811  ;;  %v8895_v36 = vpack.c.bf16 %v1208_v45, %v1204_v32 }
 0x4e1   : > { %v2818_v34 = vpop.permute.xlu1 %2817  ;;  %v8903_v10 = vpack.c.bf16 %v1198_v21, %v1194_v51  ;;  %v8907_v1 = vpack.c.bf16 %v1188_v52, %v1184_v6  ;;  %v10542_v6 = vld [vmem:[#allocation71_spill] sm:$0xff]  ;;  %v10544_v52 = vld [vmem:[#allocation62_spill] sm:$0xff] }
 0x4e3   : > { %6301 = vmatpush3.bf16.xpose.msra.mxu1 %v2862_v18 }
 0x4e4   : > { %6382 = vmatprep.subr.bf16.mxu1 %v8858_v3  ;;  %6283 = vmatmul.mubr.bf16.gmra.mxu1 %v2602_v35  ;;  %v2816_v17 = vpop.permute.xlu0 %2815 }
 0x4e5   : > { %6302 = vmatprep.mubr.msk.bf16.mxu1 %vm1308_vm0, %v2806_v54 }
 0x4e8   : > { %v2820_v24 = vpop.permute.xlu0 %2819 }
 0x4ec   : > { %6303 = vmatmul.mubr.msk.bf16.vlgmr.msra.gmra.mxu1 %vm1308_vm0, %v2808_v23 }
 0x4ed   : > { %6383 = vmatpush3.bf16.msra.mxu1 %v8858_v3  ;;  %6306 = vmatprep.mubr.msk.bf16.mxu1 %vm1308_vm0, %v2810_v7 }
 0x4ee   : > { %6384 = vmatprep.subr.bf16.mxu1 %v8867_v0 }
 0x4f1   : > { %6385 = vmatpush3.bf16.msra.mxu1 %v8867_v0 }
 0x4f2   : > { %6386 = vmatprep.subr.bf16.mxu1 %v8875_v22 }
 0x4f4   : > { %6307 = vmatmul.mubr.msk.bf16.gmra.mxu1 %vm1308_vm0, %v2812_v26 }
 0x4f5   : > { %6387 = vmatpush3.bf16.msra.mxu1 %v8875_v22  ;;  %6310 = vmatprep.mubr.msk.bf16.mxu1 %vm1308_vm0, %v2814_v14 }
 0x4f6   : > { %6388 = vmatprep.subr.bf16.mxu1 %v8881_v27 }
 0x4f9   : > { %6389 = vmatpush3.bf16.msra.mxu1 %v8881_v27 }
 0x4fa   : > { %6390 = vmatprep.subr.bf16.mxu1 %v8889_v43 }
 0x4fc   : > { %6311 = vmatmul.mubr.msk.bf16.gmra.mxu1 %vm1308_vm0, %v2816_v17 }
 0x4fd   : > { %6391 = vmatpush3.bf16.msra.mxu1 %v8889_v43  ;;  %6314 = vmatprep.mubr.msk.bf16.mxu1 %vm1308_vm0, %v2818_v34 }
 0x4fe   : > { %6392 = vmatprep.subr.bf16.mxu1 %v8895_v36 }
 0x501   : > { %6393 = vmatpush3.bf16.msra.mxu1 %v8895_v36 }
 0x502   : > { %6394 = vmatprep.subr.bf16.mxu1 %v8903_v10 }
 0x504   : > { %6315 = vmatmul.mubr.msk.bf16.gmra.mxu1 %vm1308_vm0, %v2820_v24  ;;  %v10545_v24 = vld [vmem:[#allocation72_spill] sm:$0xff] }
 0x505   : > { %6395 = vmatpush3.bf16.msra.mxu1 %v8903_v10 }
 0x506   : > { %6396 = vmatprep.subr.bf16.mxu1 %v8907_v1 }
 0x509   : > { %6397 = vmatpush3.bf16.msra.mxu1 %v8907_v1 }
 0x514   : > { %v8913_v4 = vpop.f32.mrf.mxu1 }
 0x516   : > { %v8915_v13 = vpop.f32.mrf.mxu1 }
 0x517   : > { %10513 = vst [vmem:[#allocation86_spill] sm:$0xff] %v8915_v13 }
 0x518   : > { %v8917_v48 = vpop.f32.mrf.mxu1 }
 0x519   : > { %10514 = vst [vmem:[#allocation85_spill] sm:$0xff] %v8917_v48 }
 0x51a   : > { %v8919_v28 = vpop.f32.mrf.mxu1 }
 0x51c   : > { %v8921_v62 = vpop.f32.mrf.mxu1 }
 0x51e   : > { %v8923_v60 = vpop.f32.mrf.mxu1 }
 0x520   : > { %v8925_v61 = vpop.f32.mrf.mxu1 }
 0x521   : > { %10515 = vst [vmem:[#allocation87_spill] sm:$0xff] %v8925_v61 }
 0x522   : > { %v8927_v12 = vpop.f32.mrf.mxu1 }
 0x523   : > { %10516 = vst [vmem:[#allocation90_spill] sm:$0xff] %v8927_v12 }
 0x525   : > { %v8929_v25 = vpop.f32.mrf.mxu1 }
 0x526   : > { %10517 = vst [vmem:[#allocation88_spill] sm:$0xff] %v8929_v25 }
 0x527   : > { %v8931_v53 = vpop.f32.mrf.mxu1 }
 0x529   : > { %v8933_v42 = vpop.f32.mrf.mxu1 }
 0x52a   : > { %10518 = vst [vmem:[#allocation91_spill] sm:$0xff] %v8933_v42 }
 0x52b   : > { %v8935_v49 = vpop.f32.mrf.mxu1 }
 0x52c   : > { %10519 = vst [vmem:[#allocation89_spill] sm:$0xff] %v8935_v49 }
 0x52d   : > { %v8937_v2 = vpop.f32.mrf.mxu1 }
 0x52e   : > { %10520 = vst [vmem:[#allocation92_spill] sm:$0xff] %v8937_v2 }
 0x52f   : > { %v8939_v15 = vpop.f32.mrf.mxu1 }
 0x530   : > { %10521 = vst [vmem:[#allocation93_spill] sm:$0xff] %v8939_v15 }
 0x531   : > { %v8941_v30 = vpop.f32.mrf.mxu1 }
 0x532   : > { %10522 = vst [vmem:[#allocation33_spill] sm:$0xff] %v8941_v30 }
 0x533   : > { %v8943_v8 = vpop.f32.mrf.mxu1 }
 0x534   : > { %10523 = vst [vmem:[#allocation84_spill] sm:$0xff] %v8943_v8 }
 0x559   : > { %v8945_v18 = vpop.f32.mrf.mxu1 }
 0x55a   : > { %10524 = vst [vmem:[#allocation43_spill] sm:$0xff] %v8945_v18 }
 0x55b   : > { %v8947_v35 = vpop.f32.mrf.mxu1 }
 0x55c   : > { %10525 = vst [vmem:[#allocation19_spill] sm:$0xff] %v8947_v35 }
 0x55d   : > { %v8949_v54 = vpop.f32.mrf.mxu1 }
 0x55e   : > { %10526 = vst [vmem:[#allocation83_spill] sm:$0xff] %v8949_v54 }
 0x55f   : > { %v8951_v20 = vpop.f32.mrf.mxu1 }
 0x560   : > { %10527 = vst [vmem:[#allocation37_spill] sm:$0xff] %v8951_v20 }
 0x592   : > { %v8953_v55 = vpop.f32.mrf.mxu1 }
 0x593   : > { %10528 = vst [vmem:[#allocation42_spill] sm:$0xff] %v8953_v55 }
 0x594   : > { %v8955_v29 = vpop.f32.mrf.mxu1 }
 0x595   : > { %10529 = vst [vmem:[#allocation74_spill] sm:$0xff] %v8955_v29 }
 0x596   : > { %v8957_v38 = vpop.f32.mrf.mxu1 }
 0x597   : > { %10530 = vst [vmem:[#allocation45_spill] sm:$0xff] %v8957_v38 }
 0x598   : > { %v8959_v23 = vpop.f32.mrf.mxu1 }
 0x599   : > { %10531 = vst [vmem:[#allocation53_spill] sm:$0xff] %v8959_v23 }
 0x59c   : > { %v8961_v16 = vpop.f32.mrf.mxu1 }
 0x59d   : > { %10532 = vst [vmem:[#allocation81_spill] sm:$0xff] %v8961_v16 }
 0x59e   : > { %v8963_v63 = vpop.f32.mrf.mxu1 }
 0x59f   : > { %10533 = vst [vmem:[#allocation51_spill] sm:$0xff] %v8963_v63 }
 0x5a0   : > { %v8965_v56 = vpop.f32.mrf.mxu1 }
 0x5a1   : > { %10534 = vst [vmem:[#allocation49_spill] sm:$0xff] %v8965_v56 }
 0x5a2   : > { %v8967_v44 = vpop.f32.mrf.mxu1 }
 0x5a3   : > { %10535 = vst [vmem:[#allocation95_spill] sm:$0xff] %v8967_v44 }
 0x5a4   : > { %v8969_v7 = vpop.f32.mrf.mxu1 }
 0x5a5   : > { %10536 = vst [vmem:[#allocation97_spill] sm:$0xff] %v8969_v7 }
 0x5a6   : > { %v8971_v59 = vpop.f32.mrf.mxu1 }
 0x5a7   : > { %10537 = vst [vmem:[#allocation80_spill] sm:$0xff] %v8971_v59 }
 0x5a8   : > { %v8973_v47 = vpop.f32.mrf.mxu1 }
 0x5a9   : > { %10538 = vst [vmem:[#allocation47_spill] sm:$0xff] %v8973_v47 }
 0x5aa   : > { %v8975_v11 = vpop.f32.mrf.mxu1 }
 0x5ab   : > { %10539 = vst [vmem:[#allocation96_spill] sm:$0xff] %v8975_v11 }
 0x5ac   : > { %v6304_v40 = vpop.f32.mrf.mxu1 }
 0x5ad   : > { %2986 = vmax.xlane.f32.xlu0 %v6304_v40 }
 0x5ae   : > { %v2919_v26 = vpop.f32.mrf.mxu1 }
 0x5af   : > { %2982 = vmax.xlane.f32.xlu1 %v2919_v26 }
 0x5b0   : > { %v6305_v41 = vpop.f32.mrf.mxu1 }
 0x5b2   : > { %v2922_v39 = vpop.f32.mrf.mxu1 }
 0x5b3   : > { %2988 = vmax.xlane.f32.xlu1 %v6305_v41  ;;  %2984 = vmax.xlane.f32.xlu0 %v2922_v39 }
 0x5b4   : > { %v8981_v14 = vpop.f32.mrf.mxu1 }
 0x5b6   : > { %v8983_v37 = vpop.f32.mrf.mxu1 }
 0x5b8   : > { %v8985_v32 = vpop.f32.mrf.mxu1 }
 0x5ba   : > { %v8987_v33 = vpop.f32.mrf.mxu1 }
 0x5bc   : > { %v8989_v45 = vpop.f32.mrf.mxu1 }
 0x5be   : > { %v8991_v17 = vpop.f32.mrf.mxu1 }
 0x5c0   : > { %v8993_v57 = vpop.f32.mrf.mxu1 }
 0x5c2   : > { %v8997_v51 = vpop.f32.mrf.mxu1 }
 0x5c4   : > { %3146 = vrot.lane.b32.xlu1 %v10540_v58, %s7586_s25  ;;  %v9001_v46 = vpop.f32.mrf.mxu1  ;;  %v10546_v58 = vld [vmem:[#allocation60_spill] sm:$0xff] }
 0x5c6   : > { %v9005_v21 = vpop.f32.mrf.mxu1 }
 0x5c8   : > { %v9009_v34 = vpop.f32.mrf.mxu1 }
 0x5c9   : > { %3148 = vrot.lane.b32.xlu0 %v10541_v50, %s7586_s25 }
 0x5ca   : > { %v9013_v9 = vpop.f32.mrf.mxu1 }
 0x5e8   : > { %2994 = vmax.xlane.f32.xlu0 %v8981_v14  ;;  %2996 = vmax.xlane.f32.xlu1 %v8985_v32 }
 0x5ec   : > { %2990 = vmax.xlane.f32.xlu0 %v8983_v37  ;;  %2992 = vmax.xlane.f32.xlu1 %v8987_v33 }
 0x5f0   : > { %3002 = vmax.xlane.f32.xlu0 %v8989_v45  ;;  %3004 = vmax.xlane.f32.xlu1 %v8993_v57 }
 0x5f4   : > { %2998 = vmax.xlane.f32.xlu0 %v8991_v17  ;;  %3000 = vmax.xlane.f32.xlu1 %v8997_v51 }
 0x5f8   : > { %3010 = vmax.xlane.f32.xlu0 %v9001_v46  ;;  %3012 = vmax.xlane.f32.xlu1 %v9009_v34 }
 0x5fc   : > { %3006 = vmax.xlane.f32.xlu0 %v9005_v21  ;;  %3008 = vmax.xlane.f32.xlu1 %v9013_v9 }
 0x612   : > { %3144 = vrot.lane.b32.xlu0 %v10542_v6, %s7586_s25 }
 0x616   : > { %3142 = vrot.lane.b32.xlu0 %v10543_v31, %s7586_s25 }
 0x61a   : > { %3140 = vrot.lane.b32.xlu0 %v10544_v52, %s7586_s25 }
 0x61e   : > { %3138 = vrot.lane.b32.xlu0 %v10545_v24, %s7586_s25 }
 0x622   : > { %3134 = vrot.lane.b32.xlu0 %v10546_v58, %s7586_s25 }
 0x636   : > { %v2987_v50 = vpop.xlane.xlu0 %2986 }
 0x637   : > { %v3016_v47 = vsub.f32 %v6304_v40, %v2987_v50 }
 0x638   : > { %v2983_v11 = vpop.xlane.xlu1 %2982 }
 0x639   : > { %v3034_v56 = vmul.f32 1.442695, %v3016_v47  ;;  %v3014_v44 = vsub.f32 %v2919_v26, %v2983_v11 }
 0x63b   : > { %7106 = vpow2.f32 %v3034_v56  ;;  %v3030_v38 = vmul.f32 1.442695, %v3014_v44 }
 0x63c   : > { %v2989_v6 = vpop.xlane.xlu1 %2988  ;;  %v2985_v23 = vpop.xlane.xlu0 %2984 }
 0x63d   : > { %v3017_v54 = vsub.f32 %v6305_v41, %v2989_v6  ;;  %7108 = vpow2.f32 %v3030_v38  ;;  %v3015_v20 = vsub.f32 %v2922_v39, %v2985_v23 }
 0x63f   : > { %v3036_v31 = vmul.f32 1.442695, %v3017_v54  ;;  %v3032_v24 = vmul.f32 1.442695, %v3015_v20  ;;  %v10547_v20 = vld [vmem:[#allocation70_spill] sm:$0xff] }
 0x640   : > { %v3149_v52 = vpop.permute.xlu0 %3148  ;;  %v3147_v7 = vpop.permute.xlu1 %3146 }
 0x641   : > { %6318 = vmatprep.subr.bf16.mxu0 %v3149_v52  ;;  %7110 = vpow2.f32 %v3036_v31 }
 0x642   : > { %6319 = vmatpush3.bf16.msra.mxu0 %v3149_v52  ;;  %7112 = vpow2.f32 %v3032_v24 }
 0x643   : > { %6320 = vmatprep.subr.bf16.mxu0 %v3147_v7 }
 0x646   : > { %6321 = vmatpush3.bf16.msra.mxu0 %v3147_v7 }
 0x648   : > { %v9027_v40 = vpop.eup %7106 }
 0x649   : > { %3066 = vadd.xlane.f32.xlu1 %v9027_v40 }
 0x64a   : > { %v9030_v56 = vpop.eup %7108 }
 0x64d   : > { %3062 = vadd.xlane.f32.xlu1 %v9030_v56 }
 0x64e   : > { %v9033_v38 = vpop.eup %7110 }
 0x64f   : > { %v9036_v54 = vpop.eup %7112 }
 0x651   : > { %3068 = vadd.xlane.f32.xlu1 %v9033_v38 }
 0x655   : > { %3064 = vadd.xlane.f32.xlu1 %v9036_v54 }
 0x666   : > { %3136 = vrot.lane.b32.xlu1 %v10547_v20, %s7586_s25 }
 0x671   : > { %v2997_v23 = vpop.xlane.xlu1 %2996  ;;  %v2995_v44 = vpop.xlane.xlu0 %2994 }
 0x672   : > { %v3020_v11 = vsub.f32 %v8981_v14, %v2995_v44  ;;  %v3021_v39 = vsub.f32 %v8985_v32, %v2997_v23 }
 0x674   : > { %v3042_v52 = vmul.f32 1.442695, %v3020_v11  ;;  %v3044_v24 = vmul.f32 1.442695, %v3021_v39 }
 0x675   : > { %v2993_v7 = vpop.xlane.xlu1 %2992  ;;  %v2991_v47 = vpop.xlane.xlu0 %2990 }
 0x676   : > { %v3019_v26 = vsub.f32 %v8987_v33, %v2993_v7  ;;  %v3018_v41 = vsub.f32 %v8983_v37, %v2991_v47 }
 0x678   : > { %v3040_v58 = vmul.f32 1.442695, %v3019_v26  ;;  %v3038_v50 = vmul.f32 1.442695, %v3018_v41 }
 0x679   : > { %v3005_v6 = vpop.xlane.xlu1 %3004  ;;  %v3003_v31 = vpop.xlane.xlu0 %3002 }
 0x67a   : > { %7114 = vpow2.f32 %v3040_v58  ;;  %v3024_v33 = vsub.f32 %v8989_v45, %v3003_v31  ;;  %v3025_v37 = vsub.f32 %v8993_v57, %v3005_v6 }
 0x67b   : > { %7116 = vpow2.f32 %v3038_v50 }
 0x67c   : > { %7118 = vpow2.f32 %v3042_v52  ;;  %v3050_v47 = vmul.f32 1.442695, %v3024_v33  ;;  %v3052_v11 = vmul.f32 1.442695, %v3025_v37 }
 0x67d   : > { %v3001_v20 = vpop.xlane.xlu1 %3000  ;;  %v2999_v59 = vpop.xlane.xlu0 %2998  ;;  %7120 = vpow2.f32 %v3044_v24 }
 0x67e   : > { %v3023_v16 = vsub.f32 %v8997_v51, %v3001_v20  ;;  %v3022_v14 = vsub.f32 %v8991_v17, %v2999_v59 }
 0x680   : > { %v3048_v32 = vmul.f32 1.442695, %v3023_v16  ;;  %v3046_v23 = vmul.f32 1.442695, %v3022_v14 }
 0x681   : > { %v3013_v44 = vpop.xlane.xlu1 %3012  ;;  %v3011_v7 = vpop.xlane.xlu0 %3010 }
 0x682   : > { %7122 = vpow2.f32 %v3046_v23  ;;  %v3028_v45 = vsub.f32 %v9001_v46, %v3011_v7  ;;  %v3029_v16 = vsub.f32 %v9009_v34, %v3013_v44  ;;  %v10548_v7 = vld [vmem:[#allocation14_spill] sm:$0xff] }
 0x683   : > { %7124 = vpow2.f32 %v3048_v32 }
 0x684   : > { %7126 = vpow2.f32 %v3050_v47  ;;  %v3060_v6 = vmul.f32 1.442695, %v3029_v16  ;;  %v10549_v47 = vld [vmem:[#allocation75_spill] sm:$0xff] }
 0x685   : > { %v3009_v26 = vpop.xlane.xlu1 %3008  ;;  %v3007_v41 = vpop.xlane.xlu0 %3006  ;;  %7128 = vpow2.f32 %v3052_v11  ;;  %v1145_v11 = vadd.f32 %v10549_v47, %v10548_v7 }
 0x686   : > { %v3027_v39 = vsub.f32 %v9013_v9, %v3009_v26  ;;  %v3026_v51 = vsub.f32 %v9005_v21, %v3007_v41  ;;  %v3058_v21 = vmul.f32 1.442695, %v3028_v45  ;;  %v10550_v26 = vld [vmem:[#allocation36_spill] sm:$0xff] }
 0x687   : > { %v9051_v59 = vpop.eup %7114  ;;  %v1141_v41 = vadd.f32 %v10550_v26, %v10548_v7 }
 0x688   : > { %v3056_v17 = vmul.f32 1.442695, %v3027_v39  ;;  %v3054_v57 = vmul.f32 1.442695, %v3026_v51  ;;  %3072 = vadd.xlane.f32.xlu0 %v9051_v59  ;;  %v9056_v58 = vpop.eup %7116 }
 0x689   : > { %v3145_v50 = vpop.permute.xlu0 %3144  ;;  %v9059_v9 = vpop.eup %7118  ;;  %v9093_v39 = vpack.c.bf16 %v1145_v11, %v1141_v41 }
 0x68a   : > { %3070 = vadd.xlane.f32.xlu1 %v9056_v58  ;;  %6322 = vmatprep.subr.bf16.mxu0 %v3145_v50  ;;  %7130 = vpow2.f32 %v3054_v57  ;;  %v9062_v46 = vpop.eup %7120 }
 0x68b   : > { %6323 = vmatpush3.bf16.msra.mxu0 %v3145_v50  ;;  %7132 = vpow2.f32 %v3056_v17 }
 0x68c   : > { %3074 = vadd.xlane.f32.xlu0 %v9059_v9  ;;  %7134 = vpow2.f32 %v3058_v21 }
 0x68d   : > { %v3143_v34 = vpop.permute.xlu0 %3142  ;;  %7136 = vpow2.f32 %v3060_v6 }
 0x68e   : > { %3076 = vadd.xlane.f32.xlu1 %v9062_v46  ;;  %6324 = vmatprep.subr.bf16.mxu0 %v3143_v34 }
 0x68f   : > { %6325 = vmatpush3.bf16.msra.mxu0 %v3143_v34  ;;  %v9065_v31 = vpop.eup %7122 }
 0x690   : > { %v9067_v52 = vpop.eup %7124  ;;  %3078 = vadd.xlane.f32.xlu0 %v9065_v31 }
 0x691   : > { %v3141_v24 = vpop.permute.xlu0 %3140  ;;  %v9071_v20 = vpop.eup %7126 }
 0x692   : > { %3080 = vadd.xlane.f32.xlu1 %v9067_v52  ;;  %6326 = vmatprep.subr.bf16.mxu0 %v3141_v24  ;;  %v9073_v14 = vpop.eup %7128 }
 0x693   : > { %6327 = vmatpush3.bf16.msra.mxu0 %v3141_v24 }
 0x694   : > { %3082 = vadd.xlane.f32.xlu0 %v9071_v20 }
 0x695   : > { %v3139_v33 = vpop.permute.xlu0 %3138 }
 0x696   : > { %3084 = vadd.xlane.f32.xlu1 %v9073_v14  ;;  %6328 = vmatprep.subr.bf16.mxu0 %v3139_v33 }
 0x697   : > { %6329 = vmatpush3.bf16.msra.mxu0 %v3139_v33  ;;  %v9077_v37 = vpop.eup %7130 }
 0x698   : > { %v9079_v32 = vpop.eup %7132  ;;  %3086 = vadd.xlane.f32.xlu0 %v9077_v37 }
 0x699   : > { %v9083_v23 = vpop.eup %7134  ;;  %v3135_v50 = vpop.permute.xlu0 %3134 }
 0x69a   : > { %3088 = vadd.xlane.f32.xlu1 %v9079_v32  ;;  %v9085_v44 = vpop.eup %7136 }
 0x69c   : > { %3090 = vadd.xlane.f32.xlu0 %v9083_v23 }
 0x69e   : > { %3092 = vadd.xlane.f32.xlu1 %v9085_v44 }
 0x6b2   : > { %3792 = vrot.lane.b32.xlu0 %v9093_v39, %s7584_s18 }
 0x6d2   : > { %v3067_v51 = vpop.xlane.xlu1 %3066 }
 0x6d6   : > { %v3063_v45 = vpop.xlane.xlu1 %3062 }
 0x6da   : > { %v3069_v16 = vpop.xlane.xlu1 %3068 }
 0x6db   : > { %7138 = vrcp.f32 %v3069_v16 }
 0x6dc   : > { %7140 = vrcp.f32 %v3063_v45  ;;  %v10551_v45 = vld [vmem:[#allocation34_spill] sm:$0xff] }
 0x6dd   : > { %7142 = vrcp.f32 %v3067_v51  ;;  %v3382_v51 = vsel %vm1308_vm0, %v9093_v39, 0 }
 0x6de   : > { %v3065_v17 = vpop.xlane.xlu1 %3064 }
 0x6df   : > { %7144 = vrcp.f32 %v3065_v17  ;;  %v10554_v17 = vld [vmem:[#allocation24_spill] sm:$0xff] }
 0x6e2   : > { %v3137_v57 = vpop.permute.xlu1 %3136 }
 0x6e3   : > { %6330 = vmatprep.subr.bf16.mxu0 %v3137_v57 }
 0x6e4   : > { %6331 = vmatpush3.bf16.msra.mxu0 %v3137_v57 }
 0x6e5   : > { %6332 = vmatprep.subr.bf16.mxu0 %v3135_v50 }
 0x6e8   : > { %6333 = vmatpush3.bf16.msra.mxu0 %v3135_v50  ;;  %v7139_v21 = vpop.eup %7138  ;;  %v3370_v50 = vsel %vm1308_vm0, %v10554_v17, 0 }
 0x6e9   : > { %6638 = vmatprep.subr.msk.bf16.mxu0 %vm1308_vm0, %v9093_v39  ;;  %v7141_v6 = vpop.eup %7140  ;;  %v3113_v33 = vmul.f32 %v7139_v21, %v9033_v38  ;;  %v3379_v38 = vsel %vm1308_vm0, %v10551_v45, 0 }
 0x6ea   : > { %v7143_v34 = vpop.eup %7142  ;;  %v3110_v7 = vmul.f32 %v7141_v6, %v9030_v56  ;;  %v10552_v56 = vld [vmem:[#allocation30_spill] sm:$0xff]  ;;  %v10555_v6 = vld [vmem:[#allocation21_spill] sm:$0xff] }
 0x6eb   : > { %v3112_v11 = vmul.f32 %v7143_v34, %v9027_v40  ;;  %v3376_v40 = vsel %vm1308_vm0, %v10552_v56, 0 }
 0x6ec   : > { %v7145_v24 = vpop.eup %7144 }
 0x6ed   : > { %v3111_v47 = vmul.f32 %v7145_v24, %v9036_v54  ;;  %v3127_v41 = vpack.c.bf16 %v3113_v33, %v3112_v11  ;;  %v10553_v54 = vld [vmem:[#allocation27_spill] sm:$0xff]  ;;  %v10556_v11 = vld [vmem:[#allocation17_spill] sm:$0xff] }
 0x6ee   : > { %v3373_v16 = vsel %vm1308_vm0, %v10553_v54, 0 }
 0x6ef   : > { %v3126_v26 = vpack.c.bf16 %v3111_v47, %v3110_v7  ;;  %v3367_v7 = vsel %vm1308_vm0, %v10555_v6, 0 }
 0x6f1   : > { %6334 = vmatprep.mubr.bf16.mxu0 %v3126_v26 }
 0x6f2   : > { %6335 = vmatmul.mubr.bf16.vlgmr.msra.gmra.mxu0 %v3127_v41 }
 0x6f3   : > { %6351 = vmatpush3.bf16.xpose.msra.mxu0 %v3382_v51 }
 0x6f4   : > { %6639 = vmatprep.subr.msk.bf16.mxu0 %vm1308_vm0, %v10551_v45 }
 0x6fb   : > { %6353 = vmatpush3.bf16.xpose.msra.mxu0 %v3379_v38 }
 0x6fc   : > { %6640 = vmatprep.subr.msk.bf16.mxu0 %vm1308_vm0, %v10552_v56 }
 0x703   : > { %6355 = vmatpush3.bf16.xpose.msra.mxu0 %v3376_v40 }
 0x704   : > { %6641 = vmatprep.subr.msk.bf16.mxu0 %vm1308_vm0, %v10553_v54 }
 0x70b   : > { %6357 = vmatpush3.bf16.xpose.msra.mxu0 %v3373_v16  ;;  %v3364_v16 = vsel %vm1308_vm0, %v10556_v11, 0 }
 0x70c   : > { %6642 = vmatprep.subr.msk.bf16.mxu0 %vm1308_vm0, %v10554_v17 }
 0x711   : > { %v3073_v57 = vpop.xlane.xlu0 %3072 }
 0x712   : > { %7146 = vrcp.f32 %v3073_v57 }
 0x713   : > { %6359 = vmatpush3.bf16.xpose.msra.mxu0 %v3370_v50  ;;  %v3071_v21 = vpop.xlane.xlu1 %3070 }
 0x714   : > { %7148 = vrcp.f32 %v3071_v21  ;;  %6643 = vmatprep.subr.msk.bf16.mxu0 %vm1308_vm0, %v10555_v6 }
 0x715   : > { %v3075_v34 = vpop.xlane.xlu0 %3074 }
 0x716   : > { %7150 = vrcp.f32 %v3075_v34 }
 0x717   : > { %v3077_v24 = vpop.xlane.xlu1 %3076 }
 0x718   : > { %7152 = vrcp.f32 %v3077_v24  ;;  %v10557_v24 = vld [vmem:[#allocation15_spill] sm:$0xff] }
 0x719   : > { %v3079_v33 = vpop.xlane.xlu0 %3078 }
 0x71a   : > { %7154 = vrcp.f32 %v3079_v33 }
 0x71b   : > { %6361 = vmatpush3.bf16.xpose.msra.mxu0 %v3367_v7  ;;  %v3081_v47 = vpop.xlane.xlu1 %3080 }
 0x71c   : > { %7156 = vrcp.f32 %v3081_v47  ;;  %6644 = vmatprep.subr.msk.bf16.mxu0 %vm1308_vm0, %v10556_v11 }
 0x71d   : > { %v3083_v26 = vpop.xlane.xlu0 %3082 }
 0x71e   : > { %7158 = vrcp.f32 %v3083_v26 }
 0x71f   : > { %v7147_v41 = vpop.eup %7146  ;;  %v3085_v51 = vpop.xlane.xlu1 %3084 }
 0x720   : > { %7160 = vrcp.f32 %v3085_v51  ;;  %v3115_v50 = vmul.f32 %v7147_v41, %v9051_v59 }
 0x721   : > { %v7149_v38 = vpop.eup %7148  ;;  %v3087_v40 = vpop.xlane.xlu0 %3086 }
 0x722   : > { %v3114_v57 = vmul.f32 %v7149_v38, %v9056_v58  ;;  %7162 = vrcp.f32 %v3087_v40 }
 0x723   : > { %v7151_v21 = vpop.eup %7150  ;;  %6363 = vmatpush3.bf16.xpose.msra.mxu0 %v3364_v16  ;;  %v3089_v34 = vpop.xlane.xlu1 %3088  ;;  %v3361_v16 = vsel %vm1308_vm0, %v10557_v24, 0 }
 0x724   : > { %7164 = vrcp.f32 %v3089_v34  ;;  %6645 = vmatprep.subr.msk.bf16.mxu0 %vm1308_vm0, %v10557_v24  ;;  %v3128_v33 = vpack.c.bf16 %v3115_v50, %v3114_v57  ;;  %v3116_v26 = vmul.f32 %v7151_v21, %v9059_v9  ;;  %v337_v34 = vsub.s32 1, %v10496_v19 }
 0x725   : > { %v7153_v7 = vpop.eup %7152  ;;  %v3091_v47 = vpop.xlane.xlu0 %3090 }
 0x726   : > { %6338 = vmatprep.mubr.bf16.mxu0 %v3128_v33  ;;  %v3117_v51 = vmul.f32 %v7153_v7, %v9062_v46  ;;  %7166 = vrcp.f32 %v3091_v47 }
 0x727   : > { %v3093_v58 = vpop.xlane.xlu1 %3092  ;;  %v7155_v38 = vpop.eup %7154 }
 0x728   : > { %7168 = vrcp.f32 %v3093_v58  ;;  %v3129_v59 = vpack.c.bf16 %v3117_v51, %v3116_v26  ;;  %v3118_v57 = vmul.f32 %v7155_v38, %v9065_v31  ;;  %v338_v31 = vrot.slane %v8850_v5, %v337_v34  ;;  %v10560_v5 = vld [vmem:[#allocation20_spill] sm:$0xff]  ;;  %v10562_v34 = vld [vmem:[#allocation23_spill] sm:$0xff] }
 0x729   : > { %v7157_v41 = vpop.eup %7156  ;;  %v9135_v40 = vpop.permute.xlu0 %3792 }
 0x72a   : > { %6339 = vmatmul.mubr.bf16.gmra.mxu0 %v3129_v59  ;;  %v3119_v50 = vmul.f32 %v7157_v41, %v9067_v52  ;;  %6646 = vmatprep.subr.msk.bf16.mxu1 %vm1308_vm0, %v9135_v40 }
 0x72b   : > { %6365 = vmatpush3.bf16.xpose.msra.mxu0 %v3361_v16  ;;  %v7159_v9 = vpop.eup %7158  ;;  %v10558_v16 = vld [vmem:[#allocation16_spill] sm:$0xff] }
 0x72c   : > { %v3130_v46 = vpack.c.bf16 %v3119_v50, %v3118_v57  ;;  %v3120_v33 = vmul.f32 %v7159_v9, %v9071_v20  ;;  %v958_v19 = vadd.f32 %v10558_v16, %v338_v31  ;;  %v10559_v57 = vld [vmem:[#allocation18_spill] sm:$0xff] }
 0x72d   : > { %v7161_v21 = vpop.eup %7160  ;;  %v962_v50 = vadd.f32 %v10559_v57, %v338_v31 }
 0x72e   : > { %6342 = vmatprep.mubr.bf16.mxu0 %v3130_v46  ;;  %v3121_v7 = vmul.f32 %v7161_v21, %v9073_v14 }
 0x72f   : > { %v7163_v47 = vpop.eup %7162  ;;  %v9153_v46 = vpack.c.bf16 %v962_v50, %v958_v19  ;;  %v10568_v50 = vld [vmem:[#allocation32_spill] sm:$0xff] }
 0x730   : > { %v3131_v26 = vpack.c.bf16 %v3121_v7, %v3120_v33  ;;  %v3122_v52 = vmul.f32 %v7163_v47, %v9077_v37  ;;  %v968_v37 = vadd.f32 %v10560_v5, %v338_v31  ;;  %v978_v33 = vadd.f32 %v10562_v34, %v338_v31  ;;  %v10563_v7 = vld [vmem:[#allocation25_spill] sm:$0xff]  ;;  %v10570_v5 = vld [vmem:[#allocation38_spill] sm:$0xff] }
 0x731   : > { %v7165_v51 = vpop.eup %7164  ;;  %v982_v47 = vadd.f32 %v10563_v7, %v338_v31  ;;  %v10572_v7 = vld [vmem:[#allocation40_spill] sm:$0xff] }
 0x732   : > { %6343 = vmatmul.mubr.bf16.gmra.mxu0 %v3131_v26  ;;  %v3123_v58 = vmul.f32 %v7165_v51, %v9079_v32  ;;  %v10561_v32 = vld [vmem:[#allocation22_spill] sm:$0xff] }
 0x733   : > { %v7167_v38 = vpop.eup %7166  ;;  %v972_v21 = vadd.f32 %v10561_v32, %v338_v31  ;;  %v10571_v32 = vld [vmem:[#allocation39_spill] sm:$0xff] }
 0x734   : > { %v3132_v59 = vpack.c.bf16 %v3123_v58, %v3122_v52  ;;  %v3124_v20 = vmul.f32 %v7167_v38, %v9083_v23  ;;  %v9163_v23 = vpack.c.bf16 %v982_v47, %v978_v33  ;;  %v10565_v52 = vld [vmem:[#allocation28_spill] sm:$0xff]  ;;  %v10566_v38 = vld [vmem:[#allocation29_spill] sm:$0xff]  ;;  %v1028_v47 = vadd.f32 %v10572_v7, %v338_v31 }
 0x735   : > { %v7169_v41 = vpop.eup %7168  ;;  %v9161_v26 = vpack.c.bf16 %v972_v21, %v968_v37  ;;  %v992_v58 = vadd.f32 %v10565_v52, %v338_v31  ;;  %v1018_v37 = vadd.f32 %v10570_v5, %v338_v31  ;;  %v1022_v21 = vadd.f32 %v10571_v32, %v338_v31 }
 0x736   : > { %6346 = vmatprep.mubr.bf16.mxu0 %v3132_v59  ;;  %v3125_v14 = vmul.f32 %v7169_v41, %v9085_v44  ;;  %v10564_v44 = vld [vmem:[#allocation26_spill] sm:$0xff]  ;;  %v998_v59 = vadd.f32 %v10566_v38, %v338_v31  ;;  %v10567_v41 = vld [vmem:[#allocation31_spill] sm:$0xff] }
 0x737   : > { %v988_v51 = vadd.f32 %v10564_v44, %v338_v31  ;;  %v1002_v16 = vadd.f32 %v10567_v41, %v338_v31  ;;  %v9187_v33 = vpack.c.bf16 %v1022_v21, %v1018_v37  ;;  %v10573_v44 = vld [vmem:[#allocation41_spill] sm:$0xff] }
 0x738   : > { %v3133_v9 = vpack.c.bf16 %v3125_v14, %v3124_v20  ;;  %v1008_v20 = vadd.f32 %v10568_v50, %v338_v31  ;;  %v10569_v14 = vld [vmem:[#allocation35_spill] sm:$0xff] }
 0x739   : > { %v9173_v19 = vpack.c.bf16 %v992_v58, %v988_v51  ;;  %v9175_v57 = vpack.c.bf16 %v1002_v16, %v998_v59  ;;  %v1032_v51 = vadd.f32 %v10573_v44, %v338_v31 }
 0x73a   : > { %6347 = vmatmul.mubr.bf16.gmra.mxu0 %v3133_v9  ;;  %v1012_v9 = vadd.f32 %v10569_v14, %v338_v31 }
 0x73b   : > { %6366 = vmatprep.mubr.msk.bf16.mxu0 %vm1308_vm0, %v9153_v46  ;;  %v9195_v52 = vpack.c.bf16 %v1032_v51, %v1028_v47 }
 0x73c   : > { %v9185_v34 = vpack.c.bf16 %v1012_v9, %v1008_v20 }
 0x742   : > { %6367 = vmatmul.mubr.msk.bf16.vlgmr.msra.gmra.mxu0 %vm1308_vm0, %v9161_v26 }
 0x743   : > { %6370 = vmatprep.mubr.msk.bf16.mxu0 %vm1308_vm0, %v9163_v23 }
 0x74a   : > { %6371 = vmatmul.mubr.msk.bf16.gmra.mxu0 %vm1308_vm0, %v9173_v19 }
 0x74b   : > { %6374 = vmatprep.mubr.msk.bf16.mxu0 %vm1308_vm0, %v9175_v57 }
 0x752   : > { %6375 = vmatmul.mubr.msk.bf16.gmra.mxu0 %vm1308_vm0, %v9185_v34 }
 0x753   : > { %6378 = vmatprep.mubr.msk.bf16.mxu0 %vm1308_vm0, %v9187_v33 }
 0x75a   : > { %6379 = vmatmul.mubr.msk.bf16.gmra.mxu0 %vm1308_vm0, %v9195_v52 }
 0x7b2   : > { %v9199_v58 = vpop.f32.mrf.mxu0 }
 0x7b3   : > { %10574 = vst [vmem:[#allocation94_spill] sm:$0xff] %v9199_v58 }
 0x7b4   : > { %v9201_v38 = vpop.f32.mrf.mxu0 }
 0x7b5   : > { %10575 = vst [vmem:[#allocation79_spill] sm:$0xff] %v9201_v38 }
 0x7b6   : > { %v9203_v59 = vpop.f32.mrf.mxu0 }
 0x7b7   : > { %10576 = vst [vmem:[#allocation56_spill] sm:$0xff] %v9203_v59 }
 0x7b8   : > { %v9205_v41 = vpop.f32.mrf.mxu0 }
 0x7b9   : > { %10577 = vst [vmem:[#allocation78_spill] sm:$0xff] %v9205_v41 }
 0x7ea   : > { %v9207_v16 = vpop.f32.mrf.mxu0 }
 0x7eb   : > { %10578 = vst [vmem:[#allocation73_spill] sm:$0xff] %v9207_v16 }
 0x7ec   : > { %v9209_v50 = vpop.f32.mrf.mxu0 }
 0x7ed   : > { %10579 = vst [vmem:[#allocation76_spill] sm:$0xff] %v9209_v50 }
 0x7ee   : > { %v9211_v20 = vpop.f32.mrf.mxu0 }
 0x7ef   : > { %10580 = vst [vmem:[#allocation77_spill] sm:$0xff] %v9211_v20 }
 0x7f0   : > { %v9213_v31 = vpop.f32.mrf.mxu0 }
 0x7f1   : > { %10581 = vst [vmem:[#allocation13_spill] sm:$0xff] %v9213_v31 }
 0x7f2   : > { %v9215_v14 = vpop.f32.mrf.mxu0 }
 0x7f3   : > { %10582 = vst [vmem:[#allocation67_spill] sm:$0xff] %v9215_v14 }
 0x7f4   : > { %v9217_v9 = vpop.f32.mrf.mxu0 }
 0x7f5   : > { %10583 = vst [vmem:[#allocation82_spill] sm:$0xff] %v9217_v9 }
 0x7f6   : > { %v9219_v5 = vpop.f32.mrf.mxu0 }
 0x7f7   : > { %10584 = vst [vmem:[#allocation65_spill] sm:$0xff] %v9219_v5 }
 0x7f8   : > { %v9221_v37 = vpop.f32.mrf.mxu0 }
 0x7f9   : > { %10585 = vst [vmem:[#allocation66_spill] sm:$0xff] %v9221_v37 }
 0x7fa   : > { %v9223_v32 = vpop.f32.mrf.mxu0 }
 0x7fb   : > { %10586 = vst [vmem:[#allocation61_spill] sm:$0xff] %v9223_v32 }
 0x7fc   : > { %v9225_v21 = vpop.f32.mrf.mxu0 }
 0x7fd   : > { %10587 = vst [vmem:[#allocation63_spill] sm:$0xff] %v9225_v21 }
 0x7fe   : > { %v9227_v7 = vpop.f32.mrf.mxu0 }
 0x7ff   : > { %10588 = vst [vmem:[#allocation58_spill] sm:$0xff] %v9227_v7 }
 0x800   : > { %v9229_v47 = vpop.f32.mrf.mxu0 }
 0x801   : > { %10589 = vst [vmem:[#allocation59_spill] sm:$0xff] %v9229_v47 }
 0x802   : > { %v6368_v44 = vpop.f32.mrf.mxu0 }
 0x803   : > { %3485 = vmax.xlane.f32.xlu0 %v6368_v44 }
 0x804   : > { %v3418_v51 = vpop.f32.mrf.mxu0 }
 0x806   : > { %v6369_v20 = vpop.f32.mrf.mxu0 }
 0x807   : > { %3481 = vmax.xlane.f32.xlu0 %v3418_v51  ;;  %3487 = vmax.xlane.f32.xlu1 %v6369_v20 }
 0x808   : > { %v3421_v31 = vpop.f32.mrf.mxu0 }
 0x80a   : > { %v6372_v59 = vpop.f32.mrf.mxu0 }
 0x80b   : > { %3483 = vmax.xlane.f32.xlu1 %v3421_v31  ;;  %3493 = vmax.xlane.f32.xlu0 %v6372_v59 }
 0x80c   : > { %v3434_v5 = vpop.f32.mrf.mxu0 }
 0x80e   : > { %v9231_v37 = vpop.f32.mrf.mxu0 }
 0x80f   : > { %3489 = vmax.xlane.f32.xlu0 %v3434_v5 }
 0x810   : > { %v9233_v41 = vpop.f32.mrf.mxu0 }
 0x812   : > { %v9235_v32 = vpop.f32.mrf.mxu0 }
 0x813   : > { %3501 = vmax.xlane.f32.xlu0 %v9235_v32 }
 0x814   : > { %v9238_v7 = vpop.f32.mrf.mxu0 }
 0x816   : > { %v9240_v47 = vpop.f32.mrf.mxu0 }
 0x817   : > { %3497 = vmax.xlane.f32.xlu0 %v9238_v7 }
 0x818   : > { %v9243_v21 = vpop.f32.mrf.mxu0 }
 0x81a   : > { %v9245_v14 = vpop.f32.mrf.mxu0 }
 0x81b   : > { %3509 = vmax.xlane.f32.xlu0 %v9245_v14 }
 0x81c   : > { %3790 = vrot.lane.b32.xlu1 %v10551_v45, %s7584_s18  ;;  %v9250_v9 = vpop.f32.mrf.mxu0 }
 0x81e   : > { %v9259_v16 = vpop.f32.mrf.mxu0 }
 0x81f   : > { %3505 = vmax.xlane.f32.xlu0 %v9250_v9 }
 0x820   : > { %v9262_v50 = vpop.f32.mrf.mxu0 }
 0x835   : > { %3788 = vrot.lane.b32.xlu0 %v10552_v56, %s7584_s18 }
 0x840   : > { %3495 = vmax.xlane.f32.xlu1 %v9231_v37 }
 0x844   : > { %3491 = vmax.xlane.f32.xlu1 %v9233_v41 }
 0x848   : > { %3503 = vmax.xlane.f32.xlu1 %v9240_v47 }
 0x84c   : > { %3499 = vmax.xlane.f32.xlu1 %v9243_v21 }
 0x850   : > { %3511 = vmax.xlane.f32.xlu1 %v9259_v16 }
 0x854   : > { %3507 = vmax.xlane.f32.xlu1 %v9262_v50 }
 0x88c   : > { %v3486_v58 = vpop.xlane.xlu0 %3485 }
 0x88d   : > { %v3515_v38 = vsub.f32 %v6368_v44, %v3486_v58 }
 0x88f   : > { %v3533_v30 = vmul.f32 1.442695, %v3515_v38 }
 0x890   : > { %v3488_v63 = vpop.xlane.xlu1 %3487  ;;  %v3482_v8 = vpop.xlane.xlu0 %3481 }
 0x891   : > { %7170 = vpow2.f32 %v3533_v30  ;;  %v3516_v55 = vsub.f32 %v6369_v20, %v3488_v63  ;;  %v3513_v42 = vsub.f32 %v3418_v51, %v3482_v8 }
 0x893   : > { %v3535_v29 = vmul.f32 1.442695, %v3516_v55  ;;  %v3529_v49 = vmul.f32 1.442695, %v3513_v42 }
 0x894   : > { %v3484_v18 = vpop.xlane.xlu1 %3483  ;;  %v3494_v42 = vpop.xlane.xlu0 %3493 }
 0x895   : > { %7172 = vpow2.f32 %v3535_v29  ;;  %v3514_v61 = vsub.f32 %v3421_v31, %v3484_v18  ;;  %v3519_v8 = vsub.f32 %v6372_v59, %v3494_v42 }
 0x896   : > { %7174 = vpow2.f32 %v3529_v49 }
 0x897   : > { %v3531_v35 = vmul.f32 1.442695, %v3514_v61  ;;  %v3541_v29 = vmul.f32 1.442695, %v3519_v8 }
 0x898   : > { %v3490_v49 = vpop.xlane.xlu0 %3489 }
 0x899   : > { %7176 = vpow2.f32 %v3531_v35  ;;  %v9281_v35 = vpop.permute.xlu1 %3790  ;;  %v3517_v55 = vsub.f32 %v3434_v5, %v3490_v49 }
 0x89a   : > { %7178 = vpow2.f32 %v3541_v29 }
 0x89b   : > { %v3537_v20 = vmul.f32 1.442695, %v3517_v55 }
 0x89c   : > { %v3502_v61 = vpop.xlane.xlu0 %3501 }
 0x89d   : > { %v3523_v44 = vsub.f32 %v9235_v32, %v3502_v61  ;;  %7180 = vpow2.f32 %v3537_v20 }
 0x89e   : > { %v9265_v12 = vpop.eup %7170 }
 0x89f   : > { %3565 = vadd.xlane.f32.xlu0 %v9265_v12  ;;  %v3549_v25 = vmul.f32 1.442695, %v3523_v44 }
 0x8a0   : > { %v3498_v18 = vpop.xlane.xlu0 %3497 }
 0x8a1   : > { %v3521_v5 = vsub.f32 %v9238_v7, %v3498_v18 }
 0x8a2   : > { %v9268_v48 = vpop.eup %7172 }
 0x8a3   : > { %v9270_v58 = vpop.eup %7174  ;;  %3567 = vadd.xlane.f32.xlu1 %v9268_v48  ;;  %v3545_v32 = vmul.f32 1.442695, %v3521_v5 }
 0x8a4   : > { %3561 = vadd.xlane.f32.xlu0 %v9270_v58  ;;  %v3510_v63 = vpop.xlane.xlu0 %3509 }
 0x8a5   : > { %v3527_v2 = vsub.f32 %v9245_v14, %v3510_v63 }
 0x8a6   : > { %v9274_v30 = vpop.eup %7176 }
 0x8a7   : > { %3563 = vadd.xlane.f32.xlu1 %v9274_v30  ;;  %v3557_v8 = vmul.f32 1.442695, %v3527_v2  ;;  %v9290_v29 = vpop.eup %7178 }
 0x8a8   : > { %v3506_v42 = vpop.xlane.xlu0 %3505 }
 0x8ac   : > { %v3789_v5 = vpop.permute.xlu0 %3788 }
 0x8b8   : > { %3786 = vrot.lane.b32.xlu1 %v10553_v54, %s7584_s18 }
 0x8ba   : > { %3784 = vrot.lane.b32.xlu0 %v10554_v17, %s7584_s18 }
 0x8c9   : > { %v3496_v38 = vpop.xlane.xlu1 %3495 }
 0x8ca   : > { %v3520_v31 = vsub.f32 %v9231_v37, %v3496_v38  ;;  %v3525_v37 = vsub.f32 %v9250_v9, %v3506_v42 }
 0x8cc   : > { %v3543_v51 = vmul.f32 1.442695, %v3520_v31  ;;  %v3553_v14 = vmul.f32 1.442695, %v3525_v37 }
 0x8cd   : > { %v3492_v13 = vpop.xlane.xlu1 %3491 }
 0x8ce   : > { %v3518_v59 = vsub.f32 %v9233_v41, %v3492_v13  ;;  %7182 = vpow2.f32 %v3543_v51 }
 0x8d0   : > { %v3539_v15 = vmul.f32 1.442695, %v3518_v59 }
 0x8d1   : > { %v3504_v49 = vpop.xlane.xlu1 %3503 }
 0x8d2   : > { %7184 = vpow2.f32 %v3539_v15  ;;  %v3524_v61 = vsub.f32 %v9240_v47, %v3504_v49  ;;  %v9295_v15 = vpop.eup %7180 }
 0x8d3   : > { %7186 = vpow2.f32 %v3549_v25 }
 0x8d4   : > { %7188 = vpow2.f32 %v3557_v8  ;;  %v3551_v13 = vmul.f32 1.442695, %v3524_v61 }
 0x8d5   : > { %v3500_v55 = vpop.xlane.xlu1 %3499  ;;  %7190 = vpow2.f32 %v3545_v32 }
 0x8d6   : > { %7192 = vpow2.f32 %v3553_v14  ;;  %v3522_v2 = vsub.f32 %v9243_v21, %v3500_v55 }
 0x8d7   : > { %7194 = vpow2.f32 %v3551_v13 }
 0x8d8   : > { %v3547_v18 = vmul.f32 1.442695, %v3522_v2 }
 0x8d9   : > { %3573 = vadd.xlane.f32.xlu0 %v9290_v29  ;;  %v3512_v41 = vpop.xlane.xlu1 %3511 }
 0x8da   : > { %v3528_v9 = vsub.f32 %v9259_v16, %v3512_v41 }
 0x8db   : > { %v9298_v47 = vpop.eup %7182 }
 0x8dc   : > { %v3559_v25 = vmul.f32 1.442695, %v3528_v9  ;;  %3569 = vadd.xlane.f32.xlu1 %v9295_v15 }
 0x8dd   : > { %v3508_v7 = vpop.xlane.xlu1 %3507 }
 0x8de   : > { %7196 = vpow2.f32 %v3559_v25  ;;  %v3526_v63 = vsub.f32 %v9262_v50, %v3508_v7 }
 0x8df   : > { %v9301_v38 = vpop.eup %7184  ;;  %7198 = vpow2.f32 %v3547_v18 }
 0x8e0   : > { %3571 = vadd.xlane.f32.xlu0 %v9301_v38  ;;  %3575 = vadd.xlane.f32.xlu1 %v9298_v47  ;;  %v9305_v16 = vpop.eup %7186  ;;  %v3555_v21 = vmul.f32 1.442695, %v3526_v63  ;;  %v3840_v63 = vsel %vm1308_vm0, %v9135_v40, 0 }
 0x8e1   : > { %v9307_v20 = vpop.eup %7188 }
 0x8e2   : > { %v9311_v31 = vpop.eup %7190  ;;  %7200 = vpow2.f32 %v3555_v21 }
 0x8e3   : > { %v9313_v50 = vpop.eup %7192 }
 0x8e4   : > { %3581 = vadd.xlane.f32.xlu1 %v9305_v16  ;;  %3589 = vadd.xlane.f32.xlu0 %v9307_v20  ;;  %v9317_v44 = vpop.eup %7194 }
 0x8e8   : > { %3577 = vadd.xlane.f32.xlu1 %v9311_v31  ;;  %3585 = vadd.xlane.f32.xlu0 %v9313_v50 }
 0x8eb   : > { %v9319_v51 = vpop.eup %7196 }
 0x8ec   : > { %3583 = vadd.xlane.f32.xlu1 %v9317_v44  ;;  %3591 = vadd.xlane.f32.xlu0 %v9319_v51  ;;  %v9323_v59 = vpop.eup %7198 }
 0x8ef   : > { %v9326_v42 = vpop.eup %7200 }
 0x8f0   : > { %3579 = vadd.xlane.f32.xlu1 %v9323_v59 }
 0x8f4   : > { %3587 = vadd.xlane.f32.xlu1 %v9326_v42 }
 0x902   : > { %3780 = vrot.lane.b32.xlu0 %v10556_v11, %s7584_s18 }
 0x905   : > { %3782 = vrot.lane.b32.xlu1 %v10555_v6, %s7584_s18 }
 0x906   : > { %3778 = vrot.lane.b32.xlu0 %v10557_v24, %s7584_s18 }
 0x909   : > { %3754 = vrot.lane.b32.xlu1 %v9153_v46, %s7584_s18 }
 0x90a   : > { %3756 = vrot.lane.b32.xlu0 %v9161_v26, %s7584_s18 }
 0x90d   : > { %3758 = vrot.lane.b32.xlu1 %v9163_v23, %s7584_s18 }
 0x90e   : > { %3760 = vrot.lane.b32.xlu0 %v9173_v19, %s7584_s18 }
 0x911   : > { %3762 = vrot.lane.b32.xlu1 %v9175_v57, %s7584_s18 }
 0x912   : > { %3764 = vrot.lane.b32.xlu0 %v9185_v34, %s7584_s18 }
 0x915   : > { %3766 = vrot.lane.b32.xlu1 %v9187_v33, %s7584_s18 }
 0x916   : > { %3768 = vrot.lane.b32.xlu0 %v9195_v52, %s7584_s18 }
 0x919   : > { %4111 = vrot.lane.b32.xlu1 %v8867_v0, %s7584_s18 }
 0x91a   : > { %4113 = vrot.lane.b32.xlu0 %v8858_v3, %s7584_s18 }
 0x91e   : > { %4109 = vrot.lane.b32.xlu0 %v8875_v22, %s7584_s18 }
 0x922   : > { %4107 = vrot.lane.b32.xlu0 %v8881_v27, %s7584_s18 }
 0x926   : > { %4105 = vrot.lane.b32.xlu0 %v8889_v43, %s7584_s18 }
 0x928   : > { %v3566_v49 = vpop.xlane.xlu0 %3565 }
 0x92c   : > { %v3568_v8 = vpop.xlane.xlu1 %3567 }
 0x92d   : > { %v3562_v37 = vpop.xlane.xlu0 %3561  ;;  %7202 = vrcp.f32 %v3568_v8 }
 0x92e   : > { %7204 = vrcp.f32 %v3562_v37 }
 0x92f   : > { %7206 = vrcp.f32 %v3566_v49 }
 0x930   : > { %v3564_v32 = vpop.xlane.xlu1 %3563 }
 0x931   : > { %7208 = vrcp.f32 %v3564_v32  ;;  %v3785_v21 = vpop.permute.xlu0 %3784 }
 0x932   : > { %v3828_v40 = vsel %vm1308_vm0, %v3785_v21, 0 }
 0x93a   : > { %v7203_v61 = vpop.eup %7202 }
 0x93b   : > { %v7205_v55 = vpop.eup %7204  ;;  %v3612_v41 = vmul.f32 %v7203_v61, %v9268_v48  ;;  %v3837_v48 = vsel %vm1308_vm0, %v9281_v35, 0 }
 0x93c   : > { %v7207_v14 = vpop.eup %7206  ;;  %v3609_v2 = vmul.f32 %v7205_v55, %v9270_v58  ;;  %v3834_v58 = vsel %vm1308_vm0, %v3789_v5, 0 }
 0x93d   : > { %v3611_v25 = vmul.f32 %v7207_v14, %v9265_v12  ;;  %v3787_v12 = vpop.permute.xlu1 %3786 }
 0x93e   : > { %v7209_v13 = vpop.eup %7208 }
 0x93f   : > { %v3610_v9 = vmul.f32 %v7209_v13, %v9274_v30  ;;  %v3626_v18 = vpack.c.bf16 %v3612_v41, %v3611_v25  ;;  %v3831_v30 = vsel %vm1308_vm0, %v3787_v12, 0 }
 0x941   : > { %v3625_v7 = vpack.c.bf16 %v3610_v9, %v3609_v2 }
 0x943   : > { %6398 = vmatprep.mubr.bf16.mxu1 %v3625_v7 }
 0x944   : > { %6399 = vmatmul.mubr.bf16.vlgmr.msra.gmra.mxu1 %v3626_v18 }
 0x945   : > { %6415 = vmatpush3.bf16.xpose.msra.mxu1 %v3840_v63 }
 0x946   : > { %6647 = vmatprep.subr.msk.bf16.mxu1 %vm1308_vm0, %v9281_v35 }
 0x94d   : > { %6417 = vmatpush3.bf16.xpose.msra.mxu1 %v3837_v48 }
 0x94e   : > { %6648 = vmatprep.subr.msk.bf16.mxu1 %vm1308_vm0, %v3789_v5 }
 0x955   : > { %6419 = vmatpush3.bf16.xpose.msra.mxu1 %v3834_v58 }
 0x956   : > { %6649 = vmatprep.subr.msk.bf16.mxu1 %vm1308_vm0, %v3787_v12 }
 0x95d   : > { %6421 = vmatpush3.bf16.xpose.msra.mxu1 %v3831_v30 }
 0x95e   : > { %6650 = vmatprep.subr.msk.bf16.mxu1 %vm1308_vm0, %v3785_v21 }
 0x962   : > { %v3574_v49 = vpop.xlane.xlu0 %3573 }
 0x963   : > { %7210 = vrcp.f32 %v3574_v49 }
 0x965   : > { %6423 = vmatpush3.bf16.xpose.msra.mxu1 %v3828_v40  ;;  %v3570_v35 = vpop.xlane.xlu1 %3569 }
 0x966   : > { %7212 = vrcp.f32 %v3570_v35 }
 0x969   : > { %v3576_v8 = vpop.xlane.xlu1 %3575  ;;  %v3572_v37 = vpop.xlane.xlu0 %3571 }
 0x96a   : > { %7214 = vrcp.f32 %v3576_v8 }
 0x96b   : > { %7216 = vrcp.f32 %v3572_v37 }
 0x96d   : > { %v3582_v5 = vpop.xlane.xlu1 %3581  ;;  %v3590_v32 = vpop.xlane.xlu0 %3589 }
 0x970   : > { %v7211_v14 = vpop.eup %7210 }
 0x971   : > { %v3578_v61 = vpop.xlane.xlu1 %3577  ;;  %v3586_v55 = vpop.xlane.xlu0 %3585  ;;  %v3615_v7 = vmul.f32 %v7211_v14, %v9290_v29 }
 0x973   : > { %v7213_v2 = vpop.eup %7212 }
 0x974   : > { %v3613_v58 = vmul.f32 %v7213_v2, %v9295_v15 }
 0x975   : > { %v3584_v13 = vpop.xlane.xlu1 %3583  ;;  %v3592_v41 = vpop.xlane.xlu0 %3591 }
 0x976   : > { %7218 = vrcp.f32 %v3584_v13 }
 0x977   : > { %v7215_v9 = vpop.eup %7214  ;;  %7220 = vrcp.f32 %v3578_v61 }
 0x978   : > { %v7217_v25 = vpop.eup %7216  ;;  %v3616_v18 = vmul.f32 %v7215_v9, %v9298_v47  ;;  %7222 = vrcp.f32 %v3582_v5 }
 0x979   : > { %v3580_v63 = vpop.xlane.xlu1 %3579  ;;  %v3781_v48 = vpop.permute.xlu0 %3780  ;;  %v3614_v12 = vmul.f32 %v7217_v25, %v9301_v38 }
 0x97a   : > { %7224 = vrcp.f32 %v3580_v63  ;;  %v3628_v30 = vpack.c.bf16 %v3616_v18, %v3615_v7  ;;  %v3822_v25 = vsel %vm1308_vm0, %v3781_v48, 0 }
 0x97b   : > { %v3627_v21 = vpack.c.bf16 %v3614_v12, %v3613_v58  ;;  %7226 = vrcp.f32 %v3586_v55 }
 0x97d   : > { %6402 = vmatprep.mubr.bf16.mxu1 %v3627_v21  ;;  %v3588_v40 = vpop.xlane.xlu1 %3587  ;;  %v3779_v49 = vpop.permute.xlu0 %3778 }
 0x97e   : > { %7228 = vrcp.f32 %v3588_v40  ;;  %6403 = vmatmul.mubr.bf16.gmra.mxu1 %v3628_v30 }
 0x97f   : > { %7230 = vrcp.f32 %v3592_v41 }
 0x980   : > { %7232 = vrcp.f32 %v3590_v32 }
 0x981   : > { %v3783_v29 = vpop.permute.xlu1 %3782  ;;  %v3757_v47 = vpop.permute.xlu0 %3756 }
 0x982   : > { %6651 = vmatprep.subr.msk.bf16.mxu1 %vm1308_vm0, %v3783_v29  ;;  %v3825_v35 = vsel %vm1308_vm0, %v3783_v29, 0 }
 0x983   : > { %6425 = vmatpush3.bf16.xpose.msra.mxu1 %v3825_v35  ;;  %v7219_v15 = vpop.eup %7218  ;;  %v3819_v35 = vsel %vm1308_vm0, %v3779_v49, 0 }
 0x984   : > { %6652 = vmatprep.subr.msk.bf16.mxu1 %vm1308_vm0, %v3781_v48  ;;  %v7221_v38 = vpop.eup %7220  ;;  %v3620_v55 = vmul.f32 %v7219_v15, %v9317_v44 }
 0x985   : > { %v3755_v8 = vpop.permute.xlu1 %3754  ;;  %v3761_v37 = vpop.permute.xlu0 %3760  ;;  %v3617_v14 = vmul.f32 %v7221_v38, %v9311_v31 }
 0x986   : > { %v7223_v5 = vpop.eup %7222 }
 0x987   : > { %v7225_v61 = vpop.eup %7224  ;;  %v3619_v9 = vmul.f32 %v7223_v5, %v9305_v16 }
 0x988   : > { %v3618_v32 = vmul.f32 %v7225_v61, %v9323_v59  ;;  %v7227_v13 = vpop.eup %7226 }
 0x989   : > { %v3759_v41 = vpop.permute.xlu1 %3758  ;;  %v3765_v2 = vpop.permute.xlu0 %3764  ;;  %v3630_v63 = vpack.c.bf16 %v3620_v55, %v3619_v9  ;;  %v3621_v44 = vmul.f32 %v7227_v13, %v9313_v50 }
 0x98a   : > { %v3629_v7 = vpack.c.bf16 %v3618_v32, %v3617_v14 }
 0x98b   : > { %v7229_v18 = vpop.eup %7228  ;;  %6427 = vmatpush3.bf16.xpose.msra.mxu1 %v3822_v25 }
 0x98c   : > { %v7231_v58 = vpop.eup %7230  ;;  %6406 = vmatprep.mubr.bf16.mxu1 %v3629_v7  ;;  %6653 = vmatprep.subr.msk.bf16.mxu1 %vm1308_vm0, %v3779_v49  ;;  %v3622_v31 = vmul.f32 %v7229_v18, %v9326_v42 }
 0x98d   : > { %v3763_v59 = vpop.permute.xlu1 %3762  ;;  %6407 = vmatmul.mubr.bf16.gmra.mxu1 %v3630_v63  ;;  %v3769_v12 = vpop.permute.xlu0 %3768  ;;  %v3624_v16 = vmul.f32 %v7231_v58, %v9319_v51 }
 0x98e   : > { %v7233_v30 = vpop.eup %7232  ;;  %v3631_v21 = vpack.c.bf16 %v3622_v31, %v3621_v44 }
 0x98f   : > { %v3623_v29 = vmul.f32 %v7233_v30, %v9307_v20 }
 0x990   : > { %6410 = vmatprep.mubr.bf16.mxu1 %v3631_v21 }
 0x991   : > { %v3767_v48 = vpop.permute.xlu1 %3766  ;;  %v4114_v40 = vpop.permute.xlu0 %4113  ;;  %v3632_v50 = vpack.c.bf16 %v3624_v16, %v3623_v29 }
 0x992   : > { %6446 = vmatprep.subr.bf16.mxu0 %v4114_v40 }
 0x993   : > { %6429 = vmatpush3.bf16.xpose.msra.mxu1 %v3819_v35  ;;  %6447 = vmatpush3.bf16.msra.mxu0 %v4114_v40 }
 0x995   : > { %v4112_v15 = vpop.permute.xlu1 %4111  ;;  %6411 = vmatmul.mubr.bf16.gmra.mxu1 %v3632_v50  ;;  %v4110_v42 = vpop.permute.xlu0 %4109 }
 0x996   : > { %6430 = vmatprep.mubr.msk.bf16.mxu1 %vm1308_vm0, %v3755_v8  ;;  %6448 = vmatprep.subr.bf16.mxu0 %v4112_v15 }
 0x997   : > { %6449 = vmatpush3.bf16.msra.mxu0 %v4112_v15 }
 0x998   : > { %6450 = vmatprep.subr.bf16.mxu0 %v4110_v42 }
 0x999   : > { %v4108_v51 = vpop.permute.xlu0 %4107 }
 0x99b   : > { %6451 = vmatpush3.bf16.msra.mxu0 %v4110_v42 }
 0x99c   : > { %6452 = vmatprep.subr.bf16.mxu0 %v4108_v51 }
 0x99d   : > { %6431 = vmatmul.mubr.msk.bf16.vlgmr.msra.gmra.mxu1 %vm1308_vm0, %v3757_v47  ;;  %v4106_v20 = vpop.permute.xlu0 %4105 }
 0x99e   : > { %6434 = vmatprep.mubr.msk.bf16.mxu1 %vm1308_vm0, %v3759_v41 }
 0x99f   : > { %6453 = vmatpush3.bf16.msra.mxu0 %v4108_v51 }
 0x9a0   : > { %6454 = vmatprep.subr.bf16.mxu0 %v4106_v20 }
 0x9a3   : > { %6455 = vmatpush3.bf16.msra.mxu0 %v4106_v20 }
 0x9a5   : > { %6435 = vmatmul.mubr.msk.bf16.gmra.mxu1 %vm1308_vm0, %v3761_v37 }
 0x9a6   : > { %6438 = vmatprep.mubr.msk.bf16.mxu1 %vm1308_vm0, %v3763_v59 }
 0x9ad   : > { %6439 = vmatmul.mubr.msk.bf16.gmra.mxu1 %vm1308_vm0, %v3765_v2 }
 0x9ae   : > { %6442 = vmatprep.mubr.msk.bf16.mxu1 %vm1308_vm0, %v3767_v48 }
 0x9b5   : > { %6443 = vmatmul.mubr.msk.bf16.gmra.mxu1 %vm1308_vm0, %v3769_v12 }
 0xa04   : > { %v6400_v49 = vpop.f32.mrf.mxu1 }
 0xa05   : > { %3732 = vst.msk [vmem:[#allocation2 + $0x28] sm:$0xff] %vm1308_vm0, %v6400_v49 }
 0xa06   : > { %v3667_v47 = vpop.f32.mrf.mxu1 }
 0xa07   : > { %3730 = vst.msk [vmem:[#allocation2 + $0x8] sm:$0xff] %vm1308_vm0, %v3667_v47 }
 0xa08   : > { %v6401_v38 = vpop.f32.mrf.mxu1 }
 0xa09   : > { %3733 = vst.msk [vmem:[#allocation2 + $0x38] sm:$0xff] %vm1308_vm0, %v6401_v38 }
 0xa0a   : > { %v3670_v8 = vpop.f32.mrf.mxu1 }
 0xa0b   : > { %3731 = vst.msk [vmem:[#allocation2 + $0x18] sm:$0xff] %vm1308_vm0, %v3670_v8 }
 0xa3e   : > { %v6404_v37 = vpop.f32.mrf.mxu1 }
 0xa3f   : > { %3736 = vst.msk [vmem:[#allocation2 + $0x68] sm:$0xff] %vm1308_vm0, %v6404_v37 }
 0xa40   : > { %v3683_v5 = vpop.f32.mrf.mxu1 }
 0xa41   : > { %3734 = vst.msk [vmem:[#allocation2 + $0x48] sm:$0xff] %vm1308_vm0, %v3683_v5 }
 0xa42   : > { %v6405_v61 = vpop.f32.mrf.mxu1 }
 0xa43   : > { %3737 = vst.msk [vmem:[#allocation2 + $0x78] sm:$0xff] %vm1308_vm0, %v6405_v61 }
 0xa44   : > { %v3686_v55 = vpop.f32.mrf.mxu1 }
 0xa45   : > { %3735 = vst.msk [vmem:[#allocation2 + $0x58] sm:$0xff] %vm1308_vm0, %v3686_v55 }
 0xa4d   : > { %v6408_v14 = vpop.f32.mrf.mxu1 }
 0xa4e   : > { %3740 = vst.msk [vmem:[#allocation2 + $0xa8] sm:$0xff] %vm1308_vm0, %v6408_v14 }
 0xa4f   : > { %v3699_v32 = vpop.f32.mrf.mxu1 }
 0xa50   : > { %3738 = vst.msk [vmem:[#allocation2 + $0x88] sm:$0xff] %vm1308_vm0, %v3699_v32 }
 0xa51   : > { %v6409_v13 = vpop.f32.mrf.mxu1 }
 0xa52   : > { %3741 = vst.msk [vmem:[#allocation2 + $0xb8] sm:$0xff] %vm1308_vm0, %v6409_v13 }
 0xa53   : > { %v3702_v41 = vpop.f32.mrf.mxu1 }
 0xa54   : > { %3739 = vst.msk [vmem:[#allocation2 + $0x98] sm:$0xff] %vm1308_vm0, %v3702_v41 }
 0xa55   : > { %v6412_v2 = vpop.f32.mrf.mxu1 }
 0xa56   : > { %3744 = vst.msk [vmem:[#allocation2 + $0xe8] sm:$0xff] %vm1308_vm0, %v6412_v2 }
 0xa57   : > { %v3715_v9 = vpop.f32.mrf.mxu1 }
 0xa58   : > { %3742 = vst.msk [vmem:[#allocation2 + $0xc8] sm:$0xff] %vm1308_vm0, %v3715_v9 }
 0xa59   : > { %v6413_v25 = vpop.f32.mrf.mxu1 }
 0xa5a   : > { %3745 = vst.msk [vmem:[#allocation2 + $0xf8] sm:$0xff] %vm1308_vm0, %v6413_v25 }
 0xa5b   : > { %v3718_v7 = vpop.f32.mrf.mxu1 }
 0xa5c   : > { %3743 = vst.msk [vmem:[#allocation2 + $0xd8] sm:$0xff] %vm1308_vm0, %v3718_v7 }
 0xa5d   : > { %v6432_v18 = vpop.f32.mrf.mxu1 }
 0xa5e   : > { %3943 = vmax.xlane.f32.xlu0 %v6432_v18 }
 0xa5f   : > { %v3876_v63 = vpop.f32.mrf.mxu1 }
 0xa60   : > { %3939 = vmax.xlane.f32.xlu1 %v3876_v63 }
 0xa61   : > { %v6433_v58 = vpop.f32.mrf.mxu1 }
 0xa63   : > { %v3879_v44 = vpop.f32.mrf.mxu1 }
 0xa64   : > { %3945 = vmax.xlane.f32.xlu1 %v6433_v58  ;;  %3941 = vmax.xlane.f32.xlu0 %v3879_v44 }
 0xa65   : > { %v9423_v31 = vpop.f32.mrf.mxu1 }
 0xa67   : > { %v9425_v59 = vpop.f32.mrf.mxu1 }
 0xa69   : > { %v9427_v12 = vpop.f32.mrf.mxu1 }
 0xa6b   : > { %v9429_v30 = vpop.f32.mrf.mxu1 }
 0xa6d   : > { %v9431_v21 = vpop.f32.mrf.mxu1 }
 0xa6f   : > { %v9435_v16 = vpop.f32.mrf.mxu1 }
 0xa71   : > { %v9439_v48 = vpop.f32.mrf.mxu1 }
 0xa73   : > { %v9443_v40 = vpop.f32.mrf.mxu1 }
 0xa75   : > { %4101 = vrot.lane.b32.xlu1 %v8903_v10, %s7584_s18  ;;  %v9447_v29 = vpop.f32.mrf.mxu1 }
 0xa77   : > { %v9450_v35 = vpop.f32.mrf.mxu1 }
 0xa79   : > { %v9463_v50 = vpop.f32.mrf.mxu1 }
 0xa7a   : > { %4103 = vrot.lane.b32.xlu0 %v8895_v36, %s7584_s18 }
 0xa7b   : > { %v9466_v15 = vpop.f32.mrf.mxu1 }
 0xa99   : > { %3951 = vmax.xlane.f32.xlu0 %v9423_v31  ;;  %3953 = vmax.xlane.f32.xlu1 %v9427_v12 }
 0xa9d   : > { %3947 = vmax.xlane.f32.xlu0 %v9425_v59  ;;  %3949 = vmax.xlane.f32.xlu1 %v9429_v30 }
 0xaa1   : > { %3959 = vmax.xlane.f32.xlu0 %v9431_v21  ;;  %3961 = vmax.xlane.f32.xlu1 %v9439_v48 }
 0xaa5   : > { %3955 = vmax.xlane.f32.xlu0 %v9435_v16  ;;  %3957 = vmax.xlane.f32.xlu1 %v9443_v40 }
 0xaa9   : > { %3967 = vmax.xlane.f32.xlu0 %v9447_v29 }
 0xaad   : > { %3963 = vmax.xlane.f32.xlu0 %v9450_v35 }
 0xab6   : > { %4330 = vrot.lane.b32.xlu1 %v9093_v39, %s7585_s20 }
 0xac3   : > { %4099 = vrot.lane.b32.xlu0 %v8907_v1, %s7584_s18 }
 0xac7   : > { %4328 = vrot.lane.b32.xlu0 %v10551_v45, %s7585_s20 }
 0xacb   : > { %4326 = vrot.lane.b32.xlu0 %v10552_v56, %s7585_s20 }
 0xacf   : > { %4322 = vrot.lane.b32.xlu0 %v10554_v17, %s7585_s20 }
 0xada   : > { %3969 = vmax.xlane.f32.xlu1 %v9463_v50 }
 0xade   : > { %3965 = vmax.xlane.f32.xlu1 %v9466_v15 }
 0xae7   : > { %v3944_v42 = vpop.xlane.xlu0 %3943 }
 0xae8   : > { %v3973_v51 = vsub.f32 %v6432_v18, %v3944_v42 }
 0xae9   : > { %v3940_v20 = vpop.xlane.xlu1 %3939 }
 0xaea   : > { %v3991_v49 = vmul.f32 1.442695, %v3973_v51  ;;  %v3971_v47 = vsub.f32 %v3876_v63, %v3940_v20 }
 0xaec   : > { %7234 = vpow2.f32 %v3991_v49  ;;  %v3987_v38 = vmul.f32 1.442695, %v3971_v47 }
 0xaed   : > { %v3946_v8 = vpop.xlane.xlu1 %3945  ;;  %v3942_v37 = vpop.xlane.xlu0 %3941 }
 0xaee   : > { %v3974_v5 = vsub.f32 %v6433_v58, %v3946_v8  ;;  %7236 = vpow2.f32 %v3987_v38  ;;  %v3972_v55 = vsub.f32 %v3879_v44, %v3942_v37 }
 0xaf0   : > { %v3993_v61 = vmul.f32 1.442695, %v3974_v5  ;;  %v3989_v13 = vmul.f32 1.442695, %v3972_v55 }
 0xaf1   : > { %v4104_v14 = vpop.permute.xlu0 %4103  ;;  %v4102_v32 = vpop.permute.xlu1 %4101 }
 0xaf2   : > { %6456 = vmatprep.subr.bf16.mxu0 %v4104_v14  ;;  %7238 = vpow2.f32 %v3993_v61 }
 0xaf3   : > { %6457 = vmatpush3.bf16.msra.mxu0 %v4104_v14  ;;  %7240 = vpow2.f32 %v3989_v13 }
 0xaf4   : > { %6458 = vmatprep.subr.bf16.mxu0 %v4102_v32 }
 0xaf7   : > { %6459 = vmatpush3.bf16.msra.mxu0 %v4102_v32 }
 0xaf9   : > { %v9469_v41 = vpop.eup %7234 }
 0xafa   : > { %4023 = vadd.xlane.f32.xlu1 %v9469_v41 }
 0xafb   : > { %v9472_v2 = vpop.eup %7236 }
 0xafe   : > { %4019 = vadd.xlane.f32.xlu1 %v9472_v2 }
 0xaff   : > { %v9475_v9 = vpop.eup %7238 }
 0xb00   : > { %v9478_v25 = vpop.eup %7240 }
 0xb02   : > { %4025 = vadd.xlane.f32.xlu1 %v9475_v9 }
 0xb06   : > { %4021 = vadd.xlane.f32.xlu1 %v9478_v25 }
 0xb17   : > { %4324 = vrot.lane.b32.xlu1 %v10553_v54, %s7585_s20 }
 0xb22   : > { %v3954_v7 = vpop.xlane.xlu1 %3953  ;;  %v3952_v18 = vpop.xlane.xlu0 %3951 }
 0xb23   : > { %v3977_v63 = vsub.f32 %v9423_v31, %v3952_v18  ;;  %v3978_v49 = vsub.f32 %v9427_v12, %v3954_v7 }
 0xb25   : > { %v3999_v58 = vmul.f32 1.442695, %v3977_v63  ;;  %v4001_v37 = vmul.f32 1.442695, %v3978_v49 }
 0xb26   : > { %v3950_v44 = vpop.xlane.xlu1 %3949  ;;  %v3948_v42 = vpop.xlane.xlu0 %3947 }
 0xb27   : > { %v3976_v51 = vsub.f32 %v9429_v30, %v3950_v44  ;;  %v3975_v20 = vsub.f32 %v9425_v59, %v3948_v42  ;;  %7242 = vpow2.f32 %v3999_v58 }
 0xb29   : > { %v3997_v47 = vmul.f32 1.442695, %v3976_v51  ;;  %v3995_v38 = vmul.f32 1.442695, %v3975_v20 }
 0xb2a   : > { %v3960_v8 = vpop.xlane.xlu0 %3959  ;;  %v3962_v31 = vpop.xlane.xlu1 %3961 }
 0xb2b   : > { %7244 = vpow2.f32 %v3997_v47  ;;  %v3981_v5 = vsub.f32 %v9431_v21, %v3960_v8  ;;  %v3982_v12 = vsub.f32 %v9439_v48, %v3962_v31 }
 0xb2c   : > { %7246 = vpow2.f32 %v3995_v38 }
 0xb2d   : > { %7248 = vpow2.f32 %v4001_v37  ;;  %v4007_v55 = vmul.f32 1.442695, %v3981_v5 }
 0xb2e   : > { %v3956_v61 = vpop.xlane.xlu0 %3955  ;;  %v3958_v18 = vpop.xlane.xlu1 %3957 }
 0xb2f   : > { %v3979_v14 = vsub.f32 %v9435_v16, %v3956_v61  ;;  %7250 = vpow2.f32 %v4007_v55  ;;  %v4009_v16 = vmul.f32 1.442695, %v3982_v12  ;;  %v3980_v44 = vsub.f32 %v9443_v40, %v3958_v18 }
 0xb31   : > { %v4003_v13 = vmul.f32 1.442695, %v3979_v14 }
 0xb32   : > { %v3968_v30 = vpop.xlane.xlu0 %3967  ;;  %v9502_v51 = vpop.permute.xlu1 %4330 }
 0xb33   : > { %v3985_v59 = vsub.f32 %v9447_v29, %v3968_v30 }
 0xb34   : > { %v9490_v32 = vpop.eup %7242 }
 0xb35   : > { %v4015_v7 = vmul.f32 1.442695, %v3985_v59  ;;  %4031 = vadd.xlane.f32.xlu0 %v9490_v32 }
 0xb36   : > { %v3964_v21 = vpop.xlane.xlu0 %3963 }
 0xb37   : > { %7252 = vpow2.f32 %v4015_v7  ;;  %v3983_v63 = vsub.f32 %v9450_v35, %v3964_v21  ;;  %v4005_v35 = vmul.f32 1.442695, %v3980_v44 }
 0xb38   : > { %v9495_v58 = vpop.eup %7244  ;;  %7254 = vpow2.f32 %v4003_v13 }
 0xb39   : > { %v4011_v29 = vmul.f32 1.442695, %v3983_v63  ;;  %v9498_v42 = vpop.eup %7246  ;;  %4029 = vadd.xlane.f32.xlu0 %v9495_v58 }
 0xb3a   : > { %v4100_v48 = vpop.permute.xlu0 %4099  ;;  %v9506_v40 = vpop.eup %7248 }
 0xb3b   : > { %7256 = vpow2.f32 %v4011_v29  ;;  %4027 = vadd.xlane.f32.xlu1 %v9498_v42  ;;  %6460 = vmatprep.subr.bf16.mxu0 %v4100_v48 }
 0xb3c   : > { %6461 = vmatpush3.bf16.msra.mxu0 %v4100_v48  ;;  %7258 = vpow2.f32 %v4009_v16  ;;  %v9509_v20 = vpop.eup %7250 }
 0xb3d   : > { %6654 = vmatprep.subr.msk.bf16.mxu0 %vm1308_vm0, %v9502_v51  ;;  %7260 = vpow2.f32 %v4005_v35 }
 0xb3f   : > { %4033 = vadd.xlane.f32.xlu1 %v9506_v40 }
 0xb43   : > { %4039 = vadd.xlane.f32.xlu1 %v9509_v20 }
 0xb44   : > { %v9512_v49 = vpop.eup %7252 }
 0xb45   : > { %4047 = vadd.xlane.f32.xlu0 %v9512_v49  ;;  %v9515_v47 = vpop.eup %7254 }
 0xb47   : > { %4035 = vadd.xlane.f32.xlu1 %v9515_v47 }
 0xb48   : > { %v9518_v38 = vpop.eup %7256 }
 0xb49   : > { %4043 = vadd.xlane.f32.xlu0 %v9518_v38  ;;  %v9521_v8 = vpop.eup %7258 }
 0xb4a   : > { %v9524_v37 = vpop.eup %7260 }
 0xb4b   : > { %4041 = vadd.xlane.f32.xlu1 %v9521_v8 }
 0xb4f   : > { %4037 = vadd.xlane.f32.xlu1 %v9524_v37 }
 0xb63   : > { %v3970_v5 = vpop.xlane.xlu1 %3969 }
 0xb64   : > { %v3986_v61 = vsub.f32 %v9463_v50, %v3970_v5 }
 0xb66   : > { %v4017_v31 = vmul.f32 1.442695, %v3986_v61 }
 0xb67   : > { %v3966_v55 = vpop.xlane.xlu1 %3965 }
 0xb68   : > { %7262 = vpow2.f32 %v4017_v31  ;;  %v3984_v14 = vsub.f32 %v9466_v15, %v3966_v55  ;;  %v4378_v31 = vsel %vm1308_vm0, %v9502_v51, 0 }
 0xb6a   : > { %v4013_v30 = vmul.f32 1.442695, %v3984_v14 }
 0xb6c   : > { %7264 = vpow2.f32 %v4013_v30 }
 0xb75   : > { %v9529_v59 = vpop.eup %7262 }
 0xb76   : > { %4049 = vadd.xlane.f32.xlu0 %v9529_v59 }
 0xb79   : > { %v9532_v12 = vpop.eup %7264 }
 0xb7a   : > { %4045 = vadd.xlane.f32.xlu1 %v9532_v12 }
 0xb83   : > { %v4024_v13 = vpop.xlane.xlu1 %4023 }
 0xb87   : > { %v4020_v7 = vpop.xlane.xlu1 %4019 }
 0xb8b   : > { %v4026_v18 = vpop.xlane.xlu1 %4025  ;;  %4320 = vrot.lane.b32.xlu1 %v10555_v6, %s7585_s20 }
 0xb8c   : > { %4318 = vrot.lane.b32.xlu0 %v10556_v11, %s7585_s20  ;;  %7266 = vrcp.f32 %v4026_v18 }
 0xb8d   : > { %7268 = vrcp.f32 %v4020_v7 }
 0xb8e   : > { %7270 = vrcp.f32 %v4024_v13 }
 0xb8f   : > { %v4022_v50 = vpop.xlane.xlu1 %4021  ;;  %4300 = vrot.lane.b32.xlu1 %v9153_v46, %s7585_s20 }
 0xb90   : > { %7272 = vrcp.f32 %v4022_v50  ;;  %4316 = vrot.lane.b32.xlu0 %v10557_v24, %s7585_s20 }
 0xb93   : > { %4304 = vrot.lane.b32.xlu1 %v9163_v23, %s7585_s20  ;;  %v4325_v51 = vpop.permute.xlu1 %4324 }
 0xb94   : > { %4302 = vrot.lane.b32.xlu0 %v9161_v26, %s7585_s20  ;;  %v4369_v14 = vsel %vm1308_vm0, %v4325_v51, 0 }
 0xb97   : > { %4308 = vrot.lane.b32.xlu1 %v9175_v57, %s7585_s20 }
 0xb98   : > { %4306 = vrot.lane.b32.xlu0 %v9173_v19, %s7585_s20 }
 0xb99   : > { %v7267_v15 = vpop.eup %7266 }
 0xb9a   : > { %v7269_v21 = vpop.eup %7268  ;;  %v4070_v44 = vmul.f32 %v7267_v15, %v9475_v9  ;;  %v4329_v9 = vpop.permute.xlu0 %4328 }
 0xb9b   : > { %4312 = vrot.lane.b32.xlu1 %v9187_v33, %s7585_s20  ;;  %v7271_v63 = vpop.eup %7270  ;;  %v4067_v29 = vmul.f32 %v7269_v21, %v9472_v2 }
 0xb9c   : > { %4310 = vrot.lane.b32.xlu0 %v9185_v34, %s7585_s20  ;;  %v4069_v35 = vmul.f32 %v7271_v63, %v9469_v41  ;;  %v4375_v41 = vsel %vm1308_vm0, %v4329_v9, 0 }
 0xb9d   : > { %v7273_v16 = vpop.eup %7272 }
 0xb9e   : > { %v4068_v48 = vmul.f32 %v7273_v16, %v9478_v25  ;;  %v4084_v61 = vpack.c.bf16 %v4070_v44, %v4069_v35  ;;  %v4327_v2 = vpop.permute.xlu0 %4326 }
 0xb9f   : > { %4641 = vrot.lane.b32.xlu1 %v8867_v0, %s7585_s20  ;;  %v4372_v25 = vsel %vm1308_vm0, %v4327_v2, 0 }
 0xba0   : > { %4314 = vrot.lane.b32.xlu0 %v9195_v52, %s7585_s20  ;;  %v4083_v5 = vpack.c.bf16 %v4068_v48, %v4067_v29 }
 0xba2   : > { %6462 = vmatprep.mubr.bf16.mxu0 %v4083_v5  ;;  %v4323_v55 = vpop.permute.xlu0 %4322 }
 0xba3   : > { %6463 = vmatmul.mubr.bf16.vlgmr.msra.gmra.mxu0 %v4084_v61  ;;  %v4366_v7 = vsel %vm1308_vm0, %v4323_v55, 0 }
 0xba4   : > { %6479 = vmatpush3.bf16.xpose.msra.mxu0 %v4378_v31  ;;  %4643 = vrot.lane.b32.xlu0 %v8858_v3, %s7585_s20 }
 0xba5   : > { %6655 = vmatprep.subr.msk.bf16.mxu0 %vm1308_vm0, %v4329_v9 }
 0xba8   : > { %4639 = vrot.lane.b32.xlu0 %v8875_v22, %s7585_s20 }
 0xbac   : > { %6481 = vmatpush3.bf16.xpose.msra.mxu0 %v4375_v41  ;;  %4637 = vrot.lane.b32.xlu0 %v8881_v27, %s7585_s20 }
 0xbad   : > { %6656 = vmatprep.subr.msk.bf16.mxu0 %vm1308_vm0, %v4327_v2 }
 0xbb0   : > { %4635 = vrot.lane.b32.xlu0 %v8889_v43, %s7585_s20 }
 0xbb4   : > { %6483 = vmatpush3.bf16.xpose.msra.mxu0 %v4372_v25 }
 0xbb5   : > { %6657 = vmatprep.subr.msk.bf16.mxu0 %vm1308_vm0, %v4325_v51 }
 0xbbc   : > { %6485 = vmatpush3.bf16.xpose.msra.mxu0 %v4369_v14 }
 0xbbd   : > { %6658 = vmatprep.subr.msk.bf16.mxu0 %vm1308_vm0, %v4323_v55 }
 0xbbe   : > { %v4032_v30 = vpop.xlane.xlu0 %4031 }
 0xbc2   : > { %v4030_v13 = vpop.xlane.xlu0 %4029 }
 0xbc3   : > { %7274 = vrcp.f32 %v4030_v13 }
 0xbc4   : > { %6487 = vmatpush3.bf16.xpose.msra.mxu0 %v4366_v7  ;;  %v4028_v18 = vpop.xlane.xlu1 %4027 }
 0xbc5   : > { %7276 = vrcp.f32 %v4028_v18 }
 0xbc6   : > { %7278 = vrcp.f32 %v4032_v30 }
 0xbc8   : > { %v4034_v50 = vpop.xlane.xlu1 %4033 }
 0xbc9   : > { %7280 = vrcp.f32 %v4034_v50 }
 0xbcc   : > { %v4040_v15 = vpop.xlane.xlu1 %4039 }
 0xbd0   : > { %v4036_v21 = vpop.xlane.xlu1 %4035  ;;  %v7275_v63 = vpop.eup %7274 }
 0xbd1   : > { %v4072_v29 = vmul.f32 %v7275_v63, %v9495_v58 }
 0xbd2   : > { %v7277_v16 = vpop.eup %7276 }
 0xbd3   : > { %v4071_v44 = vmul.f32 %v7277_v16, %v9498_v42  ;;  %v7279_v48 = vpop.eup %7278 }
 0xbd4   : > { %v4042_v35 = vpop.xlane.xlu1 %4041  ;;  %v4073_v31 = vmul.f32 %v7279_v48, %v9490_v32 }
 0xbd5   : > { %v4085_v5 = vpack.c.bf16 %v4072_v29, %v4071_v44  ;;  %7282 = vrcp.f32 %v4042_v35 }
 0xbd6   : > { %v7281_v61 = vpop.eup %7280  ;;  %7284 = vrcp.f32 %v4036_v21 }
 0xbd7   : > { %6466 = vmatprep.mubr.bf16.mxu0 %v4085_v5  ;;  %v4074_v9 = vmul.f32 %v7281_v61, %v9506_v40  ;;  %7286 = vrcp.f32 %v4040_v15  ;;  %v4048_v40 = vpop.xlane.xlu0 %4047 }
 0xbd8   : > { %v4038_v41 = vpop.xlane.xlu1 %4037 }
 0xbd9   : > { %7288 = vrcp.f32 %v4038_v41  ;;  %v4086_v2 = vpack.c.bf16 %v4074_v9, %v4073_v31 }
 0xbdb   : > { %6467 = vmatmul.mubr.bf16.gmra.mxu0 %v4086_v2  ;;  %v4044_v18 = vpop.xlane.xlu0 %4043 }
 0xbe2   : > { %v7283_v25 = vpop.eup %7282 }
 0xbe3   : > { %v7285_v42 = vpop.eup %7284  ;;  %v4078_v55 = vmul.f32 %v7283_v25, %v9521_v8 }
 0xbe4   : > { %v7287_v51 = vpop.eup %7286  ;;  %v4075_v14 = vmul.f32 %v7285_v42, %v9515_v47 }
 0xbe5   : > { %v4077_v13 = vmul.f32 %v7287_v51, %v9509_v20 }
 0xbe6   : > { %v7289_v58 = vpop.eup %7288 }
 0xbe7   : > { %v4076_v30 = vmul.f32 %v7289_v58, %v9524_v37  ;;  %v4088_v7 = vpack.c.bf16 %v4078_v55, %v4077_v13 }
 0xbe9   : > { %v4087_v32 = vpack.c.bf16 %v4076_v30, %v4075_v14 }
 0xbeb   : > { %6470 = vmatprep.mubr.bf16.mxu0 %v4087_v32 }
 0xbec   : > { %6471 = vmatmul.mubr.bf16.gmra.mxu0 %v4088_v7 }
 0xbff   : > { %v4050_v50 = vpop.xlane.xlu0 %4049 }
 0xc00   : > { %7290 = vrcp.f32 %v4050_v50 }
 0xc01   : > { %7292 = vrcp.f32 %v4044_v18 }
 0xc02   : > { %7294 = vrcp.f32 %v4048_v40 }
 0xc03   : > { %v4046_v15 = vpop.xlane.xlu1 %4045  ;;  %v4319_v21 = vpop.permute.xlu0 %4318 }
 0xc04   : > { %7296 = vrcp.f32 %v4046_v15  ;;  %v4360_v5 = vsel %vm1308_vm0, %v4319_v21, 0 }
 0xc07   : > { %v4321_v8 = vpop.permute.xlu1 %4320  ;;  %v4317_v63 = vpop.permute.xlu0 %4316 }
 0xc08   : > { %6659 = vmatprep.subr.msk.bf16.mxu0 %vm1308_vm0, %v4321_v8  ;;  %v4363_v47 = vsel %vm1308_vm0, %v4321_v8, 0 }
 0xc09   : > { %6489 = vmatpush3.bf16.xpose.msra.mxu0 %v4363_v47 }
 0xc0a   : > { %6660 = vmatprep.subr.msk.bf16.mxu0 %vm1308_vm0, %v4319_v21 }
 0xc0b   : > { %v4301_v20 = vpop.permute.xlu1 %4300  ;;  %v4303_v37 = vpop.permute.xlu0 %4302 }
 0xc0d   : > { %v7291_v16 = vpop.eup %7290 }
 0xc0e   : > { %v7293_v44 = vpop.eup %7292  ;;  %v4082_v31 = vmul.f32 %v7291_v16, %v9529_v59  ;;  %v4357_v59 = vsel %vm1308_vm0, %v4317_v63, 0 }
 0xc0f   : > { %v4305_v29 = vpop.permute.xlu1 %4304  ;;  %v4307_v48 = vpop.permute.xlu0 %4306  ;;  %v4079_v9 = vmul.f32 %v7293_v44, %v9518_v38 }
 0xc10   : > { %v7295_v35 = vpop.eup %7294 }
 0xc11   : > { %v7297_v61 = vpop.eup %7296  ;;  %6491 = vmatpush3.bf16.xpose.msra.mxu0 %v4360_v5  ;;  %v4081_v42 = vmul.f32 %v7295_v35, %v9512_v49 }
 0xc12   : > { %6661 = vmatprep.subr.msk.bf16.mxu0 %vm1308_vm0, %v4317_v63  ;;  %v4080_v41 = vmul.f32 %v7297_v61, %v9532_v12 }
 0xc13   : > { %v4309_v2 = vpop.permute.xlu1 %4308  ;;  %v4311_v25 = vpop.permute.xlu0 %4310  ;;  %v4090_v58 = vpack.c.bf16 %v4082_v31, %v4081_v42 }
 0xc14   : > { %v4089_v51 = vpack.c.bf16 %v4080_v41, %v4079_v9 }
 0xc16   : > { %6474 = vmatprep.mubr.bf16.mxu0 %v4089_v51 }
 0xc17   : > { %v4313_v55 = vpop.permute.xlu1 %4312  ;;  %6475 = vmatmul.mubr.bf16.gmra.mxu0 %v4090_v58  ;;  %v4315_v14 = vpop.permute.xlu0 %4314 }
 0xc18   : > { %6494 = vmatprep.mubr.msk.bf16.mxu0 %vm1308_vm0, %v4301_v20 }
 0xc19   : > { %6493 = vmatpush3.bf16.xpose.msra.mxu0 %v4357_v59 }
 0xc1b   : > { %v4644_v30 = vpop.permute.xlu0 %4643  ;;  %v4642_v38 = vpop.permute.xlu1 %4641 }
 0xc1c   : > { %6510 = vmatprep.subr.bf16.mxu1 %v4644_v30 }
 0xc1d   : > { %6511 = vmatpush3.bf16.msra.mxu1 %v4644_v30 }
 0xc1e   : > { %6512 = vmatprep.subr.bf16.mxu1 %v4642_v38 }
 0xc1f   : > { %v4640_v12 = vpop.permute.xlu0 %4639 }
 0xc20   : > { %6495 = vmatmul.mubr.msk.bf16.vlgmr.msra.gmra.mxu0 %vm1308_vm0, %v4303_v37 }
 0xc21   : > { %6498 = vmatprep.mubr.msk.bf16.mxu0 %vm1308_vm0, %v4305_v29  ;;  %6513 = vmatpush3.bf16.msra.mxu1 %v4642_v38 }
 0xc22   : > { %6514 = vmatprep.subr.bf16.mxu1 %v4640_v12 }
 0xc23   : > { %v4638_v49 = vpop.permute.xlu0 %4637 }
 0xc25   : > { %6515 = vmatpush3.bf16.msra.mxu1 %v4640_v12 }
 0xc26   : > { %6516 = vmatprep.subr.bf16.mxu1 %v4638_v49 }
 0xc27   : > { %v4636_v13 = vpop.permute.xlu0 %4635 }
 0xc28   : > { %6499 = vmatmul.mubr.msk.bf16.gmra.mxu0 %vm1308_vm0, %v4307_v48 }
 0xc29   : > { %6502 = vmatprep.mubr.msk.bf16.mxu0 %vm1308_vm0, %v4309_v2  ;;  %6517 = vmatpush3.bf16.msra.mxu1 %v4638_v49 }
 0xc2a   : > { %6518 = vmatprep.subr.bf16.mxu1 %v4636_v13 }
 0xc2d   : > { %6519 = vmatpush3.bf16.msra.mxu1 %v4636_v13 }
 0xc30   : > { %6503 = vmatmul.mubr.msk.bf16.gmra.mxu0 %vm1308_vm0, %v4311_v25 }
 0xc31   : > { %6506 = vmatprep.mubr.msk.bf16.mxu0 %vm1308_vm0, %v4313_v55 }
 0xc38   : > { %6507 = vmatmul.mubr.msk.bf16.gmra.mxu0 %vm1308_vm0, %v4315_v14 }
 0xc63   : > { %v9607_v32 = vpop.f32.mrf.mxu0 }
 0xc65   : > { %v9609_v7 = vpop.f32.mrf.mxu0 }
 0xc67   : > { %v9611_v40 = vpop.f32.mrf.mxu0 }
 0xc68   : > { %10590 = vst [vmem:[#allocation55_spill] sm:$0xff] %v9611_v40 }
 0xc69   : > { %v9613_v18 = vpop.f32.mrf.mxu0 }
 0xc9b   : > { %v9615_v50 = vpop.f32.mrf.mxu0 }
 0xc9d   : > { %v9617_v15 = vpop.f32.mrf.mxu0 }
 0xc9f   : > { %v9619_v21 = vpop.f32.mrf.mxu0 }
 0xca0   : > { %10591 = vst [vmem:[#allocation57_spill] sm:$0xff] %v9619_v21 }
 0xca1   : > { %v9621_v8 = vpop.f32.mrf.mxu0 }
 0xca2   : > { %10592 = vst [vmem:[#allocation52_spill] sm:$0xff] %v9621_v8 }
 0xcac   : > { %v9623_v63 = vpop.f32.mrf.mxu0 }
 0xcae   : > { %v9625_v47 = vpop.f32.mrf.mxu0 }
 0xcb0   : > { %v9627_v20 = vpop.f32.mrf.mxu0 }
 0xcb1   : > { %10593 = vst [vmem:[#allocation54_spill] sm:$0xff] %v9627_v20 }
 0xcb2   : > { %v9629_v37 = vpop.f32.mrf.mxu0 }
 0xcb3   : > { %10594 = vst [vmem:[#allocation48_spill] sm:$0xff] %v9629_v37 }
 0xcd7   : > { %v9631_v16 = vpop.f32.mrf.mxu0 }
 0xcd9   : > { %v9633_v44 = vpop.f32.mrf.mxu0 }
 0xcdb   : > { %v9635_v29 = vpop.f32.mrf.mxu0 }
 0xcdc   : > { %10595 = vst [vmem:[#allocation50_spill] sm:$0xff] %v9635_v29 }
 0xcdd   : > { %v9637_v48 = vpop.f32.mrf.mxu0 }
 0xcde   : > { %10596 = vst [vmem:[#allocation44_spill] sm:$0xff] %v9637_v48 }
 0xce0   : > { %v6496_v35 = vpop.f32.mrf.mxu0 }
 0xce1   : > { %4481 = vmax.xlane.f32.xlu0 %v6496_v35 }
 0xce2   : > { %v4414_v5 = vpop.f32.mrf.mxu0 }
 0xce3   : > { %4477 = vmax.xlane.f32.xlu1 %v4414_v5 }
 0xce4   : > { %v6497_v61 = vpop.f32.mrf.mxu0 }
 0xce6   : > { %v4417_v31 = vpop.f32.mrf.mxu0 }
 0xce7   : > { %4483 = vmax.xlane.f32.xlu1 %v6497_v61  ;;  %4479 = vmax.xlane.f32.xlu0 %v4417_v31 }
 0xce8   : > { %v9643_v9 = vpop.f32.mrf.mxu0 }
 0xcea   : > { %v9645_v41 = vpop.f32.mrf.mxu0 }
 0xcec   : > { %v9647_v2 = vpop.f32.mrf.mxu0 }
 0xcee   : > { %v9649_v25 = vpop.f32.mrf.mxu0 }
 0xcf0   : > { %v9651_v42 = vpop.f32.mrf.mxu0 }
 0xcf2   : > { %v9655_v51 = vpop.f32.mrf.mxu0 }
 0xcf4   : > { %v9659_v58 = vpop.f32.mrf.mxu0 }
 0xcf6   : > { %v9663_v55 = vpop.f32.mrf.mxu0 }
 0xcf8   : > { %4631 = vrot.lane.b32.xlu1 %v8903_v10, %s7585_s20  ;;  %v9667_v14 = vpop.f32.mrf.mxu0 }
 0xcfa   : > { %v9670_v59 = vpop.f32.mrf.mxu0 }
 0xcfc   : > { %v9683_v30 = vpop.f32.mrf.mxu0 }
 0xcfd   : > { %4633 = vrot.lane.b32.xlu0 %v8895_v36, %s7585_s20 }
 0xcfe   : > { %v9686_v38 = vpop.f32.mrf.mxu0 }
 0xd1c   : > { %4489 = vmax.xlane.f32.xlu0 %v9643_v9  ;;  %4491 = vmax.xlane.f32.xlu1 %v9647_v2 }
 0xd20   : > { %4485 = vmax.xlane.f32.xlu0 %v9645_v41  ;;  %4487 = vmax.xlane.f32.xlu1 %v9649_v25 }
 0xd24   : > { %4497 = vmax.xlane.f32.xlu0 %v9651_v42  ;;  %4499 = vmax.xlane.f32.xlu1 %v9659_v58 }
 0xd28   : > { %4493 = vmax.xlane.f32.xlu0 %v9655_v51  ;;  %4495 = vmax.xlane.f32.xlu1 %v9663_v55 }
 0xd2c   : > { %4505 = vmax.xlane.f32.xlu0 %v9667_v14 }
 0xd30   : > { %4501 = vmax.xlane.f32.xlu0 %v9670_v59 }
 0xd39   : > { %4860 = vrot.lane.b32.xlu1 %v9093_v39, %s7586_s25 }
 0xd46   : > { %4629 = vrot.lane.b32.xlu0 %v8907_v1, %s7585_s20 }
 0xd4a   : > { %4858 = vrot.lane.b32.xlu0 %v10551_v45, %s7586_s25 }
 0xd4e   : > { %4856 = vrot.lane.b32.xlu0 %v10552_v56, %s7586_s25 }
 0xd52   : > { %4852 = vrot.lane.b32.xlu0 %v10554_v17, %s7586_s25 }
 0xd5d   : > { %4507 = vmax.xlane.f32.xlu1 %v9683_v30 }
 0xd61   : > { %4503 = vmax.xlane.f32.xlu1 %v9686_v38 }
 0xd6a   : > { %v4482_v39 = vpop.xlane.xlu0 %4481 }
 0xd6b   : > { %v4511_v12 = vsub.f32 %v6496_v35, %v4482_v39 }
 0xd6c   : > { %v4478_v49 = vpop.xlane.xlu1 %4477 }
 0xd6d   : > { %v4529_v13 = vmul.f32 1.442695, %v4511_v12  ;;  %v4509_v29 = vsub.f32 %v4414_v5, %v4478_v49 }
 0xd6f   : > { %7298 = vpow2.f32 %v4529_v13  ;;  %v4525_v45 = vmul.f32 1.442695, %v4509_v29 }
 0xd70   : > { %v4484_v48 = vpop.xlane.xlu1 %4483  ;;  %v4480_v56 = vpop.xlane.xlu0 %4479 }
 0xd71   : > { %v4512_v20 = vsub.f32 %v6497_v61, %v4484_v48  ;;  %7300 = vpow2.f32 %v4525_v45  ;;  %v4510_v37 = vsub.f32 %v4417_v31, %v4480_v56 }
 0xd73   : > { %v4531_v17 = vmul.f32 1.442695, %v4512_v20  ;;  %v4527_v40 = vmul.f32 1.442695, %v4510_v37 }
 0xd74   : > { %v4634_v21 = vpop.permute.xlu0 %4633  ;;  %v4632_v8 = vpop.permute.xlu1 %4631 }
 0xd75   : > { %6520 = vmatprep.subr.bf16.mxu1 %v4634_v21  ;;  %7302 = vpow2.f32 %v4531_v17 }
 0xd76   : > { %6521 = vmatpush3.bf16.msra.mxu1 %v4634_v21  ;;  %7304 = vpow2.f32 %v4527_v40 }
 0xd77   : > { %6522 = vmatprep.subr.bf16.mxu1 %v4632_v8 }
 0xd7a   : > { %6523 = vmatpush3.bf16.msra.mxu1 %v4632_v8 }
 0xd7c   : > { %v9689_v35 = vpop.eup %7298 }
 0xd7d   : > { %4561 = vadd.xlane.f32.xlu1 %v9689_v35 }
 0xd7e   : > { %v9692_v29 = vpop.eup %7300 }
 0xd81   : > { %4557 = vadd.xlane.f32.xlu1 %v9692_v29 }
 0xd82   : > { %v9695_v48 = vpop.eup %7302 }
 0xd83   : > { %v9698_v20 = vpop.eup %7304 }
 0xd85   : > { %4563 = vadd.xlane.f32.xlu1 %v9695_v48 }
 0xd89   : > { %4559 = vadd.xlane.f32.xlu1 %v9698_v20 }
 0xd9a   : > { %4854 = vrot.lane.b32.xlu1 %v10553_v54, %s7586_s25 }
 0xda5   : > { %v4492_v40 = vpop.xlane.xlu1 %4491  ;;  %v4490_v21 = vpop.xlane.xlu0 %4489 }
 0xda6   : > { %v4515_v8 = vsub.f32 %v9643_v9, %v4490_v21  ;;  %v4516_v12 = vsub.f32 %v9647_v2, %v4492_v40 }
 0xda8   : > { %v4537_v37 = vmul.f32 1.442695, %v4515_v8  ;;  %v4539_v56 = vmul.f32 1.442695, %v4516_v12 }
 0xda9   : > { %v4488_v5 = vpop.xlane.xlu1 %4487  ;;  %v4486_v61 = vpop.xlane.xlu0 %4485 }
 0xdaa   : > { %v4514_v31 = vsub.f32 %v9649_v25, %v4488_v5  ;;  %v4513_v39 = vsub.f32 %v9645_v41, %v4486_v61  ;;  %7306 = vpow2.f32 %v4537_v37 }
 0xdac   : > { %v4535_v49 = vmul.f32 1.442695, %v4514_v31  ;;  %v4533_v13 = vmul.f32 1.442695, %v4513_v39 }
 0xdad   : > { %v4498_v45 = vpop.xlane.xlu0 %4497  ;;  %v4500_v9 = vpop.xlane.xlu1 %4499 }
 0xdae   : > { %7308 = vpow2.f32 %v4535_v49  ;;  %v4519_v54 = vsub.f32 %v9651_v42, %v4498_v45  ;;  %v4520_v2 = vsub.f32 %v9659_v58, %v4500_v9 }
 0xdaf   : > { %7310 = vpow2.f32 %v4533_v13 }
 0xdb0   : > { %7312 = vpow2.f32 %v4539_v56  ;;  %v4545_v21 = vmul.f32 1.442695, %v4519_v54 }
 0xdb1   : > { %v4494_v17 = vpop.xlane.xlu0 %4493  ;;  %v4496_v61 = vpop.xlane.xlu1 %4495 }
 0xdb2   : > { %v4517_v8 = vsub.f32 %v9655_v51, %v4494_v17  ;;  %7314 = vpow2.f32 %v4545_v21  ;;  %v4547_v51 = vmul.f32 1.442695, %v4520_v2  ;;  %v4518_v12 = vsub.f32 %v9663_v55, %v4496_v61 }
 0xdb4   : > { %v4541_v40 = vmul.f32 1.442695, %v4517_v8 }
 0xdb5   : > { %v4506_v25 = vpop.xlane.xlu0 %4505  ;;  %v9722_v13 = vpop.permute.xlu1 %4860 }
 0xdb6   : > { %v4523_v41 = vsub.f32 %v9667_v14, %v4506_v25 }
 0xdb7   : > { %v9710_v37 = vpop.eup %7306 }
 0xdb8   : > { %v4553_v5 = vmul.f32 1.442695, %v4523_v41  ;;  %4569 = vadd.xlane.f32.xlu0 %v9710_v37 }
 0xdb9   : > { %v4502_v42 = vpop.xlane.xlu0 %4501 }
 0xdba   : > { %7316 = vpow2.f32 %v4553_v5  ;;  %v4521_v31 = vsub.f32 %v9670_v59, %v4502_v42  ;;  %v4543_v59 = vmul.f32 1.442695, %v4518_v12 }
 0xdbb   : > { %v9715_v39 = vpop.eup %7308  ;;  %7318 = vpow2.f32 %v4541_v40 }
 0xdbc   : > { %v4549_v14 = vmul.f32 1.442695, %v4521_v31  ;;  %v9718_v49 = vpop.eup %7310  ;;  %4567 = vadd.xlane.f32.xlu0 %v9715_v39 }
 0xdbd   : > { %v4630_v58 = vpop.permute.xlu0 %4629  ;;  %v9726_v55 = vpop.eup %7312 }
 0xdbe   : > { %7320 = vpow2.f32 %v4549_v14  ;;  %4565 = vadd.xlane.f32.xlu1 %v9718_v49  ;;  %6524 = vmatprep.subr.bf16.mxu1 %v4630_v58 }
 0xdbf   : > { %6525 = vmatpush3.bf16.msra.mxu1 %v4630_v58  ;;  %7322 = vpow2.f32 %v4547_v51  ;;  %v9729_v45 = vpop.eup %7314 }
 0xdc0   : > { %6662 = vmatprep.subr.msk.bf16.mxu1 %vm1308_vm0, %v9722_v13  ;;  %7324 = vpow2.f32 %v4543_v59 }
 0xdc2   : > { %4571 = vadd.xlane.f32.xlu1 %v9726_v55 }
 0xdc6   : > { %4577 = vadd.xlane.f32.xlu1 %v9729_v45 }
 0xdc7   : > { %v9732_v56 = vpop.eup %7316 }
 0xdc8   : > { %4585 = vadd.xlane.f32.xlu0 %v9732_v56  ;;  %v9735_v54 = vpop.eup %7318 }
 0xdca   : > { %4573 = vadd.xlane.f32.xlu1 %v9735_v54 }
 0xdcb   : > { %v9738_v17 = vpop.eup %7320 }
 0xdcc   : > { %4581 = vadd.xlane.f32.xlu0 %v9738_v17  ;;  %v9741_v9 = vpop.eup %7322 }
 0xdcd   : > { %v9744_v21 = vpop.eup %7324 }
 0xdce   : > { %4579 = vadd.xlane.f32.xlu1 %v9741_v9 }
 0xdd2   : > { %4575 = vadd.xlane.f32.xlu1 %v9744_v21 }
 0xde6   : > { %v4508_v8 = vpop.xlane.xlu1 %4507 }
 0xde7   : > { %v4524_v25 = vsub.f32 %v9683_v30, %v4508_v8 }
 0xde9   : > { %v4555_v41 = vmul.f32 1.442695, %v4524_v25 }
 0xdea   : > { %v4504_v2 = vpop.xlane.xlu1 %4503 }
 0xdeb   : > { %7326 = vpow2.f32 %v4555_v41  ;;  %v4522_v40 = vsub.f32 %v9686_v38, %v4504_v2 }
 0xded   : > { %v4551_v5 = vmul.f32 1.442695, %v4522_v40 }
 0xdef   : > { %7328 = vpow2.f32 %v4551_v5 }
 0xdf8   : > { %v9749_v61 = vpop.eup %7326 }
 0xdf9   : > { %4587 = vadd.xlane.f32.xlu0 %v9749_v61 }
 0xdfc   : > { %v9752_v42 = vpop.eup %7328 }
 0xdfd   : > { %4583 = vadd.xlane.f32.xlu1 %v9752_v42 }
 0xe06   : > { %v4562_v31 = vpop.xlane.xlu1 %4561 }
 0xe0a   : > { %v4558_v51 = vpop.xlane.xlu1 %4557 }
 0xe0e   : > { %v4564_v12 = vpop.xlane.xlu1 %4563  ;;  %4850 = vrot.lane.b32.xlu1 %v10555_v6, %s7586_s25 }
 0xe0f   : > { %4848 = vrot.lane.b32.xlu0 %v10556_v11, %s7586_s25  ;;  %7330 = vrcp.f32 %v4564_v12 }
 0xe10   : > { %7332 = vrcp.f32 %v4558_v51 }
 0xe11   : > { %7334 = vrcp.f32 %v4562_v31 }
 0xe12   : > { %v4560_v30 = vpop.xlane.xlu1 %4559  ;;  %4830 = vrot.lane.b32.xlu1 %v9153_v46, %s7586_s25 }
 0xe13   : > { %7336 = vrcp.f32 %v4560_v30  ;;  %4846 = vrot.lane.b32.xlu0 %v10557_v24, %s7586_s25 }
 0xe16   : > { %4834 = vrot.lane.b32.xlu1 %v9163_v23, %s7586_s25 }
 0xe17   : > { %4832 = vrot.lane.b32.xlu0 %v9161_v26, %s7586_s25 }
 0xe1a   : > { %4838 = vrot.lane.b32.xlu1 %v9175_v57, %s7586_s25 }
 0xe1b   : > { %4836 = vrot.lane.b32.xlu0 %v9173_v19, %s7586_s25 }
 0xe1c   : > { %v7331_v6 = vpop.eup %7330 }
 0xe1d   : > { %v7333_v11 = vpop.eup %7332  ;;  %v4608_v23 = vmul.f32 %v7331_v6, %v9695_v48  ;;  %v4859_v48 = vpop.permute.xlu0 %4858 }
 0xe1e   : > { %4842 = vrot.lane.b32.xlu1 %v9187_v33, %s7586_s25  ;;  %v7335_v46 = vpop.eup %7334  ;;  %v4605_v26 = vmul.f32 %v7333_v11, %v9692_v29  ;;  %v4855_v29 = vpop.permute.xlu1 %4854 }
 0xe1f   : > { %4840 = vrot.lane.b32.xlu0 %v9185_v34, %s7586_s25  ;;  %v4607_v57 = vmul.f32 %v7335_v46, %v9689_v35  ;;  %v4908_v34 = vsel %vm1308_vm0, %v9722_v13, 0  ;;  %v4905_v35 = vsel %vm1308_vm0, %v4859_v48, 0  ;;  %v4899_v14 = vsel %vm1308_vm0, %v4855_v29, 0 }
 0xe20   : > { %v7337_v24 = vpop.eup %7336 }
 0xe21   : > { %v4606_v38 = vmul.f32 %v7337_v24, %v9698_v20  ;;  %v4622_v33 = vpack.c.bf16 %v4608_v23, %v4607_v57 }
 0xe22   : > { %5171 = vrot.lane.b32.xlu1 %v8867_v0, %s7586_s25  ;;  %v4857_v0 = vpop.permute.xlu0 %4856 }
 0xe23   : > { %4844 = vrot.lane.b32.xlu0 %v9195_v52, %s7586_s25  ;;  %v4621_v19 = vpack.c.bf16 %v4606_v38, %v4605_v26  ;;  %v4902_v52 = vsel %vm1308_vm0, %v4857_v0, 0 }
 0xe25   : > { %6526 = vmatprep.mubr.bf16.mxu1 %v4621_v19 }
 0xe26   : > { %6527 = vmatmul.mubr.bf16.vlgmr.msra.gmra.mxu1 %v4622_v33  ;;  %v4853_v20 = vpop.permute.xlu0 %4852 }
 0xe27   : > { %6543 = vmatpush3.bf16.xpose.msra.mxu1 %v4908_v34  ;;  %5173 = vrot.lane.b32.xlu0 %v8858_v3, %s7586_s25  ;;  %v4896_v13 = vsel %vm1308_vm0, %v4853_v20, 0 }
 0xe28   : > { %6663 = vmatprep.subr.msk.bf16.mxu1 %vm1308_vm0, %v4859_v48 }
 0xe2f   : > { %6545 = vmatpush3.bf16.xpose.msra.mxu1 %v4905_v35 }
 0xe30   : > { %6664 = vmatprep.subr.msk.bf16.mxu1 %vm1308_vm0, %v4857_v0 }
 0xe37   : > { %6547 = vmatpush3.bf16.xpose.msra.mxu1 %v4902_v52 }
 0xe38   : > { %6665 = vmatprep.subr.msk.bf16.mxu1 %vm1308_vm0, %v4855_v29 }
 0xe3f   : > { %6549 = vmatpush3.bf16.xpose.msra.mxu1 %v4899_v14 }
 0xe40   : > { %6666 = vmatprep.subr.msk.bf16.mxu1 %vm1308_vm0, %v4853_v20 }
 0xe41   : > { %v4570_v3 = vpop.xlane.xlu0 %4569 }
 0xe45   : > { %v4568_v58 = vpop.xlane.xlu0 %4567 }
 0xe46   : > { %7338 = vrcp.f32 %v4568_v58 }
 0xe47   : > { %6551 = vmatpush3.bf16.xpose.msra.mxu1 %v4896_v13  ;;  %v4566_v59 = vpop.xlane.xlu1 %4565 }
 0xe48   : > { %7340 = vrcp.f32 %v4566_v59 }
 0xe49   : > { %7342 = vrcp.f32 %v4570_v3 }
 0xe4b   : > { %v4572_v8 = vpop.xlane.xlu1 %4571 }
 0xe4c   : > { %7344 = vrcp.f32 %v4572_v8 }
 0xe4f   : > { %v4578_v25 = vpop.xlane.xlu1 %4577 }
 0xe53   : > { %v4574_v41 = vpop.xlane.xlu1 %4573  ;;  %v7339_v2 = vpop.eup %7338 }
 0xe54   : > { %v4610_v31 = vmul.f32 %v7339_v2, %v9715_v39 }
 0xe55   : > { %v7341_v40 = vpop.eup %7340 }
 0xe56   : > { %v4609_v5 = vmul.f32 %v7341_v40, %v9718_v49  ;;  %v7343_v51 = vpop.eup %7342 }
 0xe57   : > { %v4580_v12 = vpop.xlane.xlu1 %4579  ;;  %v4611_v11 = vmul.f32 %v7343_v51, %v9710_v37 }
 0xe58   : > { %v4623_v30 = vpack.c.bf16 %v4610_v31, %v4609_v5  ;;  %7346 = vrcp.f32 %v4580_v12 }
 0xe59   : > { %v7345_v6 = vpop.eup %7344  ;;  %7348 = vrcp.f32 %v4574_v41 }
 0xe5a   : > { %6530 = vmatprep.mubr.bf16.mxu1 %v4623_v30  ;;  %v4612_v46 = vmul.f32 %v7345_v6, %v9726_v55  ;;  %7350 = vrcp.f32 %v4578_v25  ;;  %v4586_v55 = vpop.xlane.xlu0 %4585 }
 0xe5b   : > { %v4576_v24 = vpop.xlane.xlu1 %4575 }
 0xe5c   : > { %7352 = vrcp.f32 %v4576_v24  ;;  %v4624_v23 = vpack.c.bf16 %v4612_v46, %v4611_v11 }
 0xe5e   : > { %6531 = vmatmul.mubr.bf16.gmra.mxu1 %v4624_v23  ;;  %v4582_v35 = vpop.xlane.xlu0 %4581 }
 0xe65   : > { %v7347_v26 = vpop.eup %7346 }
 0xe66   : > { %v7349_v49 = vpop.eup %7348  ;;  %v4616_v57 = vmul.f32 %v7347_v26, %v9741_v9 }
 0xe67   : > { %v7351_v38 = vpop.eup %7350  ;;  %v4613_v19 = vmul.f32 %v7349_v49, %v9735_v54 }
 0xe68   : > { %v4615_v34 = vmul.f32 %v7351_v38, %v9729_v45 }
 0xe69   : > { %v7353_v39 = vpop.eup %7352 }
 0xe6a   : > { %v4614_v33 = vmul.f32 %v7353_v39, %v9744_v21  ;;  %v4626_v48 = vpack.c.bf16 %v4616_v57, %v4615_v34 }
 0xe6c   : > { %v4625_v37 = vpack.c.bf16 %v4614_v33, %v4613_v19 }
 0xe6e   : > { %6534 = vmatprep.mubr.bf16.mxu1 %v4625_v37 }
 0xe6f   : > { %6535 = vmatmul.mubr.bf16.gmra.mxu1 %v4626_v48 }
 0xe82   : > { %v4588_v0 = vpop.xlane.xlu0 %4587 }
 0xe83   : > { %7354 = vrcp.f32 %v4588_v0 }
 0xe84   : > { %7356 = vrcp.f32 %v4582_v35 }
 0xe85   : > { %7358 = vrcp.f32 %v4586_v55 }
 0xe86   : > { %v4584_v52 = vpop.xlane.xlu1 %4583  ;;  %v4849_v29 = vpop.permute.xlu0 %4848 }
 0xe87   : > { %7360 = vrcp.f32 %v4584_v52  ;;  %v4890_v8 = vsel %vm1308_vm0, %v4849_v29, 0 }
 0xe8a   : > { %v4851_v9 = vpop.permute.xlu1 %4850  ;;  %v4847_v20 = vpop.permute.xlu0 %4846 }
 0xe8b   : > { %6667 = vmatprep.subr.msk.bf16.mxu1 %vm1308_vm0, %v4851_v9  ;;  %v4893_v54 = vsel %vm1308_vm0, %v4851_v9, 0 }
 0xe8c   : > { %6553 = vmatpush3.bf16.xpose.msra.mxu1 %v4893_v54 }
 0xe8d   : > { %6668 = vmatprep.subr.msk.bf16.mxu1 %vm1308_vm0, %v4849_v29 }
 0xe8e   : > { %v4831_v45 = vpop.permute.xlu1 %4830  ;;  %v4833_v21 = vpop.permute.xlu0 %4832 }
 0xe90   : > { %v7355_v14 = vpop.eup %7354 }
 0xe91   : > { %v7357_v3 = vpop.eup %7356  ;;  %v4620_v41 = vmul.f32 %v7355_v14, %v9749_v61  ;;  %v4887_v61 = vsel %vm1308_vm0, %v4847_v20, 0 }
 0xe92   : > { %v4835_v58 = vpop.permute.xlu1 %4834  ;;  %v4837_v13 = vpop.permute.xlu0 %4836  ;;  %v4617_v2 = vmul.f32 %v7357_v3, %v9738_v17 }
 0xe93   : > { %v7359_v59 = vpop.eup %7358 }
 0xe94   : > { %v7361_v25 = vpop.eup %7360  ;;  %6555 = vmatpush3.bf16.xpose.msra.mxu1 %v4890_v8  ;;  %v4619_v51 = vmul.f32 %v7359_v59, %v9732_v56 }
 0xe95   : > { %6669 = vmatprep.subr.msk.bf16.mxu1 %vm1308_vm0, %v4847_v20  ;;  %v4618_v40 = vmul.f32 %v7361_v25, %v9752_v42 }
 0xe96   : > { %v4839_v5 = vpop.permute.xlu1 %4838  ;;  %v4841_v31 = vpop.permute.xlu0 %4840  ;;  %v4628_v30 = vpack.c.bf16 %v4620_v41, %v4619_v51 }
 0xe97   : > { %v4627_v12 = vpack.c.bf16 %v4618_v40, %v4617_v2 }
 0xe99   : > { %6538 = vmatprep.mubr.bf16.mxu1 %v4627_v12 }
 0xe9a   : > { %v4843_v6 = vpop.permute.xlu1 %4842  ;;  %6539 = vmatmul.mubr.bf16.gmra.mxu1 %v4628_v30  ;;  %v4845_v11 = vpop.permute.xlu0 %4844 }
 0xe9b   : > { %6558 = vmatprep.mubr.msk.bf16.mxu1 %vm1308_vm0, %v4831_v45 }
 0xe9c   : > { %6557 = vmatpush3.bf16.xpose.msra.mxu1 %v4887_v61 }
 0xe9e   : > { %v5174_v46 = vpop.permute.xlu0 %5173  ;;  %v5172_v17 = vpop.permute.xlu1 %5171 }
 0xe9f   : > { %6574 = vmatprep.subr.bf16.mxu0 %v5174_v46 }
 0xea0   : > { %6575 = vmatpush3.bf16.msra.mxu0 %v5174_v46 }
 0xea1   : > { %6576 = vmatprep.subr.bf16.mxu0 %v5172_v17 }
 0xea3   : > { %6559 = vmatmul.mubr.msk.bf16.vlgmr.msra.gmra.mxu1 %vm1308_vm0, %v4833_v21 }
 0xea4   : > { %6562 = vmatprep.mubr.msk.bf16.mxu1 %vm1308_vm0, %v4835_v58  ;;  %6577 = vmatpush3.bf16.msra.mxu0 %v5172_v17 }
 0xeab   : > { %6563 = vmatmul.mubr.msk.bf16.gmra.mxu1 %vm1308_vm0, %v4837_v13 }
 0xeac   : > { %6566 = vmatprep.mubr.msk.bf16.mxu1 %vm1308_vm0, %v4839_v5 }
 0xeb3   : > { %6567 = vmatmul.mubr.msk.bf16.gmra.mxu1 %vm1308_vm0, %v4841_v31 }
 0xeb4   : > { %6570 = vmatprep.mubr.msk.bf16.mxu1 %vm1308_vm0, %v4843_v6 }
 0xebb   : > { %6571 = vmatmul.mubr.msk.bf16.gmra.mxu1 %vm1308_vm0, %v4845_v11 }
 0xee6   : > { %v9821_v56 = vpop.f32.mrf.mxu1 }
 0xee8   : > { %v9823_v42 = vpop.f32.mrf.mxu1 }
 0xeea   : > { %v9825_v24 = vpop.f32.mrf.mxu1 }
 0xeec   : > { %v9827_v23 = vpop.f32.mrf.mxu1 }
 0xf1e   : > { %v9829_v26 = vpop.f32.mrf.mxu1 }
 0xf20   : > { %v9831_v49 = vpop.f32.mrf.mxu1 }
 0xf22   : > { %v9833_v38 = vpop.f32.mrf.mxu1 }
 0xf24   : > { %v9835_v39 = vpop.f32.mrf.mxu1 }
 0xf2f   : > { %v9837_v57 = vpop.f32.mrf.mxu1 }
 0xf31   : > { %v9839_v19 = vpop.f32.mrf.mxu1 }
 0xf33   : > { %v9841_v33 = vpop.f32.mrf.mxu1 }
 0xf35   : > { %v9843_v34 = vpop.f32.mrf.mxu1 }
 0xf5a   : > { %v9845_v37 = vpop.f32.mrf.mxu1 }
 0xf5c   : > { %v9847_v48 = vpop.f32.mrf.mxu1 }
 0xf5e   : > { %v9849_v55 = vpop.f32.mrf.mxu1 }
 0xf60   : > { %v9851_v35 = vpop.f32.mrf.mxu1 }
 0xf63   : > { %v6560_v0 = vpop.f32.mrf.mxu1 }
 0xf64   : > { %5011 = vmax.xlane.f32.xlu0 %v6560_v0 }
 0xf65   : > { %v4944_v52 = vpop.f32.mrf.mxu1 }
 0xf66   : > { %5007 = vmax.xlane.f32.xlu1 %v4944_v52 }
 0xf67   : > { %v6561_v29 = vpop.f32.mrf.mxu1 }
 0xf69   : > { %v4947_v9 = vpop.f32.mrf.mxu1 }
 0xf6a   : > { %5013 = vmax.xlane.f32.xlu1 %v6561_v29  ;;  %5009 = vmax.xlane.f32.xlu0 %v4947_v9 }
 0xf6b   : > { %v6564_v20 = vpop.f32.mrf.mxu1 }
 0xf6d   : > { %v4960_v54 = vpop.f32.mrf.mxu1 }
 0xf6e   : > { %5019 = vmax.xlane.f32.xlu0 %v6564_v20 }
 0xf6f   : > { %v6565_v45 = vpop.f32.mrf.mxu1 }
 0xf70   : > { %5021 = vmax.xlane.f32.xlu1 %v6565_v45 }
 0xf71   : > { %v4963_v21 = vpop.f32.mrf.mxu1 }
 0xf72   : > { %5015 = vmax.xlane.f32.xlu0 %v4960_v54 }
 0xf73   : > { %v6568_v14 = vpop.f32.mrf.mxu1 }
 0xf74   : > { %5017 = vmax.xlane.f32.xlu1 %v4963_v21 }
 0xf75   : > { %v9853_v3 = vpop.f32.mrf.mxu1 }
 0xf76   : > { %5027 = vmax.xlane.f32.xlu0 %v6568_v14 }
 0xf77   : > { %v9855_v58 = vpop.f32.mrf.mxu1 }
 0xf78   : > { %5029 = vmax.xlane.f32.xlu1 %v9855_v58 }
 0xf79   : > { %v9858_v13 = vpop.f32.mrf.mxu1 }
 0xf7a   : > { %5023 = vmax.xlane.f32.xlu0 %v9853_v3 }
 0xf7b   : > { %v9862_v59 = vpop.f32.mrf.mxu1 }
 0xf7c   : > { %5025 = vmax.xlane.f32.xlu1 %v9858_v13 }
 0xf7d   : > { %v9865_v8 = vpop.f32.mrf.mxu1 }
 0xf7e   : > { %5035 = vmax.xlane.f32.xlu0 %v9862_v59 }
 0xf7f   : > { %v9876_v25 = vpop.f32.mrf.mxu1 }
 0xf81   : > { %v9879_v41 = vpop.f32.mrf.mxu1 }
 0xf82   : > { %5031 = vmax.xlane.f32.xlu0 %v9865_v8 }
 0xf8d   : > { %5165 = vrot.lane.b32.xlu1 %v8889_v43, %s7586_s25 }
 0xf98   : > { %5169 = vrot.lane.b32.xlu0 %v8875_v22, %s7586_s25 }
 0xf9c   : > { %5167 = vrot.lane.b32.xlu0 %v8881_v27, %s7586_s25 }
 0xfa0   : > { %5161 = vrot.lane.b32.xlu0 %v8903_v10, %s7586_s25 }
 0xfb1   : > { %5037 = vmax.xlane.f32.xlu1 %v9876_v25 }
 0xfb5   : > { %5033 = vmax.xlane.f32.xlu1 %v9879_v41 }
 0xfc6   : > { %5163 = vrot.lane.b32.xlu1 %v8895_v36, %s7586_s25 }
 0xfed   : > { %v5012_v43 = vpop.xlane.xlu0 %5011 }
 0xfee   : > { %v5041_v2 = vsub.f32 %v6560_v0, %v5012_v43 }
 0xfef   : > { %v5008_v22 = vpop.xlane.xlu1 %5007 }
 0xff0   : > { %v5059_v40 = vmul.f32 1.442695, %v5041_v2  ;;  %v5039_v5 = vsub.f32 %v4944_v52, %v5008_v22 }
 0xff2   : > { %7362 = vpow2.f32 %v5059_v40  ;;  %v5055_v27 = vmul.f32 1.442695, %v5039_v5 }
 0xff3   : > { %v5014_v31 = vpop.xlane.xlu1 %5013  ;;  %v5010_v10 = vpop.xlane.xlu0 %5009 }
 0xff4   : > { %v5042_v51 = vsub.f32 %v6561_v29, %v5014_v31  ;;  %7364 = vpow2.f32 %v5055_v27  ;;  %v5040_v30 = vsub.f32 %v4947_v9, %v5010_v10 }
 0xff6   : > { %v5061_v12 = vmul.f32 1.442695, %v5042_v51  ;;  %v5057_v46 = vmul.f32 1.442695, %v5040_v30 }
 0xff7   : > { %v5020_v6 = vpop.xlane.xlu0 %5019 }
 0xff8   : > { %v5045_v11 = vsub.f32 %v6564_v20, %v5020_v6  ;;  %7366 = vpow2.f32 %v5061_v12 }
 0xff9   : > { %v5022_v61 = vpop.xlane.xlu1 %5021 }
 0xffa   : > { %v5067_v17 = vmul.f32 1.442695, %v5045_v11  ;;  %v5046_v0 = vsub.f32 %v6565_v45, %v5022_v61 }
 0xffb   : > { %v5016_v36 = vpop.xlane.xlu0 %5015 }
 0xffc   : > { %7368 = vpow2.f32 %v5067_v17  ;;  %v5043_v43 = vsub.f32 %v4960_v54, %v5016_v36  ;;  %v5069_v5 = vmul.f32 1.442695, %v5046_v0 }
 0xffd   : > { %v5018_v2 = vpop.xlane.xlu1 %5017  ;;  %7370 = vpow2.f32 %v5057_v46 }
 0xffe   : > { %v5063_v52 = vmul.f32 1.442695, %v5043_v43  ;;  %v5044_v22 = vsub.f32 %v4963_v21, %v5018_v2 }
 0xfff   : > { %v9884_v40 = vpop.eup %7362  ;;  %v5028_v29 = vpop.xlane.xlu0 %5027 }
0x1000   : > { %7372 = vpow2.f32 %v5063_v52  ;;  %v5065_v9 = vmul.f32 1.442695, %v5044_v22  ;;  %v5049_v27 = vsub.f32 %v6568_v14, %v5028_v29  ;;  %5091 = vadd.xlane.f32.xlu1 %v9884_v40 }
0x1001   : > { %v5030_v20 = vpop.xlane.xlu1 %5029  ;;  %v9887_v31 = vpop.eup %7364 }
0x1002   : > { %7374 = vpow2.f32 %v5065_v9  ;;  %v5075_v54 = vmul.f32 1.442695, %v5049_v27  ;;  %v5050_v14 = vsub.f32 %v9855_v58, %v5030_v20 }
0x1003   : > { %v5024_v10 = vpop.xlane.xlu0 %5023  ;;  %7376 = vpow2.f32 %v5069_v5 }
0x1004   : > { %v5047_v45 = vsub.f32 %v9853_v3, %v5024_v10  ;;  %5087 = vadd.xlane.f32.xlu1 %v9887_v31  ;;  %7378 = vpow2.f32 %v5075_v54  ;;  %v5077_v36 = vmul.f32 1.442695, %v5050_v14 }
0x1005   : > { %v5026_v21 = vpop.xlane.xlu1 %5025  ;;  %v9892_v12 = vpop.eup %7366 }
0x1006   : > { %v5048_v51 = vsub.f32 %v9858_v13, %v5026_v21  ;;  %v5071_v6 = vmul.f32 1.442695, %v5047_v45 }
0x1007   : > { %v5036_v30 = vpop.xlane.xlu0 %5035 }
0x1008   : > { %v5073_v11 = vmul.f32 1.442695, %v5048_v51  ;;  %v5053_v61 = vsub.f32 %v9862_v59, %v5036_v30  ;;  %5093 = vadd.xlane.f32.xlu1 %v9892_v12 }
0x1009   : > { %v9897_v46 = vpop.eup %7368  ;;  %v5166_v29 = vpop.permute.xlu1 %5165 }
0x100a   : > { %7380 = vpow2.f32 %v5073_v11  ;;  %v5083_v3 = vmul.f32 1.442695, %v5053_v61  ;;  %5099 = vadd.xlane.f32.xlu0 %v9897_v46  ;;  %v9900_v17 = vpop.eup %7370  ;;  %v10610_v11 = vld [vmem:[#allocation84_spill] sm:$0xff]  ;;  %v10611_v61 = vld [vmem:[#allocation51_spill] sm:$0xff] }
0x100b   : > { %v5032_v13 = vpop.xlane.xlu0 %5031  ;;  %7382 = vpow2.f32 %v5071_v6  ;;  %v10609_v6 = vld [vmem:[#allocation42_spill] sm:$0xff] }
0x100c   : > { %v5051_v58 = vsub.f32 %v9865_v8, %v5032_v13  ;;  %5089 = vadd.xlane.f32.xlu1 %v9900_v17  ;;  %7384 = vpow2.f32 %v5083_v3  ;;  %v10612_v3 = vld [vmem:[#allocation33_spill] sm:$0xff] }
0x100d   : > { %v9904_v0 = vpop.eup %7372  ;;  %7386 = vpow2.f32 %v5077_v36  ;;  %v10613_v36 = vld [vmem:[#allocation81_spill] sm:$0xff] }
0x100e   : > { %v5079_v59 = vmul.f32 1.442695, %v5051_v58  ;;  %5095 = vadd.xlane.f32.xlu0 %v9904_v0 }
0x100f   : > { %v9907_v43 = vpop.eup %7374  ;;  %v5170_v2 = vpop.permute.xlu0 %5169 }
0x1010   : > { %5097 = vadd.xlane.f32.xlu1 %v9907_v43  ;;  %6578 = vmatprep.subr.bf16.mxu0 %v5170_v2  ;;  %v9910_v52 = vpop.eup %7376  ;;  %7388 = vpow2.f32 %v5079_v59  ;;  %v10614_v59 = vld [vmem:[#allocation80_spill] sm:$0xff] }
0x1011   : > { %6579 = vmatpush3.bf16.msra.mxu0 %v5170_v2  ;;  %v9913_v22 = vpop.eup %7378  ;;  %v10615_v2 = vld [vmem:[#allocation55_spill] sm:$0xff] }
0x1012   : > { %5101 = vadd.xlane.f32.xlu0 %v9910_v52 }
0x1013   : > { %v5168_v8 = vpop.permute.xlu0 %5167 }
0x1014   : > { %6580 = vmatprep.subr.bf16.mxu0 %v5168_v8 }
0x1015   : > { %6581 = vmatpush3.bf16.msra.mxu0 %v5168_v8 }
0x1016   : > { %5107 = vadd.xlane.f32.xlu0 %v9913_v22  ;;  %6582 = vmatprep.subr.bf16.mxu0 %v5166_v29 }
0x1017   : > { %v9916_v5 = vpop.eup %7380 }
0x1018   : > { %5105 = vadd.xlane.f32.xlu1 %v9916_v5  ;;  %v9919_v9 = vpop.eup %7382 }
0x1019   : > { %6583 = vmatpush3.bf16.msra.mxu0 %v5166_v29  ;;  %v9922_v27 = vpop.eup %7384  ;;  %v10616_v29 = vld [vmem:[#allocation97_spill] sm:$0xff] }
0x101a   : > { %5103 = vadd.xlane.f32.xlu0 %v9919_v9  ;;  %v9925_v20 = vpop.eup %7386 }
0x101c   : > { %5115 = vadd.xlane.f32.xlu1 %v9922_v27 }
0x101d   : > { %v9928_v10 = vpop.eup %7388 }
0x101e   : > { %5109 = vadd.xlane.f32.xlu0 %v9925_v20 }
0x1020   : > { %5111 = vadd.xlane.f32.xlu1 %v9928_v10 }
0x1031   : > { %5159 = vrot.lane.b32.xlu1 %v8907_v1, %s7586_s25 }
0x1035   : > { %2211 = vrot.lane.b32.xlu1 %v8919_v28, %s7586_s25  ;;  %v5162_v28 = vpop.permute.xlu0 %5161 }
0x1039   : > { %2213 = vrot.lane.b32.xlu1 %v8913_v4, %s7586_s25  ;;  %v10597_v4 = vld [vmem:[#allocation88_spill] sm:$0xff] }
0x103a   : > { %v5038_v54 = vpop.xlane.xlu1 %5037 }
0x103b   : > { %v5054_v21 = vsub.f32 %v9876_v25, %v5038_v54  ;;  %v10617_v54 = vld [vmem:[#allocation52_spill] sm:$0xff] }
0x103d   : > { %2217 = vrot.lane.b32.xlu1 %v8923_v60, %s7586_s25  ;;  %v5085_v30 = vmul.f32 1.442695, %v5054_v21  ;;  %v10598_v60 = vld [vmem:[#allocation93_spill] sm:$0xff] }
0x103e   : > { %v5034_v45 = vpop.xlane.xlu1 %5033 }
0x103f   : > { %v5052_v51 = vsub.f32 %v9879_v41, %v5034_v45 }
0x1041   : > { %v5081_v14 = vmul.f32 1.442695, %v5052_v51  ;;  %2221 = vrot.lane.b32.xlu1 %v8921_v62, %s7586_s25  ;;  %v10599_v62 = vld [vmem:[#allocation92_spill] sm:$0xff] }
0x1042   : > { %v5164_v1 = vpop.permute.xlu1 %5163 }
0x1043   : > { %7390 = vpow2.f32 %v5081_v14  ;;  %6584 = vmatprep.subr.bf16.mxu0 %v5164_v1 }
0x1044   : > { %6585 = vmatpush3.bf16.msra.mxu0 %v5164_v1  ;;  %7392 = vpow2.f32 %v5085_v30  ;;  %v10619_v1 = vld [vmem:[#allocation48_spill] sm:$0xff] }
0x1045   : > { %2225 = vrot.lane.b32.xlu1 %v8931_v53, %s7586_s25  ;;  %6586 = vmatprep.subr.bf16.mxu0 %v5162_v28  ;;  %v10600_v53 = vld [vmem:[#allocation86_spill] sm:$0xff] }
0x1048   : > { %6587 = vmatpush3.bf16.msra.mxu0 %v5162_v28 }
0x1049   : > { %2229 = vrot.lane.b32.xlu1 %v10597_v4, %s7586_s25 }
0x104d   : > { %2233 = vrot.lane.b32.xlu1 %v10598_v60, %s7586_s25 }
0x1050   : > { %v9949_v25 = vpop.eup %7390 }
0x1051   : > { %5113 = vadd.xlane.f32.xlu0 %v9949_v25  ;;  %2237 = vrot.lane.b32.xlu1 %v10599_v62, %s7586_s25  ;;  %v9954_v41 = vpop.eup %7392  ;;  %v10621_v62 = vld [vmem:[#allocation44_spill] sm:$0xff] }
0x1055   : > { %5117 = vadd.xlane.f32.xlu0 %v9954_v41  ;;  %4236 = vrot.lane.b32.xlu1 %v9609_v7, %s7586_s25  ;;  %v10602_v7 = vld [vmem:[#allocation90_spill] sm:$0xff] }
0x1059   : > { %4240 = vrot.lane.b32.xlu1 %v9607_v32, %s7586_s25  ;;  %v10601_v32 = vld [vmem:[#allocation85_spill] sm:$0xff] }
0x105d   : > { %4244 = vrot.lane.b32.xlu1 %v9617_v15, %s7586_s25  ;;  %v10604_v15 = vld [vmem:[#allocation87_spill] sm:$0xff] }
0x1061   : > { %4248 = vrot.lane.b32.xlu1 %v9615_v50, %s7586_s25  ;;  %v10603_v50 = vld [vmem:[#allocation19_spill] sm:$0xff] }
0x1065   : > { %4252 = vrot.lane.b32.xlu1 %v9625_v47, %s7586_s25  ;;  %v10606_v47 = vld [vmem:[#allocation89_spill] sm:$0xff] }
0x1069   : > { %4256 = vrot.lane.b32.xlu1 %v9623_v63, %s7586_s25  ;;  %v10605_v63 = vld [vmem:[#allocation43_spill] sm:$0xff] }
0x106b   : > { %2209 = vrot.lane.b32.xlu0 %v10600_v53, %s7586_s25 }
0x106d   : > { %4260 = vrot.lane.b32.xlu1 %v9633_v44, %s7586_s25  ;;  %v10607_v44 = vld [vmem:[#allocation74_spill] sm:$0xff] }
0x106f   : > { %2215 = vrot.lane.b32.xlu0 %v10601_v32, %s7586_s25 }
0x1071   : > { %4264 = vrot.lane.b32.xlu1 %v9631_v16, %s7586_s25  ;;  %v10608_v16 = vld [vmem:[#allocation91_spill] sm:$0xff] }
0x1073   : > { %2219 = vrot.lane.b32.xlu0 %v10602_v7, %s7586_s25 }
0x1075   : > { %2740 = vrot.lane.b32.xlu1 %v10603_v50, %s7585_s20 }
0x1077   : > { %2223 = vrot.lane.b32.xlu0 %v10604_v15, %s7586_s25 }
0x1079   : > { %2744 = vrot.lane.b32.xlu1 %v10605_v63, %s7585_s20 }
0x107b   : > { %2227 = vrot.lane.b32.xlu0 %v10606_v47, %s7586_s25 }
0x107d   : > { %2748 = vrot.lane.b32.xlu1 %v10607_v44, %s7585_s20  ;;  %v10623_v44 = vld [vmem:[#allocation37_spill] sm:$0xff] }
0x107f   : > { %2231 = vrot.lane.b32.xlu0 %v10608_v16, %s7586_s25 }
0x1081   : > { %2752 = vrot.lane.b32.xlu1 %v10609_v6, %s7585_s20 }
0x1083   : > { %2235 = vrot.lane.b32.xlu0 %v10610_v11, %s7586_s25 }
0x1085   : > { %2756 = vrot.lane.b32.xlu1 %v10611_v61, %s7585_s20 }
0x1087   : > { %2239 = vrot.lane.b32.xlu0 %v10612_v3, %s7586_s25 }
0x1089   : > { %v5092_v13 = vpop.xlane.xlu1 %5091  ;;  %2760 = vrot.lane.b32.xlu1 %v10613_v36, %s7585_s20 }
0x108b   : > { %4238 = vrot.lane.b32.xlu0 %v9613_v18, %s7586_s25  ;;  %v10618_v18 = vld [vmem:[#allocation57_spill] sm:$0xff] }
0x108d   : > { %v5088_v58 = vpop.xlane.xlu1 %5087  ;;  %2764 = vrot.lane.b32.xlu1 %v10614_v59, %s7585_s20 }
0x108e   : > { %7394 = vrcp.f32 %v5088_v58 }
0x108f   : > { %4242 = vrot.lane.b32.xlu0 %v10615_v2, %s7586_s25 }
0x1091   : > { %v5094_v8 = vpop.xlane.xlu1 %5093  ;;  %2768 = vrot.lane.b32.xlu1 %v10616_v29, %s7585_s20 }
0x1093   : > { %4246 = vrot.lane.b32.xlu0 %v10617_v54, %s7586_s25  ;;  %v5100_v45 = vpop.xlane.xlu0 %5099  ;;  %v10627_v54 = vld [vmem:[#allocation45_spill] sm:$0xff] }
0x1095   : > { %v5090_v21 = vpop.xlane.xlu1 %5089  ;;  %4766 = vrot.lane.b32.xlu1 %v9823_v42, %s7585_s20  ;;  %v10620_v42 = vld [vmem:[#allocation54_spill] sm:$0xff] }
0x1096   : > { %7396 = vrcp.f32 %v5090_v21 }
0x1097   : > { %4250 = vrot.lane.b32.xlu0 %v10618_v18, %s7586_s25  ;;  %v5096_v51 = vpop.xlane.xlu0 %5095  ;;  %7398 = vrcp.f32 %v5094_v8 }
0x1099   : > { %4770 = vrot.lane.b32.xlu1 %v9821_v56, %s7585_s20  ;;  %v5098_v14 = vpop.xlane.xlu1 %5097 }
0x109a   : > { %7400 = vrcp.f32 %v5098_v14 }
0x109b   : > { %4254 = vrot.lane.b32.xlu0 %v10619_v1, %s7586_s25  ;;  %v5102_v30 = vpop.xlane.xlu0 %5101  ;;  %7402 = vrcp.f32 %v5092_v13  ;;  %v7395_v4 = vpop.eup %7394  ;;  %v10629_v1 = vld [vmem:[#allocation95_spill] sm:$0xff] }
0x109c   : > { %7404 = vrcp.f32 %v5096_v51  ;;  %v5135_v32 = vmul.f32 %v7395_v4, %v9887_v31  ;;  %v10628_v51 = vld [vmem:[#allocation94_spill] sm:$0xff] }
0x109d   : > { %4774 = vrot.lane.b32.xlu1 %v9831_v49, %s7585_s20  ;;  %7406 = vrcp.f32 %v5102_v30  ;;  %v10630_v30 = vld [vmem:[#allocation76_spill] sm:$0xff] }
0x109f   : > { %4258 = vrot.lane.b32.xlu0 %v10620_v42, %s7586_s25  ;;  %v5108_v28 = vpop.xlane.xlu0 %5107 }
0x10a1   : > { %v5106_v60 = vpop.xlane.xlu1 %5105  ;;  %4778 = vrot.lane.b32.xlu1 %v9829_v26, %s7585_s20  ;;  %v10622_v26 = vld [vmem:[#allocation50_spill] sm:$0xff] }
0x10a3   : > { %v7397_v56 = vpop.eup %7396  ;;  %4262 = vrot.lane.b32.xlu0 %v10621_v62, %s7586_s25  ;;  %v5104_v53 = vpop.xlane.xlu0 %5103  ;;  %v10634_v62 = vld [vmem:[#allocation82_spill] sm:$0xff] }
0x10a4   : > { %v5136_v49 = vmul.f32 %v7397_v56, %v9900_v17  ;;  %7408 = vrcp.f32 %v5104_v53  ;;  %v7399_v15 = vpop.eup %7398 }
0x10a5   : > { %v10029_v7 = vpop.xlane.xlu1 %5115  ;;  %4782 = vrot.lane.b32.xlu1 %v9839_v19, %s7585_s20  ;;  %7410 = vrcp.f32 %v5100_v45  ;;  %v5138_v16 = vmul.f32 %v7399_v15, %v9892_v12  ;;  %v10638_v15 = vld [vmem:[#allocation61_spill] sm:$0xff] }
0x10a6   : > { %v5151_v50 = vpack.c.bf16 %v5136_v49, %v5135_v32  ;;  %7412 = vrcp.f32 %v5106_v60  ;;  %v10632_v60 = vld [vmem:[#allocation73_spill] sm:$0xff]  ;;  %v10636_v32 = vld [vmem:[#allocation67_spill] sm:$0xff] }
0x10a7   : > { %4266 = vrot.lane.b32.xlu0 %v10622_v26, %s7586_s25  ;;  %v5110_v63 = vpop.xlane.xlu0 %5109  ;;  %v7401_v17 = vpop.eup %7400 }
0x10a8   : > { %6590 = vmatprep.mubr.bf16.mxu0 %v5151_v50  ;;  %v7403_v47 = vpop.eup %7402  ;;  %7414 = vrcp.f32 %v5110_v63  ;;  %v5140_v11 = vmul.f32 %v7401_v17, %v9907_v43  ;;  %v10625_v43 = vld [vmem:[#allocation53_spill] sm:$0xff]  ;;  %v10637_v50 = vld [vmem:[#allocation63_spill] sm:$0xff] }
0x10a9   : > { %4786 = vrot.lane.b32.xlu1 %v9837_v57, %s7585_s20  ;;  %v10037_v31 = vpop.xlane.xlu1 %5111  ;;  %v7405_v19 = vpop.eup %7404  ;;  %v5137_v61 = vmul.f32 %v7403_v47, %v9884_v40  ;;  %7416 = vrcp.f32 %v5108_v28  ;;  %v10624_v57 = vld [vmem:[#allocation83_spill] sm:$0xff]  ;;  %v10631_v28 = vld [vmem:[#allocation49_spill] sm:$0xff] }
0x10aa   : > { %v5139_v3 = vmul.f32 %v7405_v19, %v9904_v0  ;;  %v7407_v12 = vpop.eup %7406  ;;  %v10626_v0 = vld [vmem:[#allocation79_spill] sm:$0xff]  ;;  %7418 = vrcp.f32 %v10037_v31 }
0x10ab   : > { %2742 = vrot.lane.b32.xlu0 %v10623_v44, %s7585_s20  ;;  %v5152_v13 = vpack.c.bf16 %v5138_v16, %v5137_v61  ;;  %v5142_v2 = vmul.f32 %v7407_v12, %v9910_v52  ;;  %v10639_v61 = vld [vmem:[#allocation78_spill] sm:$0xff] }
0x10ac   : > { %v5153_v36 = vpack.c.bf16 %v5140_v11, %v5139_v3 }
0x10ad   : > { %4790 = vrot.lane.b32.xlu1 %v9847_v48, %s7585_s20  ;;  %v5160_v6 = vpop.permute.xlu1 %5159 }
0x10ae   : > { %6588 = vmatprep.subr.bf16.mxu0 %v5160_v6 }
0x10af   : > { %2746 = vrot.lane.b32.xlu0 %v10624_v57, %s7585_s20  ;;  %6589 = vmatpush3.bf16.msra.mxu0 %v5160_v6 }
0x10b1   : > { %4794 = vrot.lane.b32.xlu1 %v9845_v37, %s7585_s20  ;;  %v2212_v48 = vpop.permute.xlu1 %2211  ;;  %v7409_v58 = vpop.eup %7408 }
0x10b2   : > { %2259 = vst.msk [vmem:[#allocation2 + $0x10] sm:$0xff] %vm2257_vm1, %v2212_v48  ;;  %6591 = vmatmul.mubr.bf16.vlgmr.msra.gmra.mxu0 %v5152_v13  ;;  %v7411_v40 = vpop.eup %7410  ;;  %v5143_v37 = vmul.f32 %v7409_v58, %v9919_v9 }
0x10b3   : > { %2750 = vrot.lane.b32.xlu0 %v10625_v43, %s7585_s20  ;;  %6594 = vmatprep.mubr.bf16.mxu0 %v5153_v36  ;;  %v7413_v59 = vpop.eup %7412  ;;  %v5141_v29 = vmul.f32 %v7411_v40, %v9897_v46  ;;  %v10642_v43 = vld [vmem:[#allocation77_spill] sm:$0xff] }
0x10b4   : > { %v5144_v45 = vmul.f32 %v7413_v59, %v9916_v5 }
0x10b5   : > { %3271 = vrot.lane.b32.xlu1 %v10626_v0, %s7584_s18  ;;  %v2214_v8 = vpop.permute.xlu1 %2213  ;;  %v5154_v21 = vpack.c.bf16 %v5142_v2, %v5141_v29  ;;  %v7415_v18 = vpop.eup %7414  ;;  %v10643_v0 = vld [vmem:[#allocation66_spill] sm:$0xff]  ;;  %v10644_v29 = vld [vmem:[#allocation65_spill] sm:$0xff] }
0x10b6   : > { %2260 = vst.msk [vmem:[#allocation2 + $0x20] sm:$0xff] %vm2257_vm1, %v2214_v8  ;;  %v5155_v14 = vpack.c.bf16 %v5144_v45, %v5143_v37  ;;  %v7417_v9 = vpop.eup %7416  ;;  %v5146_v46 = vmul.f32 %v7415_v18, %v9925_v20  ;;  %v10633_v20 = vld [vmem:[#allocation96_spill] sm:$0xff] }
0x10b7   : > { %2754 = vrot.lane.b32.xlu0 %v10627_v54, %s7585_s20  ;;  %v5145_v42 = vmul.f32 %v7417_v9, %v9913_v22  ;;  %v10635_v22 = vld [vmem:[#allocation47_spill] sm:$0xff]  ;;  %v7419_v44 = vpop.eup %7418 }
0x10b8   : > { %v5147_v16 = vmul.f32 %v7419_v44, %v9928_v10 }
0x10b9   : > { %3275 = vrot.lane.b32.xlu1 %v10628_v51, %s7584_s18  ;;  %v2218_v52 = vpop.permute.xlu1 %2217  ;;  %v5156_v4 = vpack.c.bf16 %v5146_v46, %v5145_v42 }
0x10ba   : > { %2262 = vst.msk [vmem:[#allocation2 + $0x40] sm:$0xff] %vm2257_vm1, %v2218_v52  ;;  %6595 = vmatmul.mubr.bf16.gmra.mxu0 %v5154_v21  ;;  %v10645_v21 = vld [vmem:[#allocation59_spill] sm:$0xff]  ;;  %v10646_v52 = vld [vmem:[#allocation58_spill] sm:$0xff] }
0x10bb   : > { %2758 = vrot.lane.b32.xlu0 %v10629_v1, %s7585_s20  ;;  %6598 = vmatprep.mubr.bf16.mxu0 %v5155_v14 }
0x10bd   : > { %3279 = vrot.lane.b32.xlu1 %v10630_v30, %s7584_s18  ;;  %v2222_v5 = vpop.permute.xlu1 %2221 }
0x10be   : > { %2264 = vst.msk [vmem:[#allocation2 + $0x60] sm:$0xff] %vm2257_vm1, %v2222_v5 }
0x10bf   : > { %2762 = vrot.lane.b32.xlu0 %v10631_v28, %s7585_s20 }
0x10c1   : > { %3283 = vrot.lane.b32.xlu1 %v10632_v60, %s7584_s18  ;;  %v2226_v56 = vpop.permute.xlu1 %2225 }
0x10c2   : > { %2266 = vst.msk [vmem:[#allocation2 + $0x80] sm:$0xff] %vm2257_vm1, %v2226_v56  ;;  %6599 = vmatmul.mubr.bf16.gmra.mxu0 %v5156_v4 }
0x10c3   : > { %2766 = vrot.lane.b32.xlu0 %v10633_v20, %s7585_s20 }
0x10c5   : > { %3287 = vrot.lane.b32.xlu1 %v10634_v62, %s7584_s18  ;;  %v2230_v53 = vpop.permute.xlu1 %2229 }
0x10c6   : > { %2268 = vst.msk [vmem:[#allocation2 + $0xa0] sm:$0xff] %vm2257_vm1, %v2230_v53 }
0x10c7   : > { %2770 = vrot.lane.b32.xlu0 %v10635_v22, %s7585_s20 }
0x10c9   : > { %3291 = vrot.lane.b32.xlu1 %v10636_v32, %s7584_s18  ;;  %v2234_v49 = vpop.permute.xlu1 %2233 }
0x10ca   : > { %2270 = vst.msk [vmem:[#allocation2 + $0xc0] sm:$0xff] %vm2257_vm1, %v2234_v49 }
0x10cb   : > { %4768 = vrot.lane.b32.xlu0 %v9827_v23, %s7585_s20 }
0x10cd   : > { %3295 = vrot.lane.b32.xlu1 %v10637_v50, %s7584_s18  ;;  %v2238_v26 = vpop.permute.xlu1 %2237 }
0x10ce   : > { %2272 = vst.msk [vmem:[#allocation2 + $0xe0] sm:$0xff] %vm2257_vm1, %v2238_v26 }
0x10cf   : > { %4772 = vrot.lane.b32.xlu0 %v9825_v24, %s7585_s20 }
0x10d1   : > { %3299 = vrot.lane.b32.xlu1 %v10638_v15, %s7584_s18  ;;  %v4237_v63 = vpop.permute.xlu1 %4236 }
0x10d2   : > { %4284 = vst.msk [vmem:[#allocation2 + $0x8] sm:$0xff] %vm2257_vm1, %v4237_v63 }
0x10d3   : > { %4776 = vrot.lane.b32.xlu0 %v9835_v39, %s7585_s20 }
0x10d5   : > { %v4241_v17 = vpop.permute.xlu1 %4240 }
0x10d6   : > { %4286 = vst.msk [vmem:[#allocation2 + $0x28] sm:$0xff] %vm2257_vm1, %v4241_v17 }
0x10d7   : > { %4780 = vrot.lane.b32.xlu0 %v9833_v38, %s7585_s20 }
0x10d9   : > { %v4245_v23 = vpop.permute.xlu1 %4244 }
0x10da   : > { %4288 = vst.msk [vmem:[#allocation2 + $0x48] sm:$0xff] %vm2257_vm1, %v4245_v23  ;;  %v5114_v24 = vpop.xlane.xlu0 %5113 }
0x10db   : > { %7420 = vrcp.f32 %v5114_v24  ;;  %4784 = vrot.lane.b32.xlu0 %v9843_v34, %s7585_s20 }
0x10dc   : > { %7422 = vrcp.f32 %v10029_v7 }
0x10dd   : > { %v4249_v47 = vpop.permute.xlu1 %4248 }
0x10de   : > { %4290 = vst.msk [vmem:[#allocation2 + $0x68] sm:$0xff] %vm2257_vm1, %v4249_v47  ;;  %v5118_v39 = vpop.xlane.xlu0 %5117 }
0x10df   : > { %7424 = vrcp.f32 %v5118_v39  ;;  %4788 = vrot.lane.b32.xlu0 %v9841_v33, %s7585_s20 }
0x10e1   : > { %v4253_v38 = vpop.permute.xlu1 %4252 }
0x10e2   : > { %4292 = vst.msk [vmem:[#allocation2 + $0x88] sm:$0xff] %vm2257_vm1, %v4253_v38  ;;  %v2210_v31 = vpop.permute.xlu0 %2209 }
0x10e3   : > { %2258 = vst.msk [vmem:[#allocation2] sm:$0xff] %vm2257_vm1, %v2210_v31  ;;  %4792 = vrot.lane.b32.xlu0 %v9851_v35, %s7585_s20 }
0x10e5   : > { %v4257_v34 = vpop.permute.xlu1 %4256 }
0x10e6   : > { %4294 = vst.msk [vmem:[#allocation2 + $0xa8] sm:$0xff] %vm2257_vm1, %v4257_v34  ;;  %v2216_v7 = vpop.permute.xlu0 %2215 }
0x10e7   : > { %2261 = vst.msk [vmem:[#allocation2 + $0x30] sm:$0xff] %vm2257_vm1, %v2216_v7  ;;  %4796 = vrot.lane.b32.xlu0 %v9849_v55, %s7585_s20 }
0x10e8   : > { %v7421_v33 = vpop.eup %7420 }
0x10e9   : > { %v4261_v19 = vpop.permute.xlu1 %4260  ;;  %v5148_v6 = vmul.f32 %v7421_v33, %v9949_v25  ;;  %v7423_v11 = vpop.eup %7422  ;;  %v10640_v25 = vld [vmem:[#allocation56_spill] sm:$0xff] }
0x10ea   : > { %4296 = vst.msk [vmem:[#allocation2 + $0xc8] sm:$0xff] %vm2257_vm1, %v4261_v19  ;;  %v2220_v35 = vpop.permute.xlu0 %2219  ;;  %v5149_v55 = vmul.f32 %v7423_v11, %v9922_v27  ;;  %v10641_v27 = vld [vmem:[#allocation13_spill] sm:$0xff] }
0x10eb   : > { %2263 = vst.msk [vmem:[#allocation2 + $0x50] sm:$0xff] %vm2257_vm1, %v2220_v35  ;;  %3273 = vrot.lane.b32.xlu0 %v10639_v61, %s7584_s18  ;;  %v5157_v57 = vpack.c.bf16 %v5148_v6, %v5147_v16 }
0x10ec   : > { %v7425_v3 = vpop.eup %7424 }
0x10ed   : > { %v4265_v13 = vpop.permute.xlu1 %4264  ;;  %6602 = vmatprep.mubr.bf16.mxu0 %v5157_v57  ;;  %v5150_v12 = vmul.f32 %v7425_v3, %v9954_v41 }
0x10ee   : > { %4298 = vst.msk [vmem:[#allocation2 + $0xe8] sm:$0xff] %vm2257_vm1, %v4265_v13  ;;  %v2224_v10 = vpop.permute.xlu0 %2223 }
0x10ef   : > { %2265 = vst.msk [vmem:[#allocation2 + $0x70] sm:$0xff] %vm2257_vm1, %v2224_v10  ;;  %3277 = vrot.lane.b32.xlu0 %v10640_v25, %s7584_s18  ;;  %v5158_v48 = vpack.c.bf16 %v5150_v12, %v5149_v55 }
0x10f1   : > { %v2741_v36 = vpop.permute.xlu1 %2740  ;;  %6603 = vmatmul.mubr.bf16.gmra.mxu0 %v5158_v48 }
0x10f2   : > { %2789 = vst.msk [vmem:[#allocation2] sm:$0xff] %vm2788_vm2, %v2741_v36  ;;  %v2228_v58 = vpop.permute.xlu0 %2227 }
0x10f3   : > { %2267 = vst.msk [vmem:[#allocation2 + $0x90] sm:$0xff] %vm2257_vm1, %v2228_v58  ;;  %3281 = vrot.lane.b32.xlu0 %v10641_v27, %s7584_s18 }
0x10f5   : > { %v2745_v41 = vpop.permute.xlu1 %2744 }
0x10f6   : > { %2791 = vst.msk [vmem:[#allocation2 + $0x20] sm:$0xff] %vm2788_vm2, %v2745_v41  ;;  %v2232_v40 = vpop.permute.xlu0 %2231 }
0x10f7   : > { %2269 = vst.msk [vmem:[#allocation2 + $0xb0] sm:$0xff] %vm2257_vm1, %v2232_v40  ;;  %3285 = vrot.lane.b32.xlu0 %v10642_v43, %s7584_s18 }
0x10f9   : > { %v2749_v59 = vpop.permute.xlu1 %2748 }
0x10fa   : > { %2793 = vst.msk [vmem:[#allocation2 + $0x40] sm:$0xff] %vm2788_vm2, %v2749_v59  ;;  %v2236_v2 = vpop.permute.xlu0 %2235 }
0x10fb   : > { %2271 = vst.msk [vmem:[#allocation2 + $0xd0] sm:$0xff] %vm2257_vm1, %v2236_v2  ;;  %3289 = vrot.lane.b32.xlu0 %v10643_v0, %s7584_s18 }
0x10fd   : > { %v2753_v8 = vpop.permute.xlu1 %2752 }
0x10fe   : > { %2795 = vst.msk [vmem:[#allocation2 + $0x60] sm:$0xff] %vm2788_vm2, %v2753_v8  ;;  %v2240_v37 = vpop.permute.xlu0 %2239 }
0x10ff   : > { %2273 = vst.msk [vmem:[#allocation2 + $0xf0] sm:$0xff] %vm2257_vm1, %v2240_v37  ;;  %3293 = vrot.lane.b32.xlu0 %v10644_v29, %s7584_s18 }
0x1101   : > { %v2757_v54 = vpop.permute.xlu1 %2756 }
0x1102   : > { %2797 = vst.msk [vmem:[#allocation2 + $0x80] sm:$0xff] %vm2788_vm2, %v2757_v54  ;;  %v4239_v45 = vpop.permute.xlu0 %4238 }
0x1103   : > { %4285 = vst.msk [vmem:[#allocation2 + $0x18] sm:$0xff] %vm2257_vm1, %v4239_v45  ;;  %3297 = vrot.lane.b32.xlu0 %v10645_v21, %s7584_s18 }
0x1105   : > { %v2761_v18 = vpop.permute.xlu1 %2760 }
0x1106   : > { %2799 = vst.msk [vmem:[#allocation2 + $0xa0] sm:$0xff] %vm2788_vm2, %v2761_v18  ;;  %v4243_v51 = vpop.permute.xlu0 %4242 }
0x1107   : > { %4287 = vst.msk [vmem:[#allocation2 + $0x38] sm:$0xff] %vm2257_vm1, %v4243_v51  ;;  %3301 = vrot.lane.b32.xlu0 %v10646_v52, %s7584_s18 }
0x1109   : > { %v2765_v14 = vpop.permute.xlu1 %2764 }
0x110a   : > { %2801 = vst.msk [vmem:[#allocation2 + $0xc0] sm:$0xff] %vm2788_vm2, %v2765_v14  ;;  %v4247_v9 = vpop.permute.xlu0 %4246 }
0x110b   : > { %4289 = vst.msk [vmem:[#allocation2 + $0x58] sm:$0xff] %vm2257_vm1, %v4247_v9 }
0x110d   : > { %v2769_v1 = vpop.permute.xlu1 %2768 }
0x110e   : > { %2803 = vst.msk [vmem:[#allocation2 + $0xe0] sm:$0xff] %vm2788_vm2, %v2769_v1  ;;  %v4251_v46 = vpop.permute.xlu0 %4250 }
0x110f   : > { %4291 = vst.msk [vmem:[#allocation2 + $0x78] sm:$0xff] %vm2257_vm1, %v4251_v46 }
0x1111   : > { %v4767_v30 = vpop.permute.xlu1 %4766 }
0x1112   : > { %4814 = vst.msk [vmem:[#allocation2 + $0x8] sm:$0xff] %vm2788_vm2, %v4767_v30  ;;  %v4255_v5 = vpop.permute.xlu0 %4254 }
0x1113   : > { %4293 = vst.msk [vmem:[#allocation2 + $0x98] sm:$0xff] %vm2257_vm1, %v4255_v5 }
0x1115   : > { %v4771_v42 = vpop.permute.xlu1 %4770 }
0x1116   : > { %4816 = vst.msk [vmem:[#allocation2 + $0x28] sm:$0xff] %vm2788_vm2, %v4771_v42  ;;  %v4259_v28 = vpop.permute.xlu0 %4258 }
0x1117   : > { %4295 = vst.msk [vmem:[#allocation2 + $0xb8] sm:$0xff] %vm2257_vm1, %v4259_v28 }
0x1119   : > { %v4775_v4 = vpop.permute.xlu1 %4774 }
0x111a   : > { %4818 = vst.msk [vmem:[#allocation2 + $0x48] sm:$0xff] %vm2788_vm2, %v4775_v4  ;;  %v4263_v60 = vpop.permute.xlu0 %4262 }
0x111b   : > { %4297 = vst.msk [vmem:[#allocation2 + $0xd8] sm:$0xff] %vm2257_vm1, %v4263_v60 }
0x111d   : > { %v4779_v56 = vpop.permute.xlu1 %4778 }
0x111e   : > { %4820 = vst.msk [vmem:[#allocation2 + $0x68] sm:$0xff] %vm2788_vm2, %v4779_v56  ;;  %v4267_v20 = vpop.permute.xlu0 %4266 }
0x111f   : > { %4299 = vst.msk [vmem:[#allocation2 + $0xf8] sm:$0xff] %vm2257_vm1, %v4267_v20 }
0x1121   : > { %v4783_v62 = vpop.permute.xlu1 %4782 }
0x1122   : > { %4822 = vst.msk [vmem:[#allocation2 + $0x88] sm:$0xff] %vm2788_vm2, %v4783_v62  ;;  %v2743_v53 = vpop.permute.xlu0 %2742 }
0x1123   : > { %2790 = vst.msk [vmem:[#allocation2 + $0x10] sm:$0xff] %vm2788_vm2, %v2743_v53 }
0x1125   : > { %v4787_v22 = vpop.permute.xlu1 %4786 }
0x1126   : > { %4824 = vst.msk [vmem:[#allocation2 + $0xa8] sm:$0xff] %vm2788_vm2, %v4787_v22  ;;  %v2747_v32 = vpop.permute.xlu0 %2746 }
0x1127   : > { %2792 = vst.msk [vmem:[#allocation2 + $0x30] sm:$0xff] %vm2788_vm2, %v2747_v32 }
0x1129   : > { %v4791_v49 = vpop.permute.xlu1 %4790 }
0x112a   : > { %4826 = vst.msk [vmem:[#allocation2 + $0xc8] sm:$0xff] %vm2788_vm2, %v4791_v49  ;;  %v2751_v50 = vpop.permute.xlu0 %2750 }
0x112b   : > { %2794 = vst.msk [vmem:[#allocation2 + $0x50] sm:$0xff] %vm2788_vm2, %v2751_v50 }
0x112d   : > { %v4795_v26 = vpop.permute.xlu1 %4794 }
0x112e   : > { %4828 = vst.msk [vmem:[#allocation2 + $0xe8] sm:$0xff] %vm2788_vm2, %v4795_v26  ;;  %v2755_v15 = vpop.permute.xlu0 %2754 }
0x112f   : > { %2796 = vst.msk [vmem:[#allocation2 + $0x70] sm:$0xff] %vm2788_vm2, %v2755_v15 }
0x1131   : > { %v3272_v63 = vpop.permute.xlu1 %3271 }
0x1132   : > { %3320 = vst.msk [vmem:[#allocation2] sm:$0xff] %vm3319_vm3, %v3272_v63  ;;  %v2759_v17 = vpop.permute.xlu0 %2758 }
0x1133   : > { %2798 = vst.msk [vmem:[#allocation2 + $0x90] sm:$0xff] %vm2788_vm2, %v2759_v17 }
0x1135   : > { %v3276_v23 = vpop.permute.xlu1 %3275 }
0x1136   : > { %3322 = vst.msk [vmem:[#allocation2 + $0x20] sm:$0xff] %vm3319_vm3, %v3276_v23  ;;  %v2763_v24 = vpop.permute.xlu0 %2762 }
0x1137   : > { %2800 = vst.msk [vmem:[#allocation2 + $0xb0] sm:$0xff] %vm2788_vm2, %v2763_v24 }
0x1139   : > { %v3280_v47 = vpop.permute.xlu1 %3279  ;;  %v5360_v4 = vld [vmem:[#allocation2] sm:$0xff] }
0x113a   : > { %3324 = vst.msk [vmem:[#allocation2 + $0x40] sm:$0xff] %vm3319_vm3, %v3280_v47  ;;  %v2767_v39 = vpop.permute.xlu0 %2766 }
0x113b   : > { %2802 = vst.msk [vmem:[#allocation2 + $0xd0] sm:$0xff] %vm2788_vm2, %v2767_v39 }
0x113d   : > { %v3284_v38 = vpop.permute.xlu1 %3283  ;;  %v5364_v46 = vld [vmem:[#allocation2 + $0x20] sm:$0xff] }
0x113e   : > { %3326 = vst.msk [vmem:[#allocation2 + $0x60] sm:$0xff] %vm3319_vm3, %v3284_v38  ;;  %v2771_v31 = vpop.permute.xlu0 %2770 }
0x113f   : > { %2804 = vst.msk [vmem:[#allocation2 + $0xf0] sm:$0xff] %vm2788_vm2, %v2771_v31 }
0x1141   : > { %v3288_v34 = vpop.permute.xlu1 %3287  ;;  %v5368_v47 = vld [vmem:[#allocation2 + $0x40] sm:$0xff] }
0x1142   : > { %3328 = vst.msk [vmem:[#allocation2 + $0x80] sm:$0xff] %vm3319_vm3, %v3288_v34  ;;  %v4769_v44 = vpop.permute.xlu0 %4768 }
0x1143   : > { %4815 = vst.msk [vmem:[#allocation2 + $0x18] sm:$0xff] %vm2788_vm2, %v4769_v44 }
0x1145   : > { %v3292_v7 = vpop.permute.xlu1 %3291  ;;  %v5372_v49 = vld [vmem:[#allocation2 + $0x60] sm:$0xff] }
0x1146   : > { %3330 = vst.msk [vmem:[#allocation2 + $0xa0] sm:$0xff] %vm3319_vm3, %v3292_v7  ;;  %v4773_v33 = vpop.permute.xlu0 %4772 }
0x1147   : > { %4817 = vst.msk [vmem:[#allocation2 + $0x38] sm:$0xff] %vm2788_vm2, %v4773_v33 }
0x1149   : > { %v3296_v19 = vpop.permute.xlu1 %3295 }
0x114a   : > { %3332 = vst.msk [vmem:[#allocation2 + $0xc0] sm:$0xff] %vm3319_vm3, %v3296_v19  ;;  %v4777_v16 = vpop.permute.xlu0 %4776 }
0x114b   : > { %4819 = vst.msk [vmem:[#allocation2 + $0x58] sm:$0xff] %vm2788_vm2, %v4777_v16 }
0x114d   : > { %v3300_v6 = vpop.permute.xlu1 %3299  ;;  %v5380_v19 = vld [vmem:[#allocation2 + $0xa0] sm:$0xff] }
0x114e   : > { %3334 = vst.msk [vmem:[#allocation2 + $0xe0] sm:$0xff] %vm3319_vm3, %v3300_v6  ;;  %v4781_v11 = vpop.permute.xlu0 %4780 }
0x114f   : > { %4821 = vst.msk [vmem:[#allocation2 + $0x78] sm:$0xff] %vm2788_vm2, %v4781_v11 }
0x1152   : > { %v4785_v35 = vpop.permute.xlu0 %4784 }
0x1153   : > { %4823 = vst.msk [vmem:[#allocation2 + $0x98] sm:$0xff] %vm2788_vm2, %v4785_v35 }
0x1156   : > { %v4789_v61 = vpop.permute.xlu0 %4788 }
0x1157   : > { %4825 = vst.msk [vmem:[#allocation2 + $0xb8] sm:$0xff] %vm2788_vm2, %v4789_v61 }
0x115a   : > { %v4793_v57 = vpop.permute.xlu0 %4792 }
0x115b   : > { %4827 = vst.msk [vmem:[#allocation2 + $0xd8] sm:$0xff] %vm2788_vm2, %v4793_v57 }
0x115e   : > { %v4797_v3 = vpop.permute.xlu0 %4796 }
0x115f   : > { %4829 = vst.msk [vmem:[#allocation2 + $0xf8] sm:$0xff] %vm2788_vm2, %v4797_v3  ;;  %v5376_v3 = vld [vmem:[#allocation2 + $0x80] sm:$0xff] }
0x1162   : > { %v3274_v13 = vpop.permute.xlu0 %3273 }
0x1163   : > { %3321 = vst.msk [vmem:[#allocation2 + $0x10] sm:$0xff] %vm3319_vm3, %v3274_v13 }
0x1166   : > { %v3278_v55 = vpop.permute.xlu0 %3277 }
0x1167   : > { %3323 = vst.msk [vmem:[#allocation2 + $0x30] sm:$0xff] %vm3319_vm3, %v3278_v55 }
0x116a   : > { %v3282_v12 = vpop.permute.xlu0 %3281  ;;  %v5362_v50 = vld [vmem:[#allocation2 + $0x10] sm:$0xff] }
0x116b   : > { %3325 = vst.msk [vmem:[#allocation2 + $0x50] sm:$0xff] %vm3319_vm3, %v3282_v12 }
0x116e   : > { %v3286_v10 = vpop.permute.xlu0 %3285  ;;  %v5366_v60 = vld [vmem:[#allocation2 + $0x30] sm:$0xff] }
0x116f   : > { %3327 = vst.msk [vmem:[#allocation2 + $0x70] sm:$0xff] %vm3319_vm3, %v3286_v10 }
0x1172   : > { %v6592_v25 = vpop.f32.mrf.mxu0  ;;  %v3290_v48 = vpop.permute.xlu0 %3289  ;;  %v5370_v16 = vld [vmem:[#allocation2 + $0x50] sm:$0xff] }
0x1173   : > { %3329 = vst.msk [vmem:[#allocation2 + $0x90] sm:$0xff] %vm3319_vm3, %v3290_v48  ;;  %5300 = vrot.lane.b32.xlu1 %v6592_v25, %s7584_s18 }
0x1174   : > { %v5217_v36 = vpop.f32.mrf.mxu0 }
0x1176   : > { %v6593_v58 = vpop.f32.mrf.mxu0  ;;  %v3294_v27 = vpop.permute.xlu0 %3293  ;;  %v5374_v39 = vld [vmem:[#allocation2 + $0x70] sm:$0xff] }
0x1177   : > { %3331 = vst.msk [vmem:[#allocation2 + $0xb0] sm:$0xff] %vm3319_vm3, %v3294_v27  ;;  %5296 = vrot.lane.b32.xlu1 %v5217_v36, %s7584_s18  ;;  %5302 = vrot.lane.b32.xlu0 %v6593_v58, %s7584_s18 }
0x1178   : > { %v5220_v41 = vpop.f32.mrf.mxu0 }
0x117a   : > { %v6596_v40 = vpop.f32.mrf.mxu0  ;;  %v3298_v43 = vpop.permute.xlu0 %3297  ;;  %v5378_v48 = vld [vmem:[#allocation2 + $0x90] sm:$0xff] }
0x117b   : > { %3333 = vst.msk [vmem:[#allocation2 + $0xd0] sm:$0xff] %vm3319_vm3, %v3298_v43  ;;  %5298 = vrot.lane.b32.xlu0 %v5220_v41, %s7584_s18  ;;  %5308 = vrot.lane.b32.xlu1 %v6596_v40, %s7584_s18  ;;  %v5384_v43 = vld [vmem:[#allocation2 + $0xc0] sm:$0xff] }
0x117c   : > { %v5233_v59 = vpop.f32.mrf.mxu0 }
0x117e   : > { %v6597_v2 = vpop.f32.mrf.mxu0  ;;  %v3302_v0 = vpop.permute.xlu0 %3301  ;;  %v5382_v13 = vld [vmem:[#allocation2 + $0xb0] sm:$0xff] }
0x117f   : > { %3335 = vst.msk [vmem:[#allocation2 + $0xf0] sm:$0xff] %vm3319_vm3, %v3302_v0  ;;  %5304 = vrot.lane.b32.xlu1 %v5233_v59, %s7584_s18  ;;  %5310 = vrot.lane.b32.xlu0 %v6597_v2, %s7584_s18 }
0x1180   : > { %v5236_v8 = vpop.f32.mrf.mxu0 }
0x1182   : > { %v6600_v37 = vpop.f32.mrf.mxu0 }
0x1183   : > { %5306 = vrot.lane.b32.xlu0 %v5236_v8, %s7584_s18  ;;  %5316 = vrot.lane.b32.xlu1 %v6600_v37, %s7584_s18  ;;  %v5388_v8 = vld [vmem:[#allocation2 + $0xe0] sm:$0xff]  ;;  %v5386_v37 = vld [vmem:[#allocation2 + $0xd0] sm:$0xff] }
0x1184   : > { %v5249_v29 = vpop.f32.mrf.mxu0 }
0x1186   : > { %v6601_v54 = vpop.f32.mrf.mxu0 }
0x1187   : > { %5312 = vrot.lane.b32.xlu1 %v5249_v29, %s7584_s18  ;;  %5318 = vrot.lane.b32.xlu0 %v6601_v54, %s7584_s18 }
0x1188   : > { %v5252_v45 = vpop.f32.mrf.mxu0 }
0x118b   : > { %5314 = vrot.lane.b32.xlu0 %v5252_v45, %s7584_s18 }
0x11b1   : > { %v6604_v21 = vpop.f32.mrf.mxu0 }
0x11b3   : > { %v5265_v18 = vpop.f32.mrf.mxu0 }
0x11b4   : > { %5320 = vrot.lane.b32.xlu1 %v5265_v18, %s7584_s18  ;;  %v5390_v18 = vld [vmem:[#allocation2 + $0xf0] sm:$0xff] }
0x11b5   : > { %v6605_v51 = vpop.f32.mrf.mxu0 }
0x11b7   : > { %v5268_v52 = vpop.f32.mrf.mxu0 }
0x11b8   : > { %5324 = vrot.lane.b32.xlu1 %v6604_v21, %s7584_s18  ;;  %5322 = vrot.lane.b32.xlu0 %v5268_v52, %s7584_s18 }
0x11bc   : > { %5326 = vrot.lane.b32.xlu0 %v6605_v51, %s7584_s18 }
0x11e5   : > { %v5301_v14 = vpop.permute.xlu1 %5300 }
0x11e6   : > { %5346 = vst.msk [vmem:[#allocation2 + $0x28] sm:$0xff] %vm3319_vm3, %v5301_v14 }
0x11e9   : > { %v5297_v9 = vpop.permute.xlu1 %5296  ;;  %v5303_v1 = vpop.permute.xlu0 %5302 }
0x11ea   : > { %5344 = vst.msk [vmem:[#allocation2 + $0x8] sm:$0xff] %vm3319_vm3, %v5297_v9  ;;  %5347 = vst.msk [vmem:[#allocation2 + $0x38] sm:$0xff] %vm3319_vm3, %v5303_v1 }
0x11ed   : > { %v5365_v30 = vld [vmem:[#allocation2 + $0x28] sm:$0xff]  ;;  %v5309_v5 = vpop.permute.xlu1 %5308  ;;  %v5299_v42 = vpop.permute.xlu0 %5298 }
0x11ee   : > { %v5823_v28 = vpack.c.bf16 %v5365_v30, %v5364_v46  ;;  %5350 = vst.msk [vmem:[#allocation2 + $0x68] sm:$0xff] %vm3319_vm3, %v5309_v5  ;;  %5345 = vst.msk [vmem:[#allocation2 + $0x18] sm:$0xff] %vm3319_vm3, %v5299_v42 }
0x11f0   : > { %5490 = vst [vmem:[%s10226_s27 + $0x10] sm:$0xff] %v5823_v28 }
0x11f1   : > { %v5361_v56 = vld [vmem:[#allocation2 + $0x8] sm:$0xff]  ;;  %v5367_v20 = vld [vmem:[#allocation2 + $0x38] sm:$0xff]  ;;  %v5305_v62 = vpop.permute.xlu1 %5304  ;;  %v5311_v53 = vpop.permute.xlu0 %5310 }
0x11f2   : > { %v5821_v22 = vpack.c.bf16 %v5361_v56, %v5360_v4  ;;  %v5824_v32 = vpack.c.bf16 %v5367_v20, %v5366_v60  ;;  %5348 = vst.msk [vmem:[#allocation2 + $0x48] sm:$0xff] %vm3319_vm3, %v5305_v62  ;;  %5351 = vst.msk [vmem:[#allocation2 + $0x78] sm:$0xff] %vm3319_vm3, %v5311_v53 }
0x11f4   : > { %5488 = vst [vmem:[%s10226_s27] sm:$0xff] %v5821_v22  ;;  %5491 = vst [vmem:[%s10226_s27 + $0x18] sm:$0xff] %v5824_v32 }
0x11f5   : > { %v5373_v26 = vld [vmem:[#allocation2 + $0x68] sm:$0xff]  ;;  %v5363_v15 = vld [vmem:[#allocation2 + $0x18] sm:$0xff]  ;;  %v5317_v63 = vpop.permute.xlu1 %5316  ;;  %v5307_v17 = vpop.permute.xlu0 %5306 }
0x11f6   : > { %v5827_v23 = vpack.c.bf16 %v5373_v26, %v5372_v49  ;;  %v5822_v24 = vpack.c.bf16 %v5363_v15, %v5362_v50  ;;  %5354 = vst.msk [vmem:[#allocation2 + $0xa8] sm:$0xff] %vm3319_vm3, %v5317_v63  ;;  %5349 = vst.msk [vmem:[#allocation2 + $0x58] sm:$0xff] %vm3319_vm3, %v5307_v17 }
0x11f8   : > { %5494 = vst [vmem:[%s10226_s27 + $0x30] sm:$0xff] %v5827_v23  ;;  %5489 = vst [vmem:[%s10226_s27 + $0x8] sm:$0xff] %v5822_v24 }
0x11f9   : > { %v5369_v38 = vld [vmem:[#allocation2 + $0x48] sm:$0xff]  ;;  %v5375_v31 = vld [vmem:[#allocation2 + $0x78] sm:$0xff]  ;;  %v5313_v34 = vpop.permute.xlu1 %5312  ;;  %v5319_v44 = vpop.permute.xlu0 %5318 }
0x11fa   : > { %v5825_v7 = vpack.c.bf16 %v5369_v38, %v5368_v47  ;;  %v5828_v33 = vpack.c.bf16 %v5375_v31, %v5374_v39  ;;  %5352 = vst.msk [vmem:[#allocation2 + $0x88] sm:$0xff] %vm3319_vm3, %v5313_v34  ;;  %5355 = vst.msk [vmem:[#allocation2 + $0xb8] sm:$0xff] %vm3319_vm3, %v5319_v44 }
0x11fc   : > { %5492 = vst [vmem:[%s10226_s27 + $0x20] sm:$0xff] %v5825_v7  ;;  %5495 = vst [vmem:[%s10226_s27 + $0x38] sm:$0xff] %v5828_v33 }
0x11fd   : > { %v5381_v6 = vld [vmem:[#allocation2 + $0xa8] sm:$0xff]  ;;  %v5371_v11 = vld [vmem:[#allocation2 + $0x58] sm:$0xff]  ;;  %v5315_v35 = vpop.permute.xlu0 %5314 }
0x11fe   : > { %v5831_v61 = vpack.c.bf16 %v5381_v6, %v5380_v19  ;;  %v5826_v57 = vpack.c.bf16 %v5371_v11, %v5370_v16  ;;  %5353 = vst.msk [vmem:[#allocation2 + $0x98] sm:$0xff] %vm3319_vm3, %v5315_v35 }
0x1200   : > { %5498 = vst [vmem:[%s10226_s27 + $0x50] sm:$0xff] %v5831_v61  ;;  %5493 = vst [vmem:[%s10226_s27 + $0x28] sm:$0xff] %v5826_v57 }
0x1201   : > { %v5377_v55 = vld [vmem:[#allocation2 + $0x88] sm:$0xff]  ;;  %v5383_v12 = vld [vmem:[#allocation2 + $0xb8] sm:$0xff] }
0x1202   : > { %v5829_v10 = vpack.c.bf16 %v5377_v55, %v5376_v3  ;;  %v5832_v25 = vpack.c.bf16 %v5383_v12, %v5382_v13 }
0x1204   : > { %5496 = vst [vmem:[%s10226_s27 + $0x40] sm:$0xff] %v5829_v10  ;;  %5499 = vst [vmem:[%s10226_s27 + $0x58] sm:$0xff] %v5832_v25 }
0x1205   : > { %v5379_v36 = vld [vmem:[#allocation2 + $0x98] sm:$0xff] }
0x1206   : > { %v5830_v58 = vpack.c.bf16 %v5379_v36, %v5378_v48 }
0x1208   : > { %5497 = vst [vmem:[%s10226_s27 + $0x48] sm:$0xff] %v5830_v58 }
0x1226   : > { %v5321_v27 = vpop.permute.xlu1 %5320 }
0x1227   : > { %5356 = vst.msk [vmem:[#allocation2 + $0xc8] sm:$0xff] %vm3319_vm3, %v5321_v27 }
0x122a   : > { %v5325_v41 = vpop.permute.xlu1 %5324  ;;  %v5323_v40 = vpop.permute.xlu0 %5322 }
0x122b   : > { %5358 = vst.msk [vmem:[#allocation2 + $0xe8] sm:$0xff] %vm3319_vm3, %v5325_v41  ;;  %5357 = vst.msk [vmem:[#allocation2 + $0xd8] sm:$0xff] %vm3319_vm3, %v5323_v40 }
0x122e   : > { %v5385_v59 = vld [vmem:[#allocation2 + $0xc8] sm:$0xff]  ;;  %v5327_v2 = vpop.permute.xlu0 %5326 }
0x122f   : > { %v5833_v0 = vpack.c.bf16 %v5385_v59, %v5384_v43  ;;  %5359 = vst.msk [vmem:[#allocation2 + $0xf8] sm:$0xff] %vm3319_vm3, %v5327_v2 }
0x1231   : > { %5500 = vst [vmem:[%s10226_s27 + $0x60] sm:$0xff] %v5833_v0 }
0x1232   : > { %v5389_v29 = vld [vmem:[#allocation2 + $0xe8] sm:$0xff]  ;;  %v5387_v54 = vld [vmem:[#allocation2 + $0xd8] sm:$0xff] }
0x1233   : > { %v5835_v45 = vpack.c.bf16 %v5389_v29, %v5388_v8  ;;  %v5834_v21 = vpack.c.bf16 %v5387_v54, %v5386_v37 }
0x1235   : > { %5502 = vst [vmem:[%s10226_s27 + $0x70] sm:$0xff] %v5835_v45  ;;  %5501 = vst [vmem:[%s10226_s27 + $0x68] sm:$0xff] %v5834_v21 }
0x1236   : > { %v5391_v51 = vld [vmem:[#allocation2 + $0xf8] sm:$0xff] }
0x1237   : > { %v5836_v52 = vpack.c.bf16 %v5391_v51, %v5390_v18 }
0x1239   : > { %5503 = vst [vmem:[%s10226_s27 + $0x78] sm:$0xff] %v5836_v52 }
0x123a   : > { %7520 = shalt.err (!%p7517_p9)
}
0x123b   : > { %s7521_s26 = scalar_lea.hbm %s10259_s17, 2048  ;;  %s7525_s6 = scalar_lea.hbm %s10308_s3, 4096 }
0x123c   : > { %p7522_p13 = scmp.ne.s32.totalorder %s10259_s17, %s7521_s26  ;;  %p7526_p4 = scmp.lt.s32.totalorder %s10259_s17, %s10308_s3 }
0x123d   : > { %p7527_p8 = scmp.lt.s32.totalorder %s7525_s6, %s7521_s26 }
0x123e   : > { %p7523_p5 = pnand %p7522_p13, %p10647_p10 }
0x123f   : > { %p7528_p3 = por %p7527_p8, %p7526_p4 }
0x1240   : > { %p7524_p0 = pneg %p7523_p5 }
0x1242   : > { %p7529_p11 = pnand %p7528_p3, %p7524_p0 }
0x1244   : > { %7532 = shalt.err (!%p7529_p11)
}
0x1245   : > { %s7588_s25 = smov 128   ;;  %s7589_s27 = smov 8  }
0x1246   : > { %6680 = dma.vmem_to_hbm [thread:$0]  (%p10647_p10), %s10261_s29, 2048, %s10259_s17, %s5505_s21, %s7588_s25, %s7588_s25, %s7589_s27  }
0x1247 PF: > { %s5533_s28 = sand.u32 1, %s7563_s12   ;;  %p10648_p1 = scmp.ne.s32.totalorder %s10367_s19, 0 }
0x1248   : > { %p10649_p2 = scmp.ge.s32.totalorder %s7575_s15, 2  ;;  %s5534_s8 = scalar_lea.sflag [#allocation5], %s5533_s28 }
0x124a   : > { %p6694_p6 = pnand %p10649_p2, %p10648_p1 }
0x124c   : > { %p6695_p12 = pneg %p6694_p6 }
0x124e   : > { %7558 = dma.done.wait (%p6695_p12), %s5534_s8, 2048  }
0x124f   : > { %7560 = vsyncadd (%p6695_p12), %s5534_s8, 4294965248  ;;  %p17_p7 = scmp.ge.s32.totalorder %s7682_s7, 4   ;;  %s10650_s12 = smov %s7567_s13 }
0x1250   : > { %s10651_s13 = smov %s7571_s14  ;;  %s10652_s14 = smov %s7698_s11 }
0x1251   : > { %s10653_s15 = smov %s7682_s7  ;;  %19 = sbr.rel (!%p17_p7) target bundleno = 6 (0x6), region = 85 }
0x1256   :  { %5539 = vsyncpa [#allocation4], 1 }
0x1257   :  { %5541 = vsyncpa [#allocation4 + $0x1], 1 }
0x1258   :  { %5542 = vsyncpa [#allocation7], 1 }
0x1259   :  { %5543 = vsyncpa [#allocation5], 1 }
0x125a   :  { %5545 = vsyncpa [#allocation5 + $0x1], 1 }

</bundles_post_ra>
